<compile_context>
chip_gen: v7x
topology: tpu7x:2x2x1
jax: 0.10.0
libtpu: 0.0.40
codegen_flags: <defaults>
</compile_context>

<pallas_src>
import functools

import numpy as np
import jax
import jax.numpy as jnp
from jax.experimental import pallas as pl
from jax.experimental.pallas import tpu as pltpu

MIN_DEG = 0
MAX_DEG = 8   # L = MAX_DEG - MIN_DEG degrees
FEAT_D = 3


def _round_up(v, m):
    return ((v + m - 1) // m) * m


def _ipe_kernel(x_ref, y_ref, xret_ref, yret_ref, *, scales):
    """Integrated positional encoding (y given)."""
    x = x_ref[...]   # [TN, D] f32
    y = y_ref[...]   # [TN, D] f32

    # Degree-major expansion (x[..., None, :] * scales[:, None]).reshape(...):
    # exact power-of-two splat multiplies + minor-dim concat (VPU/XLU, no MXU).
    xe = jnp.concatenate([x * s for s in scales], axis=-1)        # [TN, L*D]
    ye = jnp.concatenate([y * (s * s) for s in scales], axis=-1)  # [TN, L*D]

    # 3 transcendentals per element (EUP), everything else VPU.
    sin_xe = jnp.sin(xe)
    cos_xe = jnp.cos(xe)                 # == sin(xe + pi/2)
    e_half = jnp.exp(-0.5 * ye)
    e_sq = e_half * e_half
    e_two = e_sq * e_sq                  # == exp(-2 * ye)
    cos_2xe = 1.0 - 2.0 * sin_xe * sin_xe

    xr_a = e_half * sin_xe
    xr_b = e_half * cos_xe
    yr_a = jnp.maximum(0.0, 0.5 * (1.0 - e_two * cos_2xe) - xr_a * xr_a)
    # cos(2*(xe + pi/2)) = -cos(2*xe)
    yr_b = jnp.maximum(0.0, 0.5 * (1.0 + e_two * cos_2xe) - xr_b * xr_b)

    # Single concatenated store per output ref.
    xret_ref[...] = jnp.concatenate([xr_a, xr_b], axis=-1)
    yret_ref[...] = jnp.concatenate([yr_a, yr_b], axis=-1)


def _pe_kernel(x_ref, xret_ref, *, scales):
    """Plain positional encoding (y is None)."""
    x = x_ref[...]
    xe = jnp.concatenate([x * s for s in scales], axis=-1)
    # sin(xe + pi/2) = cos(xe)
    xret_ref[...] = jnp.concatenate([jnp.sin(xe), jnp.cos(xe)], axis=-1)


def positional_encoding(x, y=None, *, min_deg=MIN_DEG, max_deg=MAX_DEG,
                        block_n=2048):
    orig_batch = x.shape[:-1]
    d = x.shape[-1]
    L = max_deg - min_deg
    out_dim = 2 * L * d
    n = int(np.prod(orig_batch)) if len(orig_batch) else 1
    scales = tuple(float(2.0 ** i) for i in range(min_deg, max_deg))

    # Row tile: as big as block_n, but keep >= 2 grid steps when the input
    # allows it (megacore sharding on v7x) and round to the sublane multiple.
    block_rows = min(block_n, max(8, _round_up(-(-n // 2), 8)))
    n_pad = _round_up(n, block_rows)
    grid = (n_pad // block_rows,)

    xf = x.reshape(n, d).astype(jnp.float32)
    if n_pad != n:
        xf = jnp.pad(xf, ((0, n_pad - n), (0, 0)))

    x_spec = pl.BlockSpec((block_rows, d), lambda i: (i, 0))
    o_spec = pl.BlockSpec((block_rows, out_dim), lambda i: (i, 0))
    cparams = pltpu.CompilerParams(
        dimension_semantics=("parallel",),
        vmem_limit_bytes=48 * 1024 * 1024,   # explicit: safe on v7x 64 MiB/TC
    )

    if y is None:
        kernel = functools.partial(_pe_kernel, scales=scales)
        x_ret = pl.pallas_call(
            kernel,
            out_shape=jax.ShapeDtypeStruct((n_pad, out_dim), jnp.float32),
            grid=grid,
            in_specs=[x_spec],
            out_specs=o_spec,
            compiler_params=cparams,
        )(xf)
        return x_ret[:n].reshape(*orig_batch, out_dim)

    yf = y.reshape(n, d).astype(jnp.float32)
    if n_pad != n:
        yf = jnp.pad(yf, ((0, n_pad - n), (0, 0)))

    kernel = functools.partial(_ipe_kernel, scales=scales)
    x_ret, y_ret = pl.pallas_call(
        kernel,
        out_shape=(jax.ShapeDtypeStruct((n_pad, out_dim), jnp.float32),
                   jax.ShapeDtypeStruct((n_pad, out_dim), jnp.float32)),
        grid=grid,
        in_specs=[x_spec, x_spec],
        out_specs=(o_spec, o_spec),
        compiler_params=cparams,
    )(xf, yf)
    return (x_ret[:n].reshape(*orig_batch, out_dim),
            y_ret[:n].reshape(*orig_batch, out_dim))


def _reference(x, y, min_deg, max_deg):
    """Pure-JAX transcription of the PyTorch forward."""
    scales = jnp.array([2.0 ** i for i in range(min_deg, max_deg)], dtype=jnp.float32)
    shape = list(x.shape[:-1]) + [-1]
    x_enc = (x[..., None, :] * scales[:, None]).reshape(shape)
    x_enc = jnp.concatenate([x_enc, x_enc + 0.5 * jnp.pi], -1)
    if y is not None:
        y_enc = (y[..., None, :] * scales[:, None] ** 2).reshape(shape)
        y_enc = jnp.concatenate([y_enc, y_enc], -1)
        x_ret = jnp.exp(-0.5 * y_enc) * jnp.sin(x_enc)
        y_ret = jnp.maximum(
            0.0, 0.5 * (1.0 - jnp.exp(-2.0 * y_enc) * jnp.cos(2.0 * x_enc)) - x_ret ** 2)
        return x_ret, y_ret
    return jnp.sin(x_enc)


if __name__ == "__main__":
    key = jax.random.PRNGKey(0)
    kx, ky, kx2, ky2 = jax.random.split(key, 4)

    # small shapes: batch dims (2, 128) of 3-D coordinates -> N = 256 rows
    x = jax.random.uniform(kx, (2, 128, FEAT_D), dtype=jnp.float32,
                           minval=-1.0, maxval=1.0)
    y = jax.random.uniform(ky, (2, 128, FEAT_D), dtype=jnp.float32) * 0.1  # variances

    # branch with y (integrated positional encoding)
    x_ret, y_ret = positional_encoding(x, y)
    jax.block_until_ready((x_ret, y_ret))
    x_ref, y_ref = _reference(x, y, MIN_DEG, MAX_DEG)
    np.testing.assert_allclose(np.asarray(x_ret), np.asarray(x_ref), rtol=1e-4, atol=1e-4)
    np.testing.assert_allclose(np.asarray(y_ret), np.asarray(y_ref), rtol=1e-4, atol=1e-4)

    # branch without y (plain positional encoding)
    x_only = positional_encoding(x, None)
    jax.block_until_ready(x_only)
    x_only_ref = _reference(x, None, MIN_DEG, MAX_DEG)
    np.testing.assert_allclose(np.asarray(x_only), np.asarray(x_only_ref),
                               rtol=1e-4, atol=1e-4)

    # ragged batch (exercises the pad-and-slice tail handling)
    xr = jax.random.uniform(kx2, (3, 70, FEAT_D), dtype=jnp.float32,
                            minval=-1.0, maxval=1.0)
    yr = jax.random.uniform(ky2, (3, 70, FEAT_D), dtype=jnp.float32) * 0.1
    xr_ret, yr_ret = positional_encoding(xr, yr)
    jax.block_until_ready((xr_ret, yr_ret))
    xr_ref, yr_ref = _reference(xr, yr, MIN_DEG, MAX_DEG)
    np.testing.assert_allclose(np.asarray(xr_ret), np.asarray(xr_ref), rtol=1e-4, atol=1e-4)
    np.testing.assert_allclose(np.asarray(yr_ret), np.asarray(yr_ref), rtol=1e-4, atol=1e-4)

    print("KERNEL_OK")
</pallas_src>

<mosaic_0001>
module attributes {stable_mosaic.version = 11 : i64} {
  func.func @_ipe_kernel(%arg0: i32, %arg1: memref<128x3xf32, #tpu.memory_space<vmem>>, %arg2: memref<128x3xf32, #tpu.memory_space<vmem>>, %arg3: memref<128x48xf32, #tpu.memory_space<vmem>>, %arg4: memref<128x48xf32, #tpu.memory_space<vmem>>) attributes {dimension_semantics = [#tpu.dimension_semantics<parallel>], iteration_bounds = array<i64: 2>, scalar_prefetch = 0 : i64, scratch_operands = 0 : i64, tpu.core_type = #tpu.core_type<tc>, window_params = [{transform_indices = @transform_0, window_bounds = array<i64: 128, 3>}, {transform_indices = @transform_1, window_bounds = array<i64: 128, 3>}, {transform_indices = @transform_2, window_bounds = array<i64: 128, 48>}, {transform_indices = @transform_3, window_bounds = array<i64: 128, 48>}]} {
    %c0 = arith.constant 0 : index
    %c0_0 = arith.constant 0 : index
    %0 = vector.load %arg1[%c0, %c0_0] : memref<128x3xf32, #tpu.memory_space<vmem>>, vector<128x3xf32>
    %c0_1 = arith.constant 0 : index
    %c0_2 = arith.constant 0 : index
    %1 = vector.load %arg2[%c0_1, %c0_2] : memref<128x3xf32, #tpu.memory_space<vmem>>, vector<128x3xf32>
    %cst = arith.constant 1.000000e+00 : f32
    %2 = vector.broadcast %cst : f32 to vector<128x3xf32>
    %3 = arith.mulf %0, %2 : vector<128x3xf32>
    %cst_3 = arith.constant 2.000000e+00 : f32
    %4 = vector.broadcast %cst_3 : f32 to vector<128x3xf32>
    %5 = arith.mulf %0, %4 : vector<128x3xf32>
    %cst_4 = arith.constant 4.000000e+00 : f32
    %6 = vector.broadcast %cst_4 : f32 to vector<128x3xf32>
    %7 = arith.mulf %0, %6 : vector<128x3xf32>
    %cst_5 = arith.constant 8.000000e+00 : f32
    %8 = vector.broadcast %cst_5 : f32 to vector<128x3xf32>
    %9 = arith.mulf %0, %8 : vector<128x3xf32>
    %cst_6 = arith.constant 1.600000e+01 : f32
    %10 = vector.broadcast %cst_6 : f32 to vector<128x3xf32>
    %11 = arith.mulf %0, %10 : vector<128x3xf32>
    %cst_7 = arith.constant 3.200000e+01 : f32
    %12 = vector.broadcast %cst_7 : f32 to vector<128x3xf32>
    %13 = arith.mulf %0, %12 : vector<128x3xf32>
    %cst_8 = arith.constant 6.400000e+01 : f32
    %14 = vector.broadcast %cst_8 : f32 to vector<128x3xf32>
    %15 = arith.mulf %0, %14 : vector<128x3xf32>
    %cst_9 = arith.constant 1.280000e+02 : f32
    %16 = vector.broadcast %cst_9 : f32 to vector<128x3xf32>
    %17 = arith.mulf %0, %16 : vector<128x3xf32>
    %18 = tpu.concatenate %3, %5, %7, %9, %11, %13, %15, %17 in 1 : vector<128x3xf32>, vector<128x3xf32>, vector<128x3xf32>, vector<128x3xf32>, vector<128x3xf32>, vector<128x3xf32>, vector<128x3xf32>, vector<128x3xf32> -> vector<128x24xf32>
    %cst_10 = arith.constant 1.000000e+00 : f32
    %19 = vector.broadcast %cst_10 : f32 to vector<128x3xf32>
    %20 = arith.mulf %1, %19 : vector<128x3xf32>
    %cst_11 = arith.constant 4.000000e+00 : f32
    %21 = vector.broadcast %cst_11 : f32 to vector<128x3xf32>
    %22 = arith.mulf %1, %21 : vector<128x3xf32>
    %cst_12 = arith.constant 1.600000e+01 : f32
    %23 = vector.broadcast %cst_12 : f32 to vector<128x3xf32>
    %24 = arith.mulf %1, %23 : vector<128x3xf32>
    %cst_13 = arith.constant 6.400000e+01 : f32
    %25 = vector.broadcast %cst_13 : f32 to vector<128x3xf32>
    %26 = arith.mulf %1, %25 : vector<128x3xf32>
    %cst_14 = arith.constant 2.560000e+02 : f32
    %27 = vector.broadcast %cst_14 : f32 to vector<128x3xf32>
    %28 = arith.mulf %1, %27 : vector<128x3xf32>
    %cst_15 = arith.constant 1.024000e+03 : f32
    %29 = vector.broadcast %cst_15 : f32 to vector<128x3xf32>
    %30 = arith.mulf %1, %29 : vector<128x3xf32>
    %cst_16 = arith.constant 4.096000e+03 : f32
    %31 = vector.broadcast %cst_16 : f32 to vector<128x3xf32>
    %32 = arith.mulf %1, %31 : vector<128x3xf32>
    %cst_17 = arith.constant 1.638400e+04 : f32
    %33 = vector.broadcast %cst_17 : f32 to vector<128x3xf32>
    %34 = arith.mulf %1, %33 : vector<128x3xf32>
    %35 = tpu.concatenate %20, %22, %24, %26, %28, %30, %32, %34 in 1 : vector<128x3xf32>, vector<128x3xf32>, vector<128x3xf32>, vector<128x3xf32>, vector<128x3xf32>, vector<128x3xf32>, vector<128x3xf32>, vector<128x3xf32> -> vector<128x24xf32>
    %36 = math.sin %18 : vector<128x24xf32>
    %37 = math.cos %18 : vector<128x24xf32>
    %cst_18 = arith.constant -5.000000e-01 : f32
    %38 = vector.broadcast %cst_18 : f32 to vector<128x24xf32>
    %39 = arith.mulf %38, %35 : vector<128x24xf32>
    %40 = math.exp %39 : vector<128x24xf32>
    %41 = arith.mulf %40, %40 : vector<128x24xf32>
    %42 = arith.mulf %41, %41 : vector<128x24xf32>
    %cst_19 = arith.constant 2.000000e+00 : f32
    %43 = vector.broadcast %cst_19 : f32 to vector<128x24xf32>
    %44 = arith.mulf %43, %36 : vector<128x24xf32>
    %45 = arith.mulf %44, %36 : vector<128x24xf32>
    %cst_20 = arith.constant 1.000000e+00 : f32
    %46 = vector.broadcast %cst_20 : f32 to vector<128x24xf32>
    %47 = arith.subf %46, %45 : vector<128x24xf32>
    %48 = arith.mulf %40, %36 : vector<128x24xf32>
    %49 = arith.mulf %40, %37 : vector<128x24xf32>
    %50 = arith.mulf %42, %47 : vector<128x24xf32>
    %cst_21 = arith.constant 1.000000e+00 : f32
    %51 = vector.broadcast %cst_21 : f32 to vector<128x24xf32>
    %52 = arith.subf %51, %50 : vector<128x24xf32>
    %cst_22 = arith.constant 5.000000e-01 : f32
    %53 = vector.broadcast %cst_22 : f32 to vector<128x24xf32>
    %54 = arith.mulf %53, %52 : vector<128x24xf32>
    %55 = arith.mulf %48, %48 : vector<128x24xf32>
    %56 = arith.subf %54, %55 : vector<128x24xf32>
    %cst_23 = arith.constant 0.000000e+00 : f32
    %57 = vector.broadcast %cst_23 : f32 to vector<128x24xf32>
    %58 = arith.maximumf %57, %56 : vector<128x24xf32>
    %59 = arith.mulf %42, %47 : vector<128x24xf32>
    %cst_24 = arith.constant 1.000000e+00 : f32
    %60 = vector.broadcast %cst_24 : f32 to vector<128x24xf32>
    %61 = arith.addf %60, %59 : vector<128x24xf32>
    %cst_25 = arith.constant 5.000000e-01 : f32
    %62 = vector.broadcast %cst_25 : f32 to vector<128x24xf32>
    %63 = arith.mulf %62, %61 : vector<128x24xf32>
    %64 = arith.mulf %49, %49 : vector<128x24xf32>
    %65 = arith.subf %63, %64 : vector<128x24xf32>
    %cst_26 = arith.constant 0.000000e+00 : f32
    %66 = vector.broadcast %cst_26 : f32 to vector<128x24xf32>
    %67 = arith.maximumf %66, %65 : vector<128x24xf32>
    %68 = tpu.concatenate %48, %49 in 1 : vector<128x24xf32>, vector<128x24xf32> -> vector<128x48xf32>
    %c0_27 = arith.constant 0 : index
    %c0_28 = arith.constant 0 : index
    %69 = vector.load %arg3[%c0_27, %c0_28] : memref<128x48xf32, #tpu.memory_space<vmem>>, vector<128x48xf32>
    tpu.vector_store %arg3[%c0_27, %c0_28], %68 {strides = array<i32>} : memref<128x48xf32, #tpu.memory_space<vmem>>, vector<128x48xf32>,
    %70 = tpu.concatenate %58, %67 in 1 : vector<128x24xf32>, vector<128x24xf32> -> vector<128x48xf32>
    %c0_29 = arith.constant 0 : index
    %c0_30 = arith.constant 0 : index
    %71 = vector.load %arg4[%c0_29, %c0_30] : memref<128x48xf32, #tpu.memory_space<vmem>>, vector<128x48xf32>
    tpu.vector_store %arg4[%c0_29, %c0_30], %70 {strides = array<i32>} : memref<128x48xf32, #tpu.memory_space<vmem>>, vector<128x48xf32>,
    return
  }
  func.func @transform_0(%arg0: i32) -> (i32, i32) {
    %c0_i32 = arith.constant 0 : i32
    %c0_i32_0 = arith.constant 0 : i32
    return %arg0, %c0_i32 : i32, i32
  }
  func.func @transform_1(%arg0: i32) -> (i32, i32) {
    %c0_i32 = arith.constant 0 : i32
    %c0_i32_0 = arith.constant 0 : i32
    return %arg0, %c0_i32 : i32, i32
  }
  func.func @transform_2(%arg0: i32) -> (i32, i32) {
    %c0_i32 = arith.constant 0 : i32
    %c0_i32_0 = arith.constant 0 : i32
    return %arg0, %c0_i32 : i32, i32
  }
  func.func @transform_3(%arg0: i32) -> (i32, i32) {
    %c0_i32 = arith.constant 0 : i32
    %c0_i32_0 = arith.constant 0 : i32
    return %arg0, %c0_i32 : i32, i32
  }
}

</mosaic_0001>

<bundles_post_ra>
// kernel: tpu_custom_call.1
= control target key start
LH: loop header
LB: loop body
LE: loop exit
PB: predicated region body
PF: predicated region fallthrough
CT: control target
= control target key end

     0   :  { %s5953_s12 = smov 0   ;;  %s10945_s0 = inlined_call_operand.vmem [shape: f32[256,3], index: 0, kind: input, shape index: {}]   ;;  %s10946_s1 = inlined_call_operand.vmem [shape: f32[256,3], index: 1, kind: input, shape index: {}]   ;;  %s10947_s2 = inlined_call_operand.vmem [shape: f32[256,48], index: 2, kind: output, shape index: {0}]   ;;  %s10948_s3 = inlined_call_operand.vmem [shape: f32[256,48], index: 3, kind: output, shape index: {1}]  }
   0x1 LB: > { %s5537_s13 = sadd.s32 4294967295, %s5917_s12   ;;  %p5541_p0 = scmp.ge.s32.totalorder %s5917_s12, 1  ;;  %s5917_s12 = sphi %s5953_s12, %s14_s12  }
   0x2   : > { %p152_p1 = scmp.lt.s32.totalorder %s5917_s12, 3 }
   0x4   : > { %p153_p2 = pnand %p5541_p0, %p152_p1 }
   0x6   : > { %156 = sbr.rel (%p153_p2) target bundleno = 1102 (0x44e), region = 28 }
   0xd   : > { %s5542_s14 = sshll.u32 %s5537_s13, 4  ;;  %s5919_s19 = smov 3   ;;  %vm819_vm0 = vcmask 48128   ;;  %vm802_vm1 = vcmask 23552   ;;  %vm10984_vm2 = vcmask 72704   ;;  %vm10983_vm3 = vcmask 97280  }
   0xe   : > { %p187_p3 = scmp.lt.s32.totalorder %s5542_s14, 31  ;;  %s5920_s20 = smov 6   ;;  %vm10982_vm4 = vcmask 121856   ;;  %vm10981_vm5 = vcmask 146432   ;;  %vm11111_vm6 = vcmask 171008  }
   0xf   : > { %s5921_s21 = smov 9   ;;  %s5922_s22 = smov 12  }
  0x10   : > { %s11883_s14 = smov (!%p187_p3, %s5542_s14), 31  ;;  %s5923_s23 = smov 15  }
  0x11   : > { %s5961_s15 = sshll.u32 %s11883_s14, 3  ;;  %s5924_s24 = smov 18  }
  0x12   : > { %s5967_s18 = scalar_lea.vmem %s10945_s0, %s5961_s15  ;;  %s5925_s25 = smov 21  }
  0x13   : > { %v5970_v0 = vld [vmem:[%s5967_s18 + $0x10] sm:$0xff]  ;;  %v5973_v1 = vld [vmem:[%s5967_s18] sm:$0xff]  ;;  %v5976_v2 = vld [vmem:[%s5967_s18 + $0x18] sm:$0xff]  ;;  %s6317_s28 = scalar_lea.vmem %s10946_s1, %s5961_s15  ;;  %s5932_s29 = smov 24  }
  0x14   : > { %v244_v3 = vmul.f32 2.0, %v5970_v0  ;;  %v242_v4 = vmul.f32 2.0, %v5973_v1  ;;  %v5981_v5 = vld [vmem:[%s5967_s18 + $0x8] sm:$0xff]  ;;  %v245_v6 = vmul.f32 2.0, %v5976_v2  ;;  %v5991_v9 = vld [vmem:[%s5967_s18 + $0x20] sm:$0xff]  ;;  %v5998_v12 = vld [vmem:[%s5967_s18 + $0x38] sm:$0xff]  ;;  %s10774_s5 = scalar_lea.vmem %s10947_s2, %s5961_s15  ;;  %s10844_s8 = scalar_lea.vmem %s10948_s3, %s5961_s15 }
  0x15   : > { %v243_v7 = vmul.f32 2.0, %v5981_v5  ;;  %v5988_v8 = vld [vmem:[%s5967_s18 + $0x28] sm:$0xff]  ;;  %v246_v11 = vmul.f32 2.0, %v5991_v9  ;;  %v6001_v13 = vld [vmem:[%s5967_s18 + $0x30] sm:$0xff]  ;;  %v249_v14 = vmul.f32 2.0, %v5998_v12  ;;  %v6011_v17 = vld [vmem:[%s5967_s18 + $0x40] sm:$0xff] }
  0x16   : > { %374 = vrot.lane.b32.xlu1 %v244_v3, %s5919_s19  ;;  %370 = vrot.lane.b32.xlu0 %v242_v4, %s5919_s19  ;;  %v247_v10 = vmul.f32 2.0, %v5988_v8  ;;  %v248_v15 = vmul.f32 2.0, %v6001_v13  ;;  %v6008_v16 = vld [vmem:[%s5967_s18 + $0x48] sm:$0xff]  ;;  %v250_v19 = vmul.f32 2.0, %v6011_v17  ;;  %v6018_v20 = vld [vmem:[%s5967_s18 + $0x58] sm:$0xff]  ;;  %v259_v32 = vmul.f32 4.0, %v5981_v5 }
  0x17   : > { %v251_v18 = vmul.f32 2.0, %v6008_v16  ;;  %v6021_v21 = vld [vmem:[%s5967_s18 + $0x50] sm:$0xff]  ;;  %v253_v22 = vmul.f32 2.0, %v6018_v20  ;;  %v6028_v24 = vld [vmem:[%s5967_s18 + $0x68] sm:$0xff]  ;;  %v6031_v25 = vld [vmem:[%s5967_s18 + $0x60] sm:$0xff]  ;;  %v258_v33 = vmul.f32 4.0, %v5973_v1 }
  0x18   : > { %v252_v23 = vmul.f32 2.0, %v6021_v21  ;;  %v255_v26 = vmul.f32 2.0, %v6028_v24  ;;  %v254_v27 = vmul.f32 2.0, %v6031_v25  ;;  %v6038_v28 = vld [vmem:[%s5967_s18 + $0x78] sm:$0xff]  ;;  %v6041_v29 = vld [vmem:[%s5967_s18 + $0x70] sm:$0xff]  ;;  %v261_v34 = vmul.f32 4.0, %v5976_v2 }
  0x19   : > { %v257_v30 = vmul.f32 2.0, %v6038_v28  ;;  %v256_v31 = vmul.f32 2.0, %v6041_v29  ;;  %v260_v35 = vmul.f32 4.0, %v5970_v0  ;;  %v263_v36 = vmul.f32 4.0, %v5988_v8 }
  0x1a   : > { %376 = vrot.lane.b32.xlu1 %v245_v6, %s5919_s19  ;;  %372 = vrot.lane.b32.xlu0 %v243_v7, %s5919_s19  ;;  %v262_v37 = vmul.f32 4.0, %v5991_v9  ;;  %v265_v38 = vmul.f32 4.0, %v5998_v12  ;;  %v264_v39 = vmul.f32 4.0, %v6001_v13  ;;  %v267_v40 = vmul.f32 4.0, %v6008_v16 }
  0x1b   : > { %v266_v41 = vmul.f32 4.0, %v6011_v17  ;;  %v269_v42 = vmul.f32 4.0, %v6018_v20  ;;  %v268_v43 = vmul.f32 4.0, %v6021_v21  ;;  %v271_v44 = vmul.f32 4.0, %v6028_v24 }
  0x1c   : > { %v270_v45 = vmul.f32 4.0, %v6031_v25  ;;  %v273_v46 = vmul.f32 4.0, %v6038_v28  ;;  %v272_v47 = vmul.f32 4.0, %v6041_v29  ;;  %v275_v48 = vmul.f32 8.0, %v5981_v5 }
  0x1d   : > { %v274_v49 = vmul.f32 8.0, %v5973_v1  ;;  %v277_v50 = vmul.f32 8.0, %v5976_v2  ;;  %v276_v51 = vmul.f32 8.0, %v5970_v0  ;;  %v279_v52 = vmul.f32 8.0, %v5988_v8 }
  0x1e   : > { %380 = vrot.lane.b32.xlu1 %v247_v10, %s5919_s19  ;;  %378 = vrot.lane.b32.xlu0 %v246_v11, %s5919_s19  ;;  %v278_v53 = vmul.f32 8.0, %v5991_v9  ;;  %v281_v54 = vmul.f32 8.0, %v5998_v12  ;;  %v280_v55 = vmul.f32 8.0, %v6001_v13  ;;  %v283_v56 = vmul.f32 8.0, %v6008_v16 }
  0x1f   : > { %v282_v57 = vmul.f32 8.0, %v6011_v17  ;;  %v285_v58 = vmul.f32 8.0, %v6018_v20  ;;  %v284_v59 = vmul.f32 8.0, %v6021_v21  ;;  %v287_v60 = vmul.f32 8.0, %v6028_v24 }
  0x20   : > { %v286_v61 = vmul.f32 8.0, %v6031_v25  ;;  %v289_v62 = vmul.f32 8.0, %v6038_v28  ;;  %v288_v63 = vmul.f32 8.0, %v6041_v29  ;;  %v291_v3 = vmul.f32 16.0, %v5981_v5 }
  0x21   : > { %v290_v4 = vmul.f32 16.0, %v5973_v1  ;;  %v293_v6 = vmul.f32 16.0, %v5976_v2  ;;  %v292_v7 = vmul.f32 16.0, %v5970_v0  ;;  %v295_v10 = vmul.f32 16.0, %v5988_v8 }
  0x22   : > { %384 = vrot.lane.b32.xlu1 %v249_v14, %s5919_s19  ;;  %382 = vrot.lane.b32.xlu0 %v248_v15, %s5919_s19  ;;  %v294_v11 = vmul.f32 16.0, %v5991_v9  ;;  %v297_v14 = vmul.f32 16.0, %v5998_v12  ;;  %v296_v15 = vmul.f32 16.0, %v6001_v13 }
  0x26   : > { %388 = vrot.lane.b32.xlu1 %v251_v18, %s5919_s19  ;;  %386 = vrot.lane.b32.xlu0 %v250_v19, %s5919_s19  ;;  %v299_v18 = vmul.f32 16.0, %v6008_v16  ;;  %v298_v19 = vmul.f32 16.0, %v6011_v17 }
  0x2a   : > { %392 = vrot.lane.b32.xlu1 %v253_v22, %s5919_s19  ;;  %390 = vrot.lane.b32.xlu0 %v252_v23, %s5919_s19  ;;  %v301_v22 = vmul.f32 16.0, %v6018_v20  ;;  %v300_v23 = vmul.f32 16.0, %v6021_v21 }
  0x2e   : > { %396 = vrot.lane.b32.xlu1 %v255_v26, %s5919_s19  ;;  %394 = vrot.lane.b32.xlu0 %v254_v27, %s5919_s19 }
  0x32   : > { %400 = vrot.lane.b32.xlu1 %v257_v30, %s5919_s19  ;;  %398 = vrot.lane.b32.xlu0 %v256_v31, %s5919_s19  ;;  %v303_v30 = vmul.f32 16.0, %v6028_v24  ;;  %v302_v31 = vmul.f32 16.0, %v6031_v25 }
  0x36   : > { %436 = vrot.lane.b32.xlu1 %v259_v32, %s5920_s20  ;;  %434 = vrot.lane.b32.xlu0 %v258_v33, %s5920_s20 }
  0x3a   : > { %440 = vrot.lane.b32.xlu1 %v261_v34, %s5920_s20  ;;  %438 = vrot.lane.b32.xlu0 %v260_v35, %s5920_s20  ;;  %v305_v34 = vmul.f32 16.0, %v6038_v28  ;;  %v304_v35 = vmul.f32 16.0, %v6041_v29 }
  0x3e   : > { %444 = vrot.lane.b32.xlu1 %v263_v36, %s5920_s20  ;;  %442 = vrot.lane.b32.xlu0 %v262_v37, %s5920_s20 }
  0x42   : > { %448 = vrot.lane.b32.xlu1 %v265_v38, %s5920_s20  ;;  %446 = vrot.lane.b32.xlu0 %v264_v39, %s5920_s20  ;;  %v307_v38 = vmul.f32 32.0, %v5981_v5  ;;  %v306_v39 = vmul.f32 32.0, %v5973_v1 }
  0x46   : > { %452 = vrot.lane.b32.xlu1 %v267_v40, %s5920_s20  ;;  %450 = vrot.lane.b32.xlu0 %v266_v41, %s5920_s20 }
  0x4a   : > { %456 = vrot.lane.b32.xlu1 %v269_v42, %s5920_s20  ;;  %454 = vrot.lane.b32.xlu0 %v268_v43, %s5920_s20  ;;  %v309_v42 = vmul.f32 32.0, %v5976_v2  ;;  %v308_v43 = vmul.f32 32.0, %v5970_v0 }
  0x4e   : > { %460 = vrot.lane.b32.xlu1 %v271_v44, %s5920_s20  ;;  %458 = vrot.lane.b32.xlu0 %v270_v45, %s5920_s20 }
  0x52   : > { %464 = vrot.lane.b32.xlu1 %v273_v46, %s5920_s20  ;;  %462 = vrot.lane.b32.xlu0 %v272_v47, %s5920_s20  ;;  %v311_v46 = vmul.f32 32.0, %v5988_v8  ;;  %v310_v47 = vmul.f32 32.0, %v5991_v9 }
  0x56   : > { %500 = vrot.lane.b32.xlu1 %v275_v48, %s5921_s21  ;;  %498 = vrot.lane.b32.xlu0 %v274_v49, %s5921_s21  ;;  %v313_v49 = vmul.f32 32.0, %v5998_v12 }
  0x5a   : > { %504 = vrot.lane.b32.xlu1 %v277_v50, %s5921_s21  ;;  %502 = vrot.lane.b32.xlu0 %v276_v51, %s5921_s21  ;;  %v312_v50 = vmul.f32 32.0, %v6001_v13 }
  0x5e   : > { %508 = vrot.lane.b32.xlu1 %v279_v52, %s5921_s21  ;;  %506 = vrot.lane.b32.xlu0 %v278_v53, %s5921_s21  ;;  %v315_v53 = vmul.f32 32.0, %v6008_v16 }
  0x62   : > { %512 = vrot.lane.b32.xlu1 %v281_v54, %s5921_s21  ;;  %510 = vrot.lane.b32.xlu0 %v280_v55, %s5921_s21  ;;  %v314_v54 = vmul.f32 32.0, %v6011_v17 }
  0x66   : > { %516 = vrot.lane.b32.xlu1 %v283_v56, %s5921_s21  ;;  %514 = vrot.lane.b32.xlu0 %v282_v57, %s5921_s21  ;;  %v317_v57 = vmul.f32 32.0, %v6018_v20 }
  0x6a   : > { %520 = vrot.lane.b32.xlu1 %v285_v58, %s5921_s21  ;;  %518 = vrot.lane.b32.xlu0 %v284_v59, %s5921_s21  ;;  %v316_v58 = vmul.f32 32.0, %v6021_v21 }
  0x6e   : > { %524 = vrot.lane.b32.xlu1 %v287_v60, %s5921_s21  ;;  %522 = vrot.lane.b32.xlu0 %v286_v61, %s5921_s21  ;;  %v319_v60 = vmul.f32 32.0, %v6028_v24  ;;  %v318_v61 = vmul.f32 32.0, %v6031_v25 }
  0x72   : > { %528 = vrot.lane.b32.xlu1 %v289_v62, %s5921_s21  ;;  %526 = vrot.lane.b32.xlu0 %v288_v63, %s5921_s21 }
  0x76   : > { %564 = vrot.lane.b32.xlu1 %v291_v3, %s5922_s22  ;;  %562 = vrot.lane.b32.xlu0 %v290_v4, %s5922_s22  ;;  %v321_v3 = vmul.f32 32.0, %v6038_v28  ;;  %v320_v4 = vmul.f32 32.0, %v6041_v29 }
  0x7a   : > { %568 = vrot.lane.b32.xlu1 %v293_v6, %s5922_s22  ;;  %566 = vrot.lane.b32.xlu0 %v292_v7, %s5922_s22 }
  0x7e   : > { %572 = vrot.lane.b32.xlu1 %v295_v10, %s5922_s22  ;;  %570 = vrot.lane.b32.xlu0 %v294_v11, %s5922_s22  ;;  %v323_v10 = vmul.f32 64.0, %v5981_v5  ;;  %v322_v11 = vmul.f32 64.0, %v5973_v1 }
  0x82   : > { %576 = vrot.lane.b32.xlu1 %v297_v14, %s5922_s22  ;;  %574 = vrot.lane.b32.xlu0 %v296_v15, %s5922_s22  ;;  %v325_v15 = vmul.f32 64.0, %v5976_v2 }
  0x86   : > { %580 = vrot.lane.b32.xlu1 %v299_v18, %s5922_s22  ;;  %578 = vrot.lane.b32.xlu0 %v298_v19, %s5922_s22  ;;  %v324_v18 = vmul.f32 64.0, %v5970_v0 }
  0x88   : > { %v6135_v26 = vpop.permute.xlu1 %374  ;;  %v6137_v27 = vpop.permute.xlu0 %370 }
  0x8a   : > { %584 = vrot.lane.b32.xlu1 %v301_v22, %s5922_s22  ;;  %582 = vrot.lane.b32.xlu0 %v300_v23, %s5922_s22  ;;  %v327_v23 = vmul.f32 64.0, %v5988_v8 }
  0x8c   : > { %v6143_v32 = vpop.permute.xlu1 %376  ;;  %v6145_v33 = vpop.permute.xlu0 %372 }
  0x8e   : > { %588 = vrot.lane.b32.xlu1 %v303_v30, %s5922_s22  ;;  %586 = vrot.lane.b32.xlu0 %v302_v31, %s5922_s22  ;;  %v326_v30 = vmul.f32 64.0, %v5991_v9 }
  0x90   : > { %v6151_v36 = vpop.permute.xlu1 %380  ;;  %v6153_v37 = vpop.permute.xlu0 %378 }
  0x92   : > { %592 = vrot.lane.b32.xlu1 %v305_v34, %s5922_s22  ;;  %590 = vrot.lane.b32.xlu0 %v304_v35, %s5922_s22  ;;  %v329_v34 = vmul.f32 64.0, %v5998_v12  ;;  %v328_v35 = vmul.f32 64.0, %v6001_v13 }
  0x94   : > { %v6159_v40 = vpop.permute.xlu1 %384  ;;  %v6161_v41 = vpop.permute.xlu0 %382 }
  0x96   : > { %628 = vrot.lane.b32.xlu1 %v307_v38, %s5923_s23  ;;  %626 = vrot.lane.b32.xlu0 %v306_v39, %s5923_s23  ;;  %v331_v39 = vmul.f32 64.0, %v6008_v16 }
  0x98   : > { %v6167_v44 = vpop.permute.xlu1 %388  ;;  %v6169_v45 = vpop.permute.xlu0 %386 }
  0x9a   : > { %632 = vrot.lane.b32.xlu1 %v309_v42, %s5923_s23  ;;  %630 = vrot.lane.b32.xlu0 %v308_v43, %s5923_s23  ;;  %v330_v42 = vmul.f32 64.0, %v6011_v17 }
  0x9c   : > { %v6175_v48 = vpop.permute.xlu1 %392  ;;  %v6181_v51 = vpop.permute.xlu0 %390 }
  0x9e   : > { %636 = vrot.lane.b32.xlu1 %v311_v46, %s5923_s23  ;;  %634 = vrot.lane.b32.xlu0 %v310_v47, %s5923_s23  ;;  %v333_v47 = vmul.f32 64.0, %v6018_v20 }
  0xa0   : > { %v6183_v52 = vpop.permute.xlu1 %396  ;;  %v6191_v56 = vpop.permute.xlu0 %394 }
  0xa2   : > { %640 = vrot.lane.b32.xlu1 %v313_v49, %s5923_s23  ;;  %638 = vrot.lane.b32.xlu0 %v312_v50, %s5923_s23  ;;  %v332_v49 = vmul.f32 64.0, %v6021_v21 }
  0xa4   : > { %v6189_v55 = vpop.permute.xlu1 %400  ;;  %v6203_v62 = vpop.permute.xlu0 %398 }
  0xa6   : > { %644 = vrot.lane.b32.xlu1 %v315_v53, %s5923_s23  ;;  %642 = vrot.lane.b32.xlu0 %v314_v54, %s5923_s23  ;;  %v335_v53 = vmul.f32 64.0, %v6028_v24  ;;  %v334_v54 = vmul.f32 64.0, %v6031_v25 }
  0xa8   : > { %v6197_v59 = vpop.permute.xlu1 %436  ;;  %v6213_v7 = vpop.permute.xlu0 %434 }
  0xaa   : > { %648 = vrot.lane.b32.xlu1 %v317_v57, %s5923_s23  ;;  %646 = vrot.lane.b32.xlu0 %v316_v58, %s5923_s23  ;;  %v337_v58 = vmul.f32 64.0, %v6038_v28 }
  0xac   : > { %v6205_v63 = vpop.permute.xlu1 %440  ;;  %v6225_v19 = vpop.permute.xlu0 %438 }
  0xae   : > { %652 = vrot.lane.b32.xlu1 %v319_v60, %s5923_s23  ;;  %650 = vrot.lane.b32.xlu0 %v318_v61, %s5923_s23  ;;  %v336_v60 = vmul.f32 64.0, %v6041_v29 }
  0xb0   : > { %v6211_v6 = vpop.permute.xlu1 %444  ;;  %v6233_v31 = vpop.permute.xlu0 %442 }
  0xb2   : > { %656 = vrot.lane.b32.xlu1 %v321_v3, %s5923_s23  ;;  %654 = vrot.lane.b32.xlu0 %v320_v4, %s5923_s23  ;;  %v339_v4 = vmul.f32 128.0, %v5981_v5 }
  0xb4   : > { %v6219_v14 = vpop.permute.xlu1 %448  ;;  %v6245_v43 = vpop.permute.xlu0 %446 }
  0xb6   : > { %692 = vrot.lane.b32.xlu1 %v323_v10, %s5924_s24  ;;  %690 = vrot.lane.b32.xlu0 %v322_v11, %s5924_s24  ;;  %v338_v10 = vmul.f32 128.0, %v5973_v1 }
  0xb8   : > { %v6227_v22 = vpop.permute.xlu1 %452  ;;  %v6253_v50 = vpop.permute.xlu0 %450 }
  0xb9   : > { %11166 = vst [vmem:[#allocation2_spill] sm:$0xff] %v6227_v22  ;;  %11169 = vst [vmem:[#allocation5_spill] sm:$0xff] %v6253_v50 }
  0xba   : > { %696 = vrot.lane.b32.xlu1 %v325_v15, %s5924_s24  ;;  %694 = vrot.lane.b32.xlu0 %v324_v18, %s5924_s24  ;;  %v341_v15 = vmul.f32 128.0, %v5976_v2  ;;  %v340_v18 = vmul.f32 128.0, %v5970_v0  ;;  %v345_v0 = vmul.f32 128.0, %v5998_v12  ;;  %v349_v12 = vmul.f32 128.0, %v6018_v20 }
  0xbc   : > { %v6239_v38 = vpop.permute.xlu1 %456  ;;  %v6265_v61 = vpop.permute.xlu0 %454 }
  0xbd   : > { %11167 = vst [vmem:[#allocation3_spill] sm:$0xff] %v6239_v38  ;;  %11171 = vst [vmem:[#allocation7_spill] sm:$0xff] %v6265_v61 }
  0xbe   : > { %700 = vrot.lane.b32.xlu1 %v327_v23, %s5924_s24  ;;  %698 = vrot.lane.b32.xlu0 %v326_v30, %s5924_s24  ;;  %v343_v30 = vmul.f32 128.0, %v5988_v8  ;;  %v347_v8 = vmul.f32 128.0, %v6008_v16  ;;  %v351_v16 = vmul.f32 128.0, %v6028_v24  ;;  %v352_v24 = vmul.f32 128.0, %v6041_v29  ;;  %v6341_v29 = vld [vmem:[%s6317_s28 + $0x10] sm:$0xff] }
  0xc0   : > { %v6247_v46 = vpop.permute.xlu1 %460  ;;  %v6273_v11 = vpop.permute.xlu0 %458 }
  0xc1   : > { %11168 = vst [vmem:[#allocation4_spill] sm:$0xff] %v6247_v46  ;;  %11172 = vst [vmem:[#allocation8_spill] sm:$0xff] %v6273_v11 }
  0xc2   : > { %704 = vrot.lane.b32.xlu1 %v329_v34, %s5924_s24  ;;  %702 = vrot.lane.b32.xlu0 %v328_v35, %s5924_s24  ;;  %v342_v34 = vmul.f32 128.0, %v5991_v9  ;;  %v346_v9 = vmul.f32 128.0, %v6011_v17  ;;  %v350_v17 = vmul.f32 128.0, %v6031_v25  ;;  %v6326_v25 = vld [vmem:[%s6317_s28 + $0x8] sm:$0xff] }
  0xc3   : > { %v938_v11 = vmul.f32 16.0, %v6326_v25 }
  0xc4   : > { %v6259_v57 = vpop.permute.xlu1 %464  ;;  %v6285_v35 = vpop.permute.xlu0 %462 }
  0xc5   : > { %11170 = vst [vmem:[#allocation6_spill] sm:$0xff] %v6259_v57  ;;  %11173 = vst [vmem:[#allocation9_spill] sm:$0xff] %v6285_v35 }
  0xc6   : > { %708 = vrot.lane.b32.xlu1 %v331_v39, %s5924_s24  ;;  %706 = vrot.lane.b32.xlu0 %v330_v42, %s5924_s24  ;;  %v344_v42 = vmul.f32 128.0, %v6001_v13  ;;  %v348_v13 = vmul.f32 128.0, %v6021_v21  ;;  %v353_v21 = vmul.f32 128.0, %v6038_v28  ;;  %v6338_v28 = vld [vmem:[%s6317_s28 + $0x18] sm:$0xff] }
  0xc8   : > { %v6267_v3 = vpop.permute.xlu1 %500 }
  0xca   : > { %712 = vrot.lane.b32.xlu1 %v333_v47, %s5924_s24  ;;  %710 = vrot.lane.b32.xlu0 %v332_v49, %s5924_s24  ;;  %v6293_v47 = vpop.permute.xlu0 %498 }
  0xcc   : > { %v6279_v23 = vpop.permute.xlu1 %504 }
  0xce   : > { %716 = vrot.lane.b32.xlu1 %v335_v53, %s5924_s24  ;;  %714 = vrot.lane.b32.xlu0 %v334_v54, %s5924_s24  ;;  %v6305_v53 = vpop.permute.xlu0 %502 }
  0xd0   : > { %v6287_v39 = vpop.permute.xlu1 %508 }
  0xd2   : > { %720 = vrot.lane.b32.xlu1 %v337_v58, %s5924_s24  ;;  %718 = vrot.lane.b32.xlu0 %v336_v60, %s5924_s24  ;;  %v6319_v20 = vpop.permute.xlu0 %506  ;;  %v6329_v58 = vld [vmem:[%s6317_s28] sm:$0xff] }
  0xd3   : > { %11176 = vst [vmem:[#allocation12_spill] sm:$0xff] %v6329_v58 }
  0xd4   : > { %v6299_v49 = vpop.permute.xlu1 %512 }
  0xd5   : > { %11174 = vst [vmem:[#allocation10_spill] sm:$0xff] %v6299_v49 }
  0xd6   : > { %756 = vrot.lane.b32.xlu1 %v339_v4, %s5925_s25  ;;  %754 = vrot.lane.b32.xlu0 %v338_v10, %s5925_s25  ;;  %v922_v4 = vmul.f32 4.0, %v6326_v25  ;;  %v921_v10 = vmul.f32 4.0, %v6329_v58 }
  0xd8   : > { %v6307_v54 = vpop.permute.xlu1 %516 }
  0xd9   : > { %11175 = vst [vmem:[#allocation11_spill] sm:$0xff] %v6307_v54 }
  0xda   : > { %760 = vrot.lane.b32.xlu1 %v341_v15, %s5925_s25  ;;  %758 = vrot.lane.b32.xlu0 %v340_v18, %s5925_s25  ;;  %v6343_v15 = vpop.permute.xlu0 %510 }
  0xdb   : > { %11178 = vst [vmem:[#allocation14_spill] sm:$0xff] %v6343_v15  ;;  %v6414_v15 = vld [vmem:[%s6317_s28 + $0x78] sm:$0xff] }
  0xdc   : > { %v6331_v60 = vpop.permute.xlu1 %520 }
  0xdd   : > { %11177 = vst [vmem:[#allocation13_spill] sm:$0xff] %v6331_v60 }
  0xde   : > { %764 = vrot.lane.b32.xlu1 %v343_v30, %s5925_s25  ;;  %762 = vrot.lane.b32.xlu0 %v342_v34, %s5925_s25  ;;  %v924_v30 = vmul.f32 4.0, %v6338_v28  ;;  %v923_v34 = vmul.f32 4.0, %v6341_v29 }
  0xe0   : > { %v6345_v18 = vpop.permute.xlu1 %524 }
  0xe1   : > { %11179 = vst [vmem:[#allocation15_spill] sm:$0xff] %v6345_v18  ;;  %v6393_v18 = vld [vmem:[%s6317_s28 + $0x50] sm:$0xff] }
  0xe2   : > { %768 = vrot.lane.b32.xlu1 %v345_v0, %s5925_s25  ;;  %766 = vrot.lane.b32.xlu0 %v344_v42, %s5925_s25  ;;  %v6352_v0 = vld [vmem:[%s6317_s28 + $0x28] sm:$0xff]  ;;  %v6355_v42 = vld [vmem:[%s6317_s28 + $0x20] sm:$0xff] }
  0xe6   : > { %772 = vrot.lane.b32.xlu1 %v347_v8, %s5925_s25  ;;  %770 = vrot.lane.b32.xlu0 %v346_v9, %s5925_s25  ;;  %v6357_v8 = vpop.permute.xlu0 %514  ;;  %v926_v9 = vmul.f32 4.0, %v6352_v0 }
  0xe7   : > { %11180 = vst [vmem:[#allocation16_spill] sm:$0xff] %v6357_v8  ;;  %v6405_v8 = vld [vmem:[%s6317_s28 + $0x60] sm:$0xff] }
  0xea   : > { %776 = vrot.lane.b32.xlu1 %v349_v12, %s5925_s25  ;;  %774 = vrot.lane.b32.xlu0 %v348_v13, %s5925_s25  ;;  %v925_v12 = vmul.f32 4.0, %v6355_v42  ;;  %v6364_v13 = vld [vmem:[%s6317_s28 + $0x38] sm:$0xff] }
  0xee   : > { %780 = vrot.lane.b32.xlu1 %v351_v16, %s5925_s25  ;;  %778 = vrot.lane.b32.xlu0 %v350_v17, %s5925_s25  ;;  %v6367_v16 = vld [vmem:[%s6317_s28 + $0x30] sm:$0xff]  ;;  %v6369_v17 = vpop.permute.xlu1 %528 }
  0xef   : > { %11181 = vst [vmem:[#allocation17_spill] sm:$0xff] %v6369_v17  ;;  %v6390_v17 = vld [vmem:[%s6317_s28 + $0x58] sm:$0xff] }
  0xf2   : > { %784 = vrot.lane.b32.xlu1 %v353_v21, %s5925_s25  ;;  %782 = vrot.lane.b32.xlu0 %v352_v24, %s5925_s25  ;;  %v928_v21 = vmul.f32 4.0, %v6364_v13  ;;  %v927_v24 = vmul.f32 4.0, %v6367_v16 }
  0xf6   : > { %1051 = vrot.lane.b32.xlu1 %v922_v4, %s5919_s19  ;;  %1049 = vrot.lane.b32.xlu0 %v921_v10, %s5919_s19  ;;  %v6376_v4 = vld [vmem:[%s6317_s28 + $0x48] sm:$0xff]  ;;  %v6379_v10 = vld [vmem:[%s6317_s28 + $0x40] sm:$0xff] }
  0xfa   : > { %1055 = vrot.lane.b32.xlu1 %v924_v30, %s5919_s19  ;;  %1053 = vrot.lane.b32.xlu0 %v923_v34, %s5919_s19  ;;  %v6381_v30 = vpop.permute.xlu0 %518  ;;  %v6383_v34 = vpop.permute.xlu1 %564 }
  0xfb   : > { %11182 = vst [vmem:[#allocation18_spill] sm:$0xff] %v6381_v30  ;;  %v6402_v30 = vld [vmem:[%s6317_s28 + $0x68] sm:$0xff] }
  0xfe   : > { %1059 = vrot.lane.b32.xlu1 %v926_v9, %s5919_s19  ;;  %1057 = vrot.lane.b32.xlu0 %v925_v12, %s5919_s19  ;;  %v930_v9 = vmul.f32 4.0, %v6376_v4  ;;  %v929_v12 = vmul.f32 4.0, %v6379_v10  ;;  %v6395_v60 = vpop.permute.xlu0 %522  ;;  %v6407_v54 = vpop.permute.xlu1 %568 }
  0xff   : > { %11183 = vst [vmem:[#allocation19_spill] sm:$0xff] %v6395_v60  ;;  %v934_v60 = vmul.f32 4.0, %v6402_v30 }
 0x102   : > { %1063 = vrot.lane.b32.xlu1 %v928_v21, %s5919_s19  ;;  %1061 = vrot.lane.b32.xlu0 %v927_v24, %s5919_s19  ;;  %v932_v21 = vmul.f32 4.0, %v6390_v17  ;;  %v931_v24 = vmul.f32 4.0, %v6393_v18  ;;  %v6419_v49 = vpop.permute.xlu0 %526  ;;  %v6421_v35 = vpop.permute.xlu1 %572 }
 0x103   : > { %11184 = vst [vmem:[#allocation20_spill] sm:$0xff] %v6419_v49  ;;  %v937_v49 = vmul.f32 16.0, %v6329_v58 }
 0x106   : > { %1067 = vrot.lane.b32.xlu1 %v930_v9, %s5919_s19  ;;  %1065 = vrot.lane.b32.xlu0 %v929_v12, %s5919_s19  ;;  %v933_v9 = vmul.f32 4.0, %v6405_v8  ;;  %v6417_v12 = vld [vmem:[%s6317_s28 + $0x70] sm:$0xff]  ;;  %v6427_v57 = vpop.permute.xlu0 %562  ;;  %v6433_v46 = vpop.permute.xlu1 %576 }
 0x107   : > { %11185 = vst [vmem:[#allocation21_spill] sm:$0xff] %v6433_v46 }
 0x10a   : > { %1071 = vrot.lane.b32.xlu1 %v932_v21, %s5919_s19  ;;  %1069 = vrot.lane.b32.xlu0 %v931_v24, %s5919_s19  ;;  %v936_v21 = vmul.f32 4.0, %v6414_v15  ;;  %v935_v24 = vmul.f32 4.0, %v6417_v12  ;;  %v6439_v61 = vpop.permute.xlu0 %566  ;;  %v6441_v38 = vpop.permute.xlu1 %580 }
 0x10b   : > { %11186 = vst [vmem:[#allocation22_spill] sm:$0xff] %v6441_v38 }
 0x10e   : > { %1075 = vrot.lane.b32.xlu1 %v934_v60, %s5919_s19  ;;  %1073 = vrot.lane.b32.xlu0 %v933_v9, %s5919_s19  ;;  %v940_v60 = vmul.f32 16.0, %v6338_v28  ;;  %v939_v9 = vmul.f32 16.0, %v6341_v29  ;;  %v6447_v46 = vpop.permute.xlu0 %570  ;;  %v6453_v50 = vpop.permute.xlu1 %584 }
 0x10f   : > { %11187 = vst [vmem:[#allocation23_spill] sm:$0xff] %v6453_v50 }
 0x112   : > { %1079 = vrot.lane.b32.xlu1 %v936_v21, %s5919_s19  ;;  %1077 = vrot.lane.b32.xlu0 %v935_v24, %s5919_s19  ;;  %v942_v21 = vmul.f32 16.0, %v6352_v0  ;;  %v941_v24 = vmul.f32 16.0, %v6355_v42  ;;  %v6459_v38 = vpop.permute.xlu0 %574  ;;  %v6461_v22 = vpop.permute.xlu1 %588 }
 0x113   : > { %11188 = vst [vmem:[#allocation24_spill] sm:$0xff] %v6459_v38  ;;  %11189 = vst [vmem:[#allocation25_spill] sm:$0xff] %v6461_v22 }
 0x116   : > { %1115 = vrot.lane.b32.xlu1 %v938_v11, %s5920_s20  ;;  %1113 = vrot.lane.b32.xlu0 %v937_v49, %s5920_s20  ;;  %v944_v11 = vmul.f32 16.0, %v6364_v13  ;;  %v943_v49 = vmul.f32 16.0, %v6367_v16  ;;  %v6467_v50 = vpop.permute.xlu0 %578  ;;  %v6473_v38 = vpop.permute.xlu1 %592 }
 0x117   : > { %11190 = vst [vmem:[#allocation26_spill] sm:$0xff] %v6467_v50  ;;  %11191 = vst [vmem:[#allocation27_spill] sm:$0xff] %v6473_v38 }
 0x11a   : > { %1119 = vrot.lane.b32.xlu1 %v940_v60, %s5920_s20  ;;  %1117 = vrot.lane.b32.xlu0 %v939_v9, %s5920_s20  ;;  %v946_v60 = vmul.f32 16.0, %v6376_v4  ;;  %v945_v9 = vmul.f32 16.0, %v6379_v10  ;;  %v6479_v22 = vpop.permute.xlu0 %582  ;;  %v6481_v50 = vpop.permute.xlu1 %628 }
 0x11b   : > { %11192 = vst [vmem:[#allocation28_spill] sm:$0xff] %v6479_v22 }
 0x11e   : > { %1123 = vrot.lane.b32.xlu1 %v942_v21, %s5920_s20  ;;  %1121 = vrot.lane.b32.xlu0 %v941_v24, %s5920_s20  ;;  %v948_v21 = vmul.f32 16.0, %v6390_v17  ;;  %v947_v24 = vmul.f32 16.0, %v6393_v18  ;;  %v6487_v38 = vpop.permute.xlu0 %586  ;;  %v6493_v22 = vpop.permute.xlu1 %632 }
 0x11f   : > { %11193 = vst [vmem:[#allocation29_spill] sm:$0xff] %v6487_v38 }
 0x122   : > { %1127 = vrot.lane.b32.xlu1 %v944_v11, %s5920_s20  ;;  %1125 = vrot.lane.b32.xlu0 %v943_v49, %s5920_s20  ;;  %v950_v11 = vmul.f32 16.0, %v6402_v30  ;;  %v949_v49 = vmul.f32 16.0, %v6405_v8  ;;  %v6501_v38 = vpop.permute.xlu1 %636 }
 0x126   : > { %1131 = vrot.lane.b32.xlu1 %v946_v60, %s5920_s20  ;;  %1129 = vrot.lane.b32.xlu0 %v945_v9, %s5920_s20  ;;  %v952_v60 = vmul.f32 16.0, %v6414_v15  ;;  %v951_v9 = vmul.f32 16.0, %v6417_v12 }
 0x12a   : > { %1135 = vrot.lane.b32.xlu1 %v948_v21, %s5920_s20  ;;  %1133 = vrot.lane.b32.xlu0 %v947_v24, %s5920_s20  ;;  %v954_v21 = vmul.f32 64.0, %v6326_v25  ;;  %v953_v24 = vmul.f32 64.0, %v6329_v58  ;;  %v6499_v58 = vpop.permute.xlu0 %590 }
 0x12b   : > { %11194 = vst [vmem:[#allocation30_spill] sm:$0xff] %v6499_v58 }
 0x12e   : > { %1139 = vrot.lane.b32.xlu1 %v950_v11, %s5920_s20  ;;  %1137 = vrot.lane.b32.xlu0 %v949_v49, %s5920_s20  ;;  %v956_v11 = vmul.f32 64.0, %v6338_v28  ;;  %v955_v49 = vmul.f32 64.0, %v6341_v29  ;;  %v960_v28 = vmul.f32 64.0, %v6364_v13  ;;  %v959_v29 = vmul.f32 64.0, %v6367_v16 }
 0x12f   : > { %v964_v13 = vmul.f32 64.0, %v6390_v17  ;;  %v963_v16 = vmul.f32 64.0, %v6393_v18  ;;  %v968_v18 = vmul.f32 64.0, %v6414_v15  ;;  %v967_v17 = vmul.f32 64.0, %v6417_v12 }
 0x132   : > { %1143 = vrot.lane.b32.xlu1 %v952_v60, %s5920_s20  ;;  %1141 = vrot.lane.b32.xlu0 %v951_v9, %s5920_s20  ;;  %v958_v60 = vmul.f32 64.0, %v6352_v0  ;;  %v957_v9 = vmul.f32 64.0, %v6355_v42  ;;  %v962_v0 = vmul.f32 64.0, %v6376_v4  ;;  %v961_v42 = vmul.f32 64.0, %v6379_v10 }
 0x133   : > { %v966_v4 = vmul.f32 64.0, %v6402_v30  ;;  %v965_v10 = vmul.f32 64.0, %v6405_v8 }
 0x136   : > { %1179 = vrot.lane.b32.xlu1 %v954_v21, %s5921_s21  ;;  %1177 = vrot.lane.b32.xlu0 %v953_v24, %s5921_s21  ;;  %v6507_v21 = vpop.permute.xlu0 %626  ;;  %v6513_v24 = vpop.permute.xlu1 %640 }
 0x137   : > { %11195 = vst [vmem:[#allocation31_spill] sm:$0xff] %v6513_v24 }
 0x13a   : > { %1183 = vrot.lane.b32.xlu1 %v956_v11, %s5921_s21  ;;  %1181 = vrot.lane.b32.xlu0 %v955_v49, %s5921_s21  ;;  %v6519_v11 = vpop.permute.xlu0 %630  ;;  %v6521_v49 = vpop.permute.xlu1 %644 }
 0x13b   : > { %11196 = vst [vmem:[#allocation32_spill] sm:$0xff] %v6521_v49 }
 0x13e   : > { %1187 = vrot.lane.b32.xlu1 %v958_v60, %s5921_s21  ;;  %1185 = vrot.lane.b32.xlu0 %v957_v9, %s5921_s21  ;;  %v6527_v60 = vpop.permute.xlu0 %634  ;;  %v6533_v9 = vpop.permute.xlu1 %648 }
 0x13f   : > { %11197 = vst [vmem:[#allocation33_spill] sm:$0xff] %v6533_v9 }
 0x142   : > { %1191 = vrot.lane.b32.xlu1 %v960_v28, %s5921_s21  ;;  %1189 = vrot.lane.b32.xlu0 %v959_v29, %s5921_s21  ;;  %v6537_v28 = vpop.permute.xlu0 %638  ;;  %v6539_v30 = vpop.permute.xlu1 %652 }
 0x143   : > { %11198 = vst [vmem:[#allocation34_spill] sm:$0xff] %v6537_v28  ;;  %11199 = vst [vmem:[#allocation35_spill] sm:$0xff] %v6539_v30 }
 0x146   : > { %1195 = vrot.lane.b32.xlu1 %v962_v0, %s5921_s21  ;;  %1193 = vrot.lane.b32.xlu0 %v961_v42, %s5921_s21  ;;  %v6541_v8 = vpop.permute.xlu0 %642  ;;  %v6543_v29 = vpop.permute.xlu1 %656 }
 0x147   : > { %11200 = vst [vmem:[#allocation36_spill] sm:$0xff] %v6541_v8  ;;  %11201 = vst [vmem:[#allocation37_spill] sm:$0xff] %v6543_v29  ;;  %v804_v8 = vsel %vm802_vm1, %v5981_v5, %v6145_v33 }
 0x14a   : > { %1199 = vrot.lane.b32.xlu1 %v964_v13, %s5921_s21  ;;  %1197 = vrot.lane.b32.xlu0 %v963_v16, %s5921_s21  ;;  %v6545_v0 = vpop.permute.xlu0 %646  ;;  %v693_v42 = vpop.permute.xlu1 %692 }
 0x14b   : > { %11202 = vst [vmem:[#allocation38_spill] sm:$0xff] %v6545_v0 }
 0x14e   : > { %1203 = vrot.lane.b32.xlu1 %v966_v4, %s5921_s21  ;;  %1201 = vrot.lane.b32.xlu0 %v965_v10, %s5921_s21  ;;  %v6547_v15 = vpop.permute.xlu0 %650  ;;  %v697_v12 = vpop.permute.xlu1 %696 }
 0x14f   : > { %11203 = vst [vmem:[#allocation39_spill] sm:$0xff] %v6547_v15 }
 0x152   : > { %1207 = vrot.lane.b32.xlu1 %v968_v18, %s5921_s21  ;;  %1205 = vrot.lane.b32.xlu0 %v967_v17, %s5921_s21  ;;  %v6549_v13 = vpop.permute.xlu0 %654  ;;  %v6551_v16 = vpop.permute.xlu1 %700 }
 0x153   : > { %11204 = vst [vmem:[#allocation40_spill] sm:$0xff] %v6549_v13 }
 0x156   : > { %v691_v4 = vpop.permute.xlu0 %690  ;;  %v6553_v10 = vpop.permute.xlu1 %704 }
 0x157   : > { %11205 = vst [vmem:[#allocation41_spill] sm:$0xff] %v6553_v10  ;;  %v11226_v10 = vmov 2131351028  }
 0x15a   : > { %v6555_v18 = vpop.permute.xlu0 %694  ;;  %v6557_v17 = vpop.permute.xlu1 %708 }
 0x15b   : > { %11206 = vst [vmem:[#allocation42_spill] sm:$0xff] %v6557_v17  ;;  %v821_v17 = vsel %vm819_vm0, %v804_v8, %v6197_v59 }
 0x15e   : > { %v6559_v30 = vpop.permute.xlu0 %698  ;;  %v6561_v29 = vpop.permute.xlu1 %712 }
 0x15f   : > { %11207 = vst [vmem:[#allocation43_spill] sm:$0xff] %v6561_v29 }
 0x162   : > { %v6563_v0 = vpop.permute.xlu0 %702  ;;  %v6565_v9 = vpop.permute.xlu1 %716 }
 0x163   : > { %11208 = vst [vmem:[#allocation44_spill] sm:$0xff] %v6563_v0  ;;  %11209 = vst [vmem:[#allocation45_spill] sm:$0xff] %v6565_v9  ;;  %v838_v9 = vsel %vm10984_vm2, %v821_v17, %v6267_v3 }
 0x166   : > { %v6567_v15 = vpop.permute.xlu0 %706  ;;  %v6569_v13 = vpop.permute.xlu1 %720 }
 0x167   : > { %11210 = vst [vmem:[#allocation46_spill] sm:$0xff] %v6567_v15  ;;  %11211 = vst [vmem:[#allocation47_spill] sm:$0xff] %v6569_v13  ;;  %v855_v13 = vsel %vm10983_vm3, %v838_v9, %v6383_v34  ;;  %v803_v34 = vsel %vm802_vm1, %v5973_v1, %v6137_v27  ;;  %v806_v27 = vsel %vm802_vm1, %v5976_v2, %v6143_v32 }
 0x168   : > { %v872_v0 = vsel %vm10982_vm4, %v855_v13, %v6481_v50  ;;  %v820_v9 = vsel %vm819_vm0, %v803_v34, %v6213_v7 }
 0x169   : > { %v889_v5 = vsel %vm10981_vm5, %v872_v0, %v693_v42  ;;  %v837_v0 = vsel %vm10984_vm2, %v820_v9, %v6293_v47 }
 0x16a   : > { %v6576_v29 = vpop.permute.xlu0 %710  ;;  %v757_v15 = vpop.permute.xlu1 %756  ;;  %v854_v42 = vsel %vm10983_vm3, %v837_v0, %v6427_v57  ;;  %v823_v57 = vsel %vm819_vm0, %v806_v27, %v6205_v63  ;;  %v10958_v27 = vmov 2475754826  }
 0x16b   : > { %11212 = vst [vmem:[#allocation48_spill] sm:$0xff] %v6576_v29  ;;  %v6586_v33 = vsel %vm11111_vm6, %v889_v5, %v757_v15  ;;  %v871_v13 = vsel %vm10982_vm4, %v854_v42, %v6507_v21  ;;  %v840_v21 = vsel %vm10984_vm2, %v823_v57, %v6279_v23  ;;  %v10954_v23 = vmov 920167782  }
 0x16c   : > { %11213 = vst [vmem:[#allocation49_spill] sm:$0xff] %v6586_v33  ;;  %v1700_v8 = vand.u32 2139095040, %v6586_v33  ;;  %v888_v17 = vsel %vm10981_vm5, %v871_v13, %v691_v4  ;;  %v857_v4 = vsel %vm10983_vm3, %v840_v21, %v6407_v54  ;;  %v10950_v13 = vmov 1326507024  }
 0x16d   : > { %v874_v9 = vsel %vm10982_vm4, %v857_v4, %v6493_v22 }
 0x16e   : > { %v6588_v59 = vpop.permute.xlu0 %714  ;;  %v1701_v3 = vshrl.u32 %v1700_v8, 23  ;;  %v761_v34 = vpop.permute.xlu1 %760 }
 0x16f   : > { %11214 = vst [vmem:[#allocation50_spill] sm:$0xff] %v6588_v59  ;;  %v5863_v59 = vld [vmem:[%s5967_s18 + $0x28] sm:$0xff] }
 0x170   : > { %v5554_v50 = vadd.s32 4294967169, %v1701_v3 }
 0x172   : > { %v6591_v29 = vpop.permute.xlu0 %718  ;;  %v1707_v5 = vadd.s32 1, %v5554_v50  ;;  %v891_v50 = vsel %vm10981_vm5, %v874_v9, %v697_v12 }
 0x173   : > { %11215 = vst [vmem:[#allocation51_spill] sm:$0xff] %v6591_v29  ;;  %v6622_v2 = vsel %vm11111_vm6, %v891_v50, %v761_v34  ;;  %v5862_v34 = vld [vmem:[%s5967_s18 + $0x10] sm:$0xff] }
 0x174   : > { %vm1708_vm7 = vcmp.gt.s32.totalorder %v1707_v5, 0  ;;  %11217 = vst [vmem:[#allocation53_spill] sm:$0xff] %v6622_v2  ;;  %v1908_v42 = vand.u32 2139095040, %v6622_v2  ;;  %v805_v9 = vsel %vm802_vm1, %v5862_v34, %v6135_v26 }
 0x175   : > { %v1709_v7 = vsel %vm1708_vm7, %v1707_v5, 0 }
 0x176   : > { %v755_v15 = vpop.permute.xlu0 %754  ;;  %v1711_v3 = vand.u32 31, %v1709_v7  ;;  %v6632_v12 = vshrl.u32 %v1709_v7, 5 }
 0x177   : > { %v6606_v8 = vsel %vm11111_vm6, %v888_v17, %v755_v15  ;;  %v10952_v17 = vmov 2102212464  }
 0x178   : > { %11216 = vst [vmem:[#allocation52_spill] sm:$0xff] %v6606_v8  ;;  %v1596_v1 = vand.u32 2139095040, %v6606_v8  ;;  %v6624_v32 = vsub.s32 32, %v1711_v3  ;;  %v1723_v5 = vshll.u32 %v10952_v17, %v1711_v3  ;;  %v1726_v7 = vshll.u32 %v10954_v23, %v1711_v3 }
 0x179   : > { %vm1732_vm9 = vcmp.lt.s32.totalorder %v6632_v12, 4  ;;  %vm1729_vm10 = vcmp.lt.s32.totalorder %v6632_v12, 1  ;;  %vm1731_vm11 = vcmp.lt.s32.totalorder %v6632_v12, 3  ;;  %vm1730_vm12 = vcmp.lt.s32.totalorder %v6632_v12, 2 }
 0x17a   : > { %v1597_v47 = vshrl.u32 %v1596_v1, 23  ;;  %v1724_v54 = vshrl.u32 %v10954_v23, %v6624_v32  ;;  %v1727_v22 = vshrl.u32 %v10950_v13, %v6624_v32  ;;  %v1909_v1 = vshrl.u32 %v1908_v42, 23 }
 0x17b   : > { %v1715_v57 = vshrl.u32 %v10958_v27, %v6624_v32  ;;  %v1721_v4 = vshrl.u32 %v10952_v17, %v6624_v32  ;;  %v1717_v13 = vshll.u32 %v10958_v27, %v1711_v3  ;;  %v808_v17 = vsel %vm802_vm1, %v5863_v59, %v6151_v36 }
 0x17c   : > { %v5550_v0 = vadd.s32 4294967169, %v1597_v47  ;;  %v10960_v47 = vmov 2131351028   ;;  %v1725_v50 = vor.u32 %v1724_v54, %v1723_v5  ;;  %v1728_v29 = vor.u32 %v1727_v22, %v1726_v7  ;;  %v5865_v7 = vld [vmem:[%s5967_s18 + $0x38] sm:$0xff] }
 0x17d   : > { %v1718_v21 = vshrl.u32 %v10960_v47, %v6624_v32  ;;  %v1720_v15 = vshll.u32 %v10960_v47, %v1711_v3  ;;  %v11218_v23 = vand.u32 2147483647, %v6586_v33  ;;  %v5562_v5 = vadd.s32 4294967169, %v1909_v1 }
 0x17e   : > { %v1603_v63 = vadd.s32 1, %v5550_v0  ;;  %v10956_v0 = vmov 683565275   ;;  %v6665_v36 = vsel %vm802_vm1, %v5865_v7, %v6159_v40  ;;  %v822_v59 = vsel %vm819_vm0, %v805_v9, %v6225_v19  ;;  %v5870_v7 = vld [vmem:[%s5967_s18 + $0x50] sm:$0xff] }
 0x17f   : > { %v1714_v42 = vshll.u32 %v10956_v0, %v1711_v3  ;;  %v1704_v26 = vand.u32 8388607, %v11218_v23  ;;  %v6656_v0 = vor.u32 %v1718_v21, %v1717_v13  ;;  %v1722_v27 = vor.u32 %v1721_v4, %v1720_v15  ;;  %v5864_v3 = vld [vmem:[%s5967_s18 + $0x20] sm:$0xff]  ;;  %v5866_v23 = vld [vmem:[%s5967_s18 + $0x30] sm:$0xff]  ;;  %v5867_v13 = vld [vmem:[%s5967_s18 + $0x48] sm:$0xff] }
 0x180   : > { %vm1604_vm8 = vcmp.gt.s32.totalorder %v1603_v63, 0  ;;  %v807_v22 = vsel %vm802_vm1, %v5864_v3, %v6153_v37  ;;  %v6674_v15 = vsel %vm802_vm1, %v5866_v23, %v6161_v41  ;;  %v6679_v37 = vsel %vm802_vm1, %v5867_v13, %v6167_v44  ;;  %v5868_v4 = vld [vmem:[%s5967_s18 + $0x40] sm:$0xff] }
 0x181   : > { %v1605_v54 = vsel %vm1604_vm8, %v1603_v63, 0  ;;  %v6654_v34 = vor.u32 %v1715_v57, %v1714_v42  ;;  %v1738_v63 = vsel %vm1732_vm9, %v1725_v50, 920167782  ;;  %v839_v40 = vsel %vm10984_vm2, %v822_v59, %v6305_v53 }
 0x182   : > { %v1742_v19 = vsel %vm1732_vm9, %v1728_v29, 1326507024  ;;  %v1607_v1 = vand.u32 31, %v1605_v54  ;;  %v1915_v41 = vadd.s32 1, %v5562_v5  ;;  %v856_v57 = vsel %vm10983_vm3, %v839_v40, %v6439_v61  ;;  %v759_v29 = vpop.permute.xlu0 %758  ;;  %v5869_v5 = vld [vmem:[%s5967_s18 + $0x58] sm:$0xff]  ;;  %v5872_v40 = vld [vmem:[%s5967_s18 + $0x60] sm:$0xff] }
 0x183   : > { %v1705_v21 = vor.u32 8388608, %v1704_v26  ;;  %v1737_v44 = vsel %vm1729_vm10, %v6654_v34, %v6656_v0  ;;  %v1739_v53 = vsel %vm1731_vm11, %v1722_v27, %v1738_v63  ;;  %v6698_v9 = vsel %vm802_vm1, %v5868_v4, %v6169_v45  ;;  %v5871_v63 = vld [vmem:[%s5967_s18 + $0x68] sm:$0xff] }
 0x184   : > { %v873_v42 = vsel %vm10982_vm4, %v856_v57, %v6519_v11  ;;  %v1741_v61 = vsel %vm1729_vm10, %v6656_v0, %v1722_v27  ;;  %v1743_v26 = vsel %vm1731_vm11, %v1725_v50, %v1742_v19  ;;  %v6710_v3 = vsel %vm802_vm1, %v5869_v5, %v6175_v48  ;;  %v5873_v57 = vld [vmem:[%s5967_s18 + $0x78] sm:$0xff] }
 0x185   : > { %v6715_v45 = vsel %vm802_vm1, %v5870_v7, %v6181_v51  ;;  %v890_v11 = vsel %vm10981_vm5, %v873_v42, %v6555_v18  ;;  %v1740_v50 = vsel %vm1730_vm12, %v1737_v44, %v1739_v53  ;;  %v6722_v59 = vsub.s32 32, %v1607_v1 }
 0x186   : > { %vm1916_vm13 = vcmp.gt.s32.totalorder %v1915_v41, 0  ;;  %v6725_v48 = vsel %vm11111_vm6, %v890_v11, %v759_v29  ;;  %v6730_v23 = vsel %vm802_vm1, %v5871_v63, %v6183_v52  ;;  %v825_v51 = vsel %vm819_vm0, %v808_v17, %v6211_v6 }
 0x187   : > { %11219 = vst [vmem:[#allocation54_spill] sm:$0xff] %v6725_v48  ;;  %v1744_v18 = vsel %vm1730_vm12, %v1741_v61, %v1743_v26  ;;  %v6736_v13 = vshll.u32 %v1705_v21, 8  ;;  %v6741_v19 = vsel %vm802_vm1, %v5872_v40, %v6191_v56  ;;  %v6746_v44 = vsel %vm802_vm1, %v5873_v57, %v6189_v55 }
 0x188   : > { %v6750_v52 = vsel %vm819_vm0, %v807_v22, %v6233_v31  ;;  %v842_v6 = vsel %vm10984_vm2, %v825_v51, %v6287_v39  ;;  %v1917_v53 = vsel %vm1916_vm13, %v1915_v41, 0  ;;  %v1804_v56 = vand.u32 2139095040, %v6725_v48 }
 0x189   : > { %v6755_v17 = vmul.u32.u64.low %v6736_v13, %v1740_v50  ;;  %v6756_v21 = vmul.u32.u64.high %v6736_v13, %v1740_v50, %v6755_v17  ;;  %v1734_v29 = vsel %vm1732_vm9, %v1722_v27, 2102212464  ;;  %v11220_v31 = vmov 920167782  }
 0x18a   : > { %v6763_v55 = vmul.u32.u64.low %v6736_v13, %v1744_v18  ;;  %v6764_v4 = vmul.u32.u64.high %v6736_v13, %v1744_v18, %v6763_v55  ;;  %v1620_v22 = vshrl.u32 %v11220_v31, %v6722_v59  ;;  %v11221_v39 = vmov 683565275  }
 0x18b   : > { %v1713_v42 = vshrl.u32 %v11221_v39, %v6624_v32  ;;  %v6771_v26 = vshrl.u32 %v1605_v54, 5  ;;  %v11222_v41 = vmov 1326507024   ;;  %v11223_v7 = vmov 2475754826  }
 0x18c   : > { %v1623_v5 = vshrl.u32 %v11222_v41, %v6722_v59  ;;  %v1611_v27 = vshrl.u32 %v11223_v7, %v6722_v59  ;;  %v1614_v11 = vshrl.u32 %v10960_v47, %v6722_v59  ;;  %v11224_v50 = vmov 2102212464  }
 0x18d   : > { %v1619_v63 = vshll.u32 %v11224_v50, %v1607_v1  ;;  %v1919_v51 = vand.u32 31, %v1917_v53  ;;  %v1733_v32 = vsel %vm1729_vm10, %v1713_v42, %v6654_v34  ;;  %v1735_v54 = vsel %vm1731_vm11, %v6656_v0, %v1734_v29 }
 0x18e   : > { %v1617_v18 = vshrl.u32 %v11224_v50, %v6722_v59  ;;  %v1622_v40 = vshll.u32 %v11220_v31, %v1607_v1  ;;  %v1610_v57 = vshll.u32 %v11221_v39, %v1607_v1  ;;  %v1613_v55 = vshll.u32 %v11223_v7, %v1607_v1 }
 0x18f   : > { %v1621_v47 = vor.u32 %v1620_v22, %v1619_v63  ;;  %v1805_v61 = vshrl.u32 %v1804_v56, 23  ;;  %v859_v33 = vsel %vm10983_vm3, %v842_v6, %v6421_v35  ;;  %v11225_v34 = vand.u32 2147483647, %v6606_v8 }
 0x190   : > { %v1616_v49 = vshll.u32 %v11226_v10, %v1607_v1  ;;  %v1624_v0 = vor.u32 %v1623_v5, %v1622_v40  ;;  %v1736_v29 = vsel %vm1730_vm12, %v1733_v32, %v1735_v54  ;;  %v6798_v28 = vor.u32 %v1611_v27, %v1610_v57 }
 0x191   : > { %v1600_v42 = vand.u32 8388607, %v11225_v34  ;;  %v6800_v24 = vor.u32 %v1614_v11, %v1613_v55  ;;  %v6802_v58 = vsub.s32 32, %v1919_v51  ;;  %v876_v56 = vsel %vm10982_vm4, %v859_v33, %v6501_v38 }
 0x192   : > { %v1755_v35 = vadd.s32 1, %v6756_v21  ;;  %v1618_v6 = vor.u32 %v1617_v18, %v1616_v49  ;;  %vm1628_vm14 = vcmp.lt.s32.totalorder %v6771_v26, 4  ;;  %vm1754_vm15 = vc.u32 %v6764_v4, %v6755_v17 }
 0x193   : > { %v1634_v12 = vsel %vm1628_vm14, %v1621_v47, 920167782  ;;  %v5558_v22 = vadd.s32 4294967169, %v1805_v61  ;;  %v1752_v5 = vmul.u32 %v6736_v13, %v1736_v29  ;;  %v1601_v27 = vor.u32 8388608, %v1600_v42 }
 0x194   : > { %vm1625_vm7 = vcmp.lt.s32.totalorder %v6771_v26, 1  ;;  %v1638_v38 = vsel %vm1628_vm14, %v1624_v0, 1326507024  ;;  %vm1626_vm8 = vcmp.lt.s32.totalorder %v6771_v26, 2  ;;  %vm1627_vm9 = vcmp.lt.s32.totalorder %v6771_v26, 3 }
 0x195   : > { %v1633_v49 = vsel %vm1625_vm7, %v6798_v28, %v6800_v24  ;;  %v1932_v33 = vshrl.u32 %v11220_v31, %v6802_v58  ;;  %v1756_v13 = vsel %vm1754_vm15, %v1755_v35, %v6756_v21  ;;  %v1635_v61 = vsel %vm1627_vm9, %v1618_v6, %v1634_v12 }
 0x196   : > { %v1637_v11 = vsel %vm1625_vm7, %v6800_v24, %v1618_v6  ;;  %v1935_v63 = vshrl.u32 %v11222_v41, %v6802_v58  ;;  %v1639_v32 = vsel %vm1627_vm9, %v1621_v47, %v1638_v38  ;;  %v6835_v54 = vshrl.u32 %v1917_v53, 5 }
 0x197   : > { %v1931_v18 = vshll.u32 %v11224_v50, %v1919_v51  ;;  %v1811_v40 = vadd.s32 1, %v5558_v22  ;;  %v1923_v21 = vshrl.u32 %v11223_v7, %v6802_v58  ;;  %v1926_v57 = vshrl.u32 %v11226_v10, %v6802_v58 }
 0x198   : > { %v1929_v55 = vshrl.u32 %v11224_v50, %v6802_v58  ;;  %v1934_v34 = vshll.u32 %v11220_v31, %v1919_v51  ;;  %v893_v42 = vsel %vm10981_vm5, %v876_v56, %v6551_v16  ;;  %v6847_v47 = vadd.s32 %v1756_v13, %v1752_v5 }
 0x199   : > { %v1636_v53 = vsel %vm1626_vm8, %v1633_v49, %v1635_v61  ;;  %v1933_v0 = vor.u32 %v1932_v33, %v1931_v18  ;;  %v1922_v29 = vshll.u32 %v11221_v39, %v1919_v51  ;;  %v1925_v35 = vshll.u32 %v11223_v7, %v1919_v51 }
 0x19a   : > { %v1928_v12 = vshll.u32 %v11226_v10, %v1919_v51  ;;  %v1936_v22 = vor.u32 %v1935_v63, %v1934_v34  ;;  %v1640_v38 = vsel %vm1626_vm8, %v1637_v11, %v1639_v32  ;;  %v6856_v1 = vshll.u32 %v1601_v27, 8  ;;  %v765_v11 = vpop.permute.xlu1 %764 }
 0x19b   : > { %v11227_v16 = vand.u32 2147483647, %v6622_v2  ;;  %vm1812_vm10 = vcmp.gt.s32.totalorder %v1811_v40, 0  ;;  %v1924_v5 = vor.u32 %v1923_v21, %v1922_v29  ;;  %v1927_v13 = vor.u32 %v1926_v57, %v1925_v35 }
 0x19c   : > { %v1930_v49 = vor.u32 %v1929_v55, %v1928_v12  ;;  %vm1940_vm11 = vcmp.lt.s32.totalorder %v6835_v54, 4  ;;  %v1758_v33 = vadd.s32 536870912, %v6847_v47  ;;  %v1813_v21 = vsel %vm1812_vm10, %v1811_v40, 0 }
 0x19d   : > { %v1912_v56 = vand.u32 8388607, %v11227_v16  ;;  %v6863_v61 = vmul.u32.u64.low %v6856_v1, %v1636_v53  ;;  %v6864_v51 = vmul.u32.u64.high %v6856_v1, %v1636_v53, %v6863_v61  ;;  %v1946_v27 = vsel %vm1940_vm11, %v1933_v0, 920167782 }
 0x19e   : > { %v6870_v63 = vmul.u32.u64.low %v6856_v1, %v1640_v38  ;;  %v6871_v32 = vmul.u32.u64.high %v6856_v1, %v1640_v38, %v6870_v63  ;;  %v1950_v18 = vsel %vm1940_vm11, %v1936_v22, 1326507024  ;;  %v1609_v57 = vshrl.u32 %v11221_v39, %v6722_v59  ;;  %v5874_v38 = vld [vmem:[%s5967_s18 + $0x70] sm:$0xff] }
 0x19f   : > { %v1913_v55 = vor.u32 8388608, %v1912_v56  ;;  %vm1937_vm12 = vcmp.lt.s32.totalorder %v6835_v54, 1  ;;  %vm1939_vm13 = vcmp.lt.s32.totalorder %v6835_v54, 3  ;;  %v1630_v34 = vsel %vm1628_vm14, %v1618_v6, 2102212464 }
 0x1a0   : > { %v1945_v53 = vsel %vm1937_vm12, %v1924_v5, %v1927_v13  ;;  %v1947_v29 = vsel %vm1939_vm13, %v1930_v49, %v1946_v27  ;;  %v6886_v35 = vsel %vm11111_vm6, %v893_v42, %v765_v11  ;;  %v6888_v40 = vshrl.u32 %v1758_v33, 30 }
 0x1a1   : > { %11228 = vst [vmem:[#allocation55_spill] sm:$0xff] %v6886_v35  ;;  %v1949_v59 = vsel %vm1937_vm12, %v1927_v13, %v1930_v49  ;;  %v1951_v12 = vsel %vm1939_vm13, %v1933_v0, %v1950_v18  ;;  %v1815_v22 = vand.u32 31, %v1813_v21  ;;  %v6897_v6 = vsel %vm802_vm1, %v5874_v38, %v6203_v62 }
 0x1a2   : > { %v6902_v16 = vsel %vm819_vm0, %v6665_v36, %v6219_v14  ;;  %v841_v42 = vsel %vm10984_vm2, %v6750_v52, %v6319_v20  ;;  %vm1938_vm14 = vcmp.lt.s32.totalorder %v6835_v54, 2  ;;  %v1629_v0 = vsel %vm1625_vm7, %v1609_v57, %v6798_v28  ;;  %v11231_v54 = vld [vmem:[#allocation12_spill] sm:$0xff] }
 0x1a3   : > { %v1631_v62 = vsel %vm1627_vm9, %v6800_v24, %v1630_v34  ;;  %v1948_v56 = vsel %vm1938_vm14, %v1945_v53, %v1947_v29  ;;  %v2116_v14 = vand.u32 2139095040, %v6886_v35  ;;  %v6920_v36 = vsel %vm819_vm0, %v6674_v15, %v6245_v43  ;;  %v763_v34 = vpop.permute.xlu0 %762  ;;  %v11229_v53 = vld [vmem:[#allocation2_spill] sm:$0xff] }
 0x1a4   : > { %v858_v20 = vsel %vm10983_vm3, %v841_v42, %v6447_v46  ;;  %v1952_v28 = vsel %vm1938_vm14, %v1949_v59, %v1951_v12  ;;  %v6926_v52 = vshll.u32 %v1913_v55, 8  ;;  %v1760_v24 = vshll.u32 %v6888_v40, 30 }
 0x1a5   : > { %v1651_v33 = vadd.s32 1, %v6864_v51  ;;  %v10964_v27 = vand.u32 2147483647, %v6725_v48  ;;  %v6931_v11 = vsub.s32 32, %v1815_v22  ;;  %v1632_v43 = vsel %vm1626_vm8, %v1629_v0, %v1631_v62 }
 0x1a6   : > { %vm1650_vm15 = vc.u32 %v6871_v32, %v6863_v61  ;;  %v6938_v46 = vmul.u32.u64.low %v6926_v52, %v1948_v56  ;;  %v6939_v15 = vmul.u32.u64.high %v6926_v52, %v1948_v56, %v6938_v46  ;;  %v875_v63 = vsel %vm10982_vm4, %v858_v20, %v6527_v60 }
 0x1a7   : > { %v6945_v18 = vmul.u32.u64.low %v6926_v52, %v1952_v28  ;;  %v6946_v57 = vmul.u32.u64.high %v6926_v52, %v1952_v28, %v6945_v18  ;;  %v2117_v55 = vshrl.u32 %v2116_v14, 23  ;;  %v6951_v26 = vsel %vm819_vm0, %v6679_v37, %v11229_v53 }
 0x1a8   : > { %v892_v29 = vsel %vm10981_vm5, %v875_v63, %v6559_v30  ;;  %v1921_v59 = vshrl.u32 %v11221_v39, %v6802_v58  ;;  %v1942_v60 = vsel %vm1940_vm11, %v1930_v49, 2102212464  ;;  %v6960_v12 = vsub.s32 %v6847_v47, %v1760_v24 }
 0x1a9   : > { %v1648_v38 = vmul.u32 %v6856_v1, %v1632_v43  ;;  %v1652_v42 = vsel %vm1650_vm15, %v1651_v33, %v6864_v51  ;;  %v1831_v37 = vshrl.u32 %v11222_v41, %v6931_v11  ;;  %v1808_v30 = vand.u32 8388607, %v10964_v27 }
 0x1aa   : > { %v1941_v0 = vsel %vm1937_vm12, %v1921_v59, %v1924_v5  ;;  %v1828_v58 = vshrl.u32 %v11220_v31, %v6931_v11  ;;  %v6973_v49 = vsel %vm11111_vm6, %v892_v29, %v763_v34  ;;  %v1943_v1 = vsel %vm1939_vm13, %v1927_v13, %v1942_v60 }
 0x1ab   : > { %11230 = vst [vmem:[#allocation2_spill] sm:$0xff] %v6973_v49  ;;  %v1822_v47 = vshrl.u32 %v11226_v10, %v6931_v11  ;;  %v1830_v51 = vshll.u32 %v11220_v31, %v1815_v22  ;;  %v5570_v62 = vadd.s32 4294967169, %v2117_v55  ;;  %v6980_v56 = vadd.s32 %v1652_v42, %v1648_v38  ;;  %v11232_v38 = vld [vmem:[#allocation5_spill] sm:$0xff] }
 0x1ac   : > { %v6982_v5 = vshrl.u32 %v1813_v21, 5  ;;  %v1825_v14 = vshrl.u32 %v11224_v50, %v6931_v11  ;;  %v1827_v20 = vshll.u32 %v11224_v50, %v1815_v22  ;;  %v1763_v28 = vsub.s32 0, %v6960_v12 }
 0x1ad   : > { %v1819_v13 = vshrl.u32 %v11223_v7, %v6931_v11  ;;  %v1821_v24 = vshll.u32 %v11223_v7, %v1815_v22  ;;  %v1832_v33 = vor.u32 %v1831_v37, %v1830_v51  ;;  %v1944_v43 = vsel %vm1938_vm14, %v1941_v0, %v1943_v1 }
 0x1ae   : > { %v1963_v63 = vadd.s32 1, %v6939_v15  ;;  %v1824_v21 = vshll.u32 %v11226_v10, %v1815_v22  ;;  %v1829_v18 = vor.u32 %v1828_v58, %v1827_v20  ;;  %vm1962_vm7 = vc.u32 %v6946_v57, %v6938_v46  ;;  %v11233_v58 = vld [vmem:[#allocation3_spill] sm:$0xff] }
 0x1af   : > { %v1818_v55 = vshll.u32 %v11221_v39, %v1815_v22  ;;  %v6998_v34 = vor.u32 %v1822_v47, %v1821_v24  ;;  %v2123_v53 = vadd.s32 1, %v5570_v62  ;;  %vm1836_vm8 = vcmp.lt.s32.totalorder %v6982_v5, 4 }
 0x1b0   : > { %v1826_v29 = vor.u32 %v1825_v14, %v1824_v21  ;;  %v970_v59 = vmul.f32 256.0, %v6326_v25  ;;  %v969_v60 = vmul.f32 256.0, %v11231_v54  ;;  %v828_v42 = vsel %vm819_vm0, %v6698_v9, %v11232_v38  ;;  %v11236_v21 = vld [vmem:[#allocation8_spill] sm:$0xff] }
 0x1b1   : > { %v1654_v37 = vadd.s32 536870912, %v6980_v56  ;;  %v1820_v0 = vor.u32 %v1819_v13, %v1818_v55  ;;  %v1846_v22 = vsel %vm1836_vm8, %v1832_v33, 1326507024  ;;  %v831_v1 = vsel %vm819_vm0, %v6710_v3, %v11233_v58  ;;  %v11235_v33 = vld [vmem:[#allocation4_spill] sm:$0xff]  ;;  %v11237_v55 = vld [vmem:[#allocation6_spill] sm:$0xff] }
 0x1b2   : > { %v1960_v47 = vmul.u32 %v6926_v52, %v1944_v43  ;;  %v1964_v25 = vsel %vm1962_vm7, %v1963_v63, %v6939_v15  ;;  %v1842_v51 = vsel %vm1836_vm8, %v1829_v18, 920167782  ;;  %1243 = vrot.lane.b32.xlu1 %v970_v59, %s5922_s22  ;;  %1241 = vrot.lane.b32.xlu0 %v969_v60, %s5922_s22  ;;  %vm1833_vm9 = vcmp.lt.s32.totalorder %v6982_v5, 1 }
 0x1b3   : > { %vm1835_vm10 = vcmp.lt.s32.totalorder %v6982_v5, 3  ;;  %vm2124_vm11 = vcmp.gt.s32.totalorder %v2123_v53, 0  ;;  %v2012_v9 = vand.u32 2139095040, %v6973_v49  ;;  %v5555_v3 = vmin.u32 %v1763_v28, %v6960_v12  ;;  %v11234_v28 = vld [vmem:[#allocation7_spill] sm:$0xff] }
 0x1b4   : > { %v1809_v62 = vor.u32 8388608, %v1808_v30  ;;  %v1845_v52 = vsel %vm1833_vm9, %v6998_v34, %v1826_v29  ;;  %v1847_v15 = vsel %vm1835_vm10, %v1829_v18, %v1846_v22  ;;  %v7027_v14 = vshrl.u32 %v1654_v37, 30  ;;  %v11239_v22 = vld [vmem:[#allocation10_spill] sm:$0xff] }
 0x1b5   : > { %v7029_v20 = vadd.s32 %v1964_v25, %v1960_v47  ;;  %v1841_v13 = vsel %vm1833_vm9, %v1820_v0, %v6998_v34  ;;  %v1843_v24 = vsel %vm1835_vm10, %v1826_v29, %v1842_v51  ;;  %v830_v30 = vsel %vm819_vm0, %v6715_v45, %v11234_v28  ;;  %v11238_v45 = vld [vmem:[#allocation9_spill] sm:$0xff]  ;;  %v11240_v25 = vld [vmem:[#allocation14_spill] sm:$0xff] }
 0x1b6   : > { %v833_v43 = vsel %vm819_vm0, %v6730_v23, %v11235_v33  ;;  %vm1834_vm12 = vcmp.lt.s32.totalorder %v6982_v5, 2  ;;  %v2125_v63 = vsel %vm2124_vm11, %v2123_v53, 0  ;;  %v832_v18 = vsel %vm819_vm0, %v6741_v19, %v11236_v21  ;;  %v11245_v28 = vld [vmem:[#allocation13_spill] sm:$0xff]  ;;  %v11246_v33 = vld [vmem:[#allocation18_spill] sm:$0xff] }
 0x1b7   : > { %v835_v59 = vsel %vm819_vm0, %v6746_v44, %v11237_v55  ;;  %v1848_v54 = vsel %vm1834_vm12, %v1845_v52, %v1847_v15  ;;  %v2013_v60 = vshrl.u32 %v2012_v9, 23  ;;  %v834_v38 = vsel %vm819_vm0, %v6897_v6, %v11238_v45  ;;  %v11241_v6 = vld [vmem:[#allocation11_spill] sm:$0xff]  ;;  %v11243_v52 = vld [vmem:[#allocation16_spill] sm:$0xff] }
 0x1b8   : > { %v1765_v23 = vclz %v5555_v3  ;;  %v1844_v53 = vsel %vm1834_vm12, %v1841_v13, %v1843_v24  ;;  %v7056_v37 = vshll.u32 %v1809_v62, 8  ;;  %v844_v19 = vsel %vm10984_vm2, %v6902_v16, %v11239_v22  ;;  %v11248_v22 = vld [vmem:[#allocation19_spill] sm:$0xff] }
 0x1b9   : > { %v1656_v44 = vshll.u32 %v7027_v14, 30  ;;  %v1966_v58 = vadd.s32 536870912, %v7029_v20  ;;  %v2127_v47 = vand.u32 31, %v2125_v63  ;;  %v843_v51 = vsel %vm10984_vm2, %v6920_v36, %v11240_v25 }
 0x1ba   : > { %v846_v9 = vsel %vm10984_vm2, %v6951_v26, %v11241_v6  ;;  %v7070_v3 = vmul.u32.u64.low %v7056_v37, %v1848_v54  ;;  %v7071_v62 = vmul.u32.u64.high %v7056_v37, %v1848_v54, %v7070_v3  ;;  %v845_v16 = vsel %vm10984_vm2, %v828_v42, %v11243_v52 }
 0x1bb   : > { %v7076_v15 = vmul.u32.u64.low %v7056_v37, %v1844_v53  ;;  %v7077_v13 = vmul.u32.u64.high %v7056_v37, %v1844_v53, %v7076_v15  ;;  %v5566_v24 = vadd.s32 4294967169, %v2013_v60  ;;  %v848_v36 = vsel %vm10984_vm2, %v831_v1, %v11245_v28  ;;  %v11247_v60 = vld [vmem:[#allocation15_spill] sm:$0xff] }
 0x1bc   : > { %11242 = vst [vmem:[#allocation12_spill] sm:$0xff] %v7071_v62  ;;  %v847_v21 = vsel %vm10984_vm2, %v830_v30, %v11246_v33  ;;  %v5556_v26 = vadd.s32 4294967294, %v1765_v23  ;;  %v1838_v55 = vsel %vm1836_vm8, %v1826_v29, 2102212464  ;;  %v7087_v54 = vsub.s32 %v6980_v56, %v1656_v44  ;;  %v11249_v23 = vld [vmem:[#allocation17_spill] sm:$0xff]  ;;  %v11250_v29 = vld [vmem:[#allocation20_spill] sm:$0xff] }
 0x1bd   : > { %11244 = vst [vmem:[#allocation5_spill] sm:$0xff] %v7076_v15  ;;  %v7089_v42 = vshrl.u32 %v1966_v58, 30  ;;  %v1817_v45 = vshrl.u32 %v11221_v39, %v6931_v11  ;;  %v7093_v53 = vsub.s32 32, %v2127_v47  ;;  %v850_v1 = vsel %vm10984_vm2, %v833_v43, %v11247_v60  ;;  %v11251_v44 = vld [vmem:[#allocation21_spill] sm:$0xff] }
 0x1be   : > { %v849_v30 = vsel %vm10984_vm2, %v832_v18, %v11248_v22  ;;  %v852_v25 = vsel %vm10984_vm2, %v835_v59, %v11249_v23  ;;  %v7103_v56 = vsel %vm10984_vm2, %v834_v38, %v11250_v29  ;;  %v7107_v58 = vsel %vm10983_vm3, %v844_v19, %v11251_v44  ;;  %v11252_v18 = vld [vmem:[#allocation24_spill] sm:$0xff]  ;;  %v11253_v59 = vld [vmem:[#allocation22_spill] sm:$0xff]  ;;  %v11255_v19 = vld [vmem:[#allocation23_spill] sm:$0xff] }
 0x1bf   : > { %v1837_v11 = vsel %vm1833_vm9, %v1817_v45, %v1820_v0  ;;  %v1839_v43 = vsel %vm1835_vm10, %v6998_v34, %v1838_v55  ;;  %v2019_v6 = vadd.s32 1, %v5566_v24  ;;  %v860_v3 = vsel %vm10983_vm3, %v843_v51, %v11252_v18  ;;  %v11254_v38 = vld [vmem:[#allocation26_spill] sm:$0xff] }
 0x1c0   : > { %v863_v52 = vsel %vm10983_vm3, %v846_v9, %v11253_v59  ;;  %v7120_v28 = vsel %vm10983_vm3, %v845_v16, %v11254_v38  ;;  %v7124_v33 = vsel %vm10983_vm3, %v848_v36, %v11255_v19  ;;  %vm5557_vm13 = vcmp.lt.s32.totalorder %v5556_v26, 0 }
 0x1c1   : > { %v1659_v0 = vsub.s32 0, %v7087_v54  ;;  %v1968_v34 = vshll.u32 %v7089_v42, 30  ;;  %v2140_v24 = vshrl.u32 %v11220_v31, %v7093_v53  ;;  %v1840_v51 = vsel %vm1834_vm12, %v1837_v11, %v1839_v43 }
 0x1c2   : > { %vm1858_vm14 = vc.u32 %v7071_v62, %v7076_v15  ;;  %v10965_v9 = vand.u32 2147483647, %v6886_v35  ;;  %v2143_v16 = vshrl.u32 %v11222_v41, %v7093_v53  ;;  %v1859_v36 = vadd.s32 1, %v7077_v13 }
 0x1c3   : > { %v7138_v55 = vshrl.u32 %v2125_v63, 5  ;;  %v2139_v45 = vshll.u32 %v11224_v50, %v2127_v47  ;;  %vm2020_vm15 = vcmp.gt.s32.totalorder %v2019_v6, 0  ;;  %v2131_v60 = vshrl.u32 %v11223_v7, %v7093_v53 }
 0x1c4   : > { %v2134_v5 = vshrl.u32 %v11226_v10, %v7093_v53  ;;  %v2137_v22 = vshrl.u32 %v11224_v50, %v7093_v53  ;;  %v2142_v23 = vshll.u32 %v11220_v31, %v2127_v47  ;;  %v7149_v29 = vsel %vm5557_vm13, 0, %v5556_v26 }
 0x1c5   : > { %v7152_v63 = vsub.s32 %v7029_v20, %v1968_v34  ;;  %v2130_v44 = vshll.u32 %v11221_v39, %v2127_v47  ;;  %v2141_v11 = vor.u32 %v2140_v24, %v2139_v45  ;;  %v2133_v43 = vshll.u32 %v11223_v7, %v2127_v47 }
 0x1c6   : > { %v2136_v18 = vshll.u32 %v11226_v10, %v2127_v47  ;;  %v2144_v59 = vor.u32 %v2143_v16, %v2142_v23  ;;  %v2021_v38 = vsel %vm2020_vm15, %v2019_v6, 0  ;;  %v5551_v19 = vmin.u32 %v1659_v0, %v7087_v54  ;;  %v11256_v47 = vld [vmem:[#allocation28_spill] sm:$0xff] }
 0x1c7   : > { %v1856_v27 = vmul.u32 %v7056_v37, %v1840_v51  ;;  %v1860_v26 = vsel %vm1858_vm14, %v1859_v36, %v7077_v13  ;;  %v2120_v20 = vand.u32 8388607, %v10965_v9  ;;  %v7165_v34 = vor.u32 %v2131_v60, %v2130_v44  ;;  %v11257_v51 = vld [vmem:[#allocation25_spill] sm:$0xff] }
 0x1c8   : > { %v7167_v24 = vor.u32 %v2134_v5, %v2133_v43  ;;  %v2138_v45 = vor.u32 %v2137_v22, %v2136_v18  ;;  %vm2148_vm7 = vcmp.lt.s32.totalorder %v7138_v55, 4  ;;  %v7172_v6 = vsel %vm10983_vm3, %v847_v21, %v11256_v47  ;;  %v11258_v36 = vld [vmem:[#allocation29_spill] sm:$0xff]  ;;  %v11259_v22 = vld [vmem:[#allocation27_spill] sm:$0xff] }
 0x1c9   : > { %v1971_v37 = vsub.s32 0, %v7152_v63  ;;  %v2154_v0 = vsel %vm2148_vm7, %v2141_v11, 920167782  ;;  %v2023_v13 = vand.u32 31, %v2021_v38  ;;  %v7179_v16 = vsel %vm10983_vm3, %v850_v1, %v11257_v51  ;;  %v11261_v47 = vld [vmem:[#allocation31_spill] sm:$0xff]  ;;  %v11262_v51 = vld [vmem:[#allocation34_spill] sm:$0xff] }
 0x1ca   : > { %v7183_v60 = vsel %vm10983_vm3, %v849_v30, %v11258_v36  ;;  %v7185_v5 = vadd.s32 %v1860_v26, %v1856_v27  ;;  %v2158_v21 = vsel %vm2148_vm7, %v2144_v59, 1326507024  ;;  %v7191_v23 = vsel %vm10983_vm3, %v852_v25, %v11259_v22  ;;  %v11264_v22 = vld [vmem:[#allocation41_spill] sm:$0xff] }
 0x1cb   : > { %v1773_v44 = vsub.s32 4294967266, %v7149_v29  ;;  %vm2145_vm8 = vcmp.lt.s32.totalorder %v7138_v55, 1  ;;  %vm2147_vm9 = vcmp.lt.s32.totalorder %v7138_v55, 3  ;;  %v1661_v1 = vclz %v5551_v19  ;;  %v11260_v19 = vld [vmem:[#allocation30_spill] sm:$0xff] }
 0x1cc   : > { %v2121_v43 = vor.u32 8388608, %v2120_v20  ;;  %v2153_v27 = vsel %vm2145_vm8, %v7165_v34, %v7167_v24  ;;  %v2155_v30 = vsel %vm2147_vm9, %v2138_v45, %v2154_v0  ;;  %v5563_v18 = vmin.u32 %v1971_v37, %v7152_v63 }
 0x1cd   : > { %v2157_v25 = vsel %vm2145_vm8, %v7167_v24, %v2138_v45  ;;  %v2159_v59 = vsel %vm2147_vm9, %v2141_v11, %v2158_v21  ;;  %v7208_v26 = vsub.s32 32, %v2023_v13  ;;  %v7213_v20 = vsel %vm10983_vm3, %v7103_v56, %v11260_v19  ;;  %v11263_v11 = vld [vmem:[#allocation32_spill] sm:$0xff] }
 0x1ce   : > { %v878_v0 = vsel %vm10982_vm4, %v7107_v58, %v11261_v47  ;;  %v1862_v37 = vadd.s32 536870912, %v7185_v5  ;;  %vm2146_vm10 = vcmp.lt.s32.totalorder %v7138_v55, 2  ;;  %v7222_v36 = vsel %vm10982_vm4, %v860_v3, %v11262_v51 }
 0x1cf   : > { %v7226_v21 = vsel %vm10982_vm4, %v863_v52, %v11263_v11  ;;  %v895_v56 = vsel %vm10981_vm5, %v878_v0, %v11264_v22  ;;  %v2156_v19 = vsel %vm2146_vm10, %v2153_v27, %v2155_v30  ;;  %v1753_v58 = vadd.s32 %v6755_v17, %v6764_v4 }
 0x1d0   : > { %v7234_v47 = vadd.s32 127, %v1773_v44  ;;  %v2160_v9 = vsel %vm2146_vm10, %v2157_v25, %v2159_v59  ;;  %v7238_v3 = vshll.u32 %v2121_v43, 8  ;;  %v5552_v51 = vadd.s32 4294967294, %v1661_v1 }
 0x1d1   : > { %v1973_v35 = vclz %v5563_v18  ;;  %v10976_v52 = vand.u32 2147483647, %v6973_v49  ;;  %v2036_v0 = vshrl.u32 %v11220_v31, %v7208_v26  ;;  %v7243_v11 = vshrl.u32 %v1862_v37, 30 }
 0x1d2   : > { %v7246_v27 = vmul.u32.u64.low %v7238_v3, %v2156_v19  ;;  %v7247_v30 = vmul.u32.u64.high %v7238_v3, %v2156_v19, %v7246_v27  ;;  %v2039_v17 = vshrl.u32 %v11222_v41, %v7208_v26  ;;  %v7256_v1 = vshrl.u32 %v2021_v38, 5 }
 0x1d3   : > { %v7253_v4 = vmul.u32.u64.low %v7238_v3, %v2160_v9  ;;  %v7254_v44 = vmul.u32.u64.high %v7238_v3, %v2160_v9, %v7253_v4  ;;  %v2035_v43 = vshll.u32 %v11224_v50, %v2023_v13  ;;  %v2027_v18 = vshrl.u32 %v11223_v7, %v7208_v26 }
 0x1d4   : > { %v2030_v25 = vshrl.u32 %v11226_v10, %v7208_v26  ;;  %v2033_v59 = vshrl.u32 %v11224_v50, %v7208_v26  ;;  %v2038_v37 = vshll.u32 %v11220_v31, %v2023_v13  ;;  %vm5553_vm11 = vcmp.lt.s32.totalorder %v5552_v51, 0 }
 0x1d5   : > { %v5564_v22 = vadd.s32 4294967294, %v1973_v35  ;;  %v2016_v9 = vand.u32 8388607, %v10976_v52  ;;  %v2037_v38 = vor.u32 %v2036_v0, %v2035_v43  ;;  %v2026_v19 = vshll.u32 %v11221_v39, %v2023_v13 }
 0x1d6   : > { %v2029_v4 = vshll.u32 %v11223_v7, %v2023_v13  ;;  %v2032_v48 = vshll.u32 %v11226_v10, %v2023_v13  ;;  %v2040_v41 = vor.u32 %v2039_v17, %v2038_v37  ;;  %v1769_v15 = vsub.s32 32, %v7149_v29 }
 0x1d7   : > { %v1864_v62 = vshll.u32 %v7243_v11, 30  ;;  %v2129_v50 = vshrl.u32 %v11221_v39, %v7093_v53  ;;  %v2150_v35 = vsel %vm2148_vm7, %v2138_v45, 2102212464  ;;  %v7277_v49 = vor.u32 %v2027_v18, %v2026_v19  ;;  %v769_v53 = vpop.permute.xlu1 %768 }
 0x1d8   : > { %v7279_v0 = vor.u32 %v2030_v25, %v2029_v4  ;;  %v2034_v43 = vor.u32 %v2033_v59, %v2032_v48  ;;  %vm2044_vm12 = vcmp.lt.s32.totalorder %v7256_v1, 4  ;;  %v1775_v13 = vshll.u32 %v7234_v47, 23 }
 0x1d9   : > { %v7284_v17 = vsel %vm5553_vm11, 0, %v5552_v51  ;;  %vm5565_vm13 = vcmp.lt.s32.totalorder %v5564_v22, 0  ;;  %v2050_v37 = vsel %vm2044_vm12, %v2037_v38, 920167782  ;;  %v2149_v45 = vsel %vm2145_vm8, %v2129_v50, %v7165_v34 }
 0x1da   : > { %v2151_v48 = vsel %vm2147_vm9, %v7167_v24, %v2150_v35  ;;  %v2017_v18 = vor.u32 8388608, %v2016_v9  ;;  %v2054_v47 = vsel %vm2044_vm12, %v2040_v41, 1326507024  ;;  %v7297_v51 = vsub.s32 %v7185_v5, %v1864_v62  ;;  %v11266_v9 = vld [vmem:[#allocation36_spill] sm:$0xff] }
 0x1db   : > { %v2171_v25 = vadd.s32 1, %v7247_v30  ;;  %vm2041_vm14 = vcmp.lt.s32.totalorder %v7256_v1, 1  ;;  %vm2043_vm15 = vcmp.lt.s32.totalorder %v7256_v1, 3  ;;  %vm2170_vm7 = vc.u32 %v7254_v44, %v7246_v27 }
 0x1dc   : > { %v2049_v50 = vsel %vm2041_vm14, %v7277_v49, %v7279_v0  ;;  %v2051_v41 = vsel %vm2043_vm15, %v2034_v43, %v2050_v37  ;;  %v7311_v62 = vsel %vm11111_vm6, %v895_v56, %v769_v53  ;;  %v1669_v34 = vsub.s32 4294967266, %v7284_v17 }
 0x1dd   : > { %11265 = vst [vmem:[#allocation3_spill] sm:$0xff] %v7311_v62  ;;  %v2152_v24 = vsel %vm2146_vm10, %v2149_v45, %v2151_v48  ;;  %v2053_v5 = vsel %vm2041_vm14, %v7279_v0, %v2034_v43  ;;  %v2055_v59 = vsel %vm2043_vm15, %v2037_v38, %v2054_v47  ;;  %v7324_v19 = vsel %vm10982_vm4, %v7120_v28, %v11266_v9 }
 0x1de   : > { %v1770_v56 = vshll.u32 %v6960_v12, %v7149_v29  ;;  %v7329_v4 = vsel %vm5565_vm13, 0, %v5564_v22  ;;  %vm2042_vm8 = vcmp.lt.s32.totalorder %v7256_v1, 2  ;;  %v1771_v55 = vshrl.u32 %v1753_v58, %v1769_v15 }
 0x1df   : > { %v2172_v35 = vsel %vm2170_vm7, %v2171_v25, %v7247_v30  ;;  %v2052_v38 = vsel %vm2042_vm8, %v2049_v50, %v2051_v41  ;;  %v2324_v37 = vand.u32 2139095040, %v7311_v62  ;;  %v1867_v28 = vsub.s32 0, %v7297_v51  ;;  %v5875_v25 = vld [vmem:[%s6317_s28 + $0x18] sm:$0xff] }
 0x1e0   : > { %v2168_v53 = vmul.u32 %v7238_v3, %v2152_v24  ;;  %v2056_v12 = vsel %vm2042_vm8, %v2053_v5, %v2055_v59  ;;  %v7340_v29 = vshll.u32 %v2017_v18, 8  ;;  %v1776_v22 = vor.u32 4788187, %v1775_v13  ;;  %v5876_v13 = vld [vmem:[%s6317_s28 + $0x10] sm:$0xff]  ;;  %v11267_v5 = vld [vmem:[#allocation33_spill] sm:$0xff] }
 0x1e1   : > { %v1665_v15 = vsub.s32 32, %v7284_v17  ;;  %v1670_v58 = vadd.s32 127, %v1669_v34  ;;  %v1981_v30 = vsub.s32 4294967266, %v7329_v4  ;;  %v972_v3 = vmul.f32 256.0, %v5875_v25 }
 0x1e2   : > { %v7344_v45 = vadd.s32 %v2172_v35, %v2168_v53  ;;  %v7347_v48 = vmul.u32.u64.low %v7340_v29, %v2052_v38  ;;  %v7348_v47 = vmul.u32.u64.high %v7340_v29, %v2052_v38, %v7347_v48  ;;  %v2325_v18 = vshrl.u32 %v2324_v37, 23  ;;  %v11268_v38 = vld [vmem:[#allocation38_spill] sm:$0xff]  ;;  %v11269_v37 = vld [vmem:[#allocation35_spill] sm:$0xff] }
 0x1e3   : > { %v7353_v50 = vmul.u32.u64.low %v7340_v29, %v2056_v12  ;;  %v7354_v41 = vmul.u32.u64.high %v7340_v29, %v2056_v12, %v7353_v50  ;;  %v971_v24 = vmul.f32 256.0, %v5876_v13  ;;  %v7360_v34 = vsel %vm10982_vm4, %v7124_v33, %v11267_v5  ;;  %1247 = vrot.lane.b32.xlu1 %v972_v3, %s5922_s22 }
 0x1e4   : > { %v1772_v59 = vor.u32 %v1771_v55, %v1770_v56  ;;  %v1649_v9 = vadd.s32 %v6863_v61, %v6871_v32  ;;  %v5559_v35 = vmin.u32 %v1867_v28, %v7297_v51  ;;  %v7369_v53 = vsel %vm10982_vm4, %v7172_v6, %v11268_v38  ;;  %v11270_v56 = vld [vmem:[#allocation39_spill] sm:$0xff]  ;;  %v11273_v38 = vld [vmem:[#allocation37_spill] sm:$0xff] }
 0x1e5   : > { %v7374_v12 = vsel %vm10982_vm4, %v7179_v16, %v11269_v37  ;;  %v1671_v33 = vshll.u32 %v1670_v58, 23  ;;  %v1982_v25 = vadd.s32 127, %v1981_v30  ;;  %1245 = vrot.lane.b32.xlu0 %v971_v24, %s5922_s22  ;;  %v7380_v61 = vsel %vm10982_vm4, %v7183_v60, %v11270_v56 }
 0x1e6   : > { %v1667_v32 = vshrl.u32 %v1649_v9, %v1665_v15  ;;  %v1977_v55 = vsub.s32 32, %v7329_v4  ;;  %v2046_v6 = vsel %vm2044_vm12, %v2034_v43, 2102212464  ;;  %v1777_v28 = vand.u32 2147483647, %v1776_v22 }
 0x1e7   : > { %v2174_v3 = vadd.s32 536870912, %v7344_v45  ;;  %v2025_v16 = vshrl.u32 %v11221_v39, %v7208_v26  ;;  %v5578_v58 = vadd.s32 4294967169, %v2325_v18  ;;  %v1779_v30 = vcvt.s32.f32 %v1772_v59  ;;  %v767_v26 = vpop.permute.xlu0 %766  ;;  %v11271_v18 = vld [vmem:[#allocation44_spill] sm:$0xff] }
 0x1e8   : > { %v1666_v50 = vshll.u32 %v7087_v54, %v7284_v17  ;;  %v1961_v60 = vadd.s32 %v6938_v46, %v6946_v57  ;;  %v1869_v15 = vclz %v5559_v35  ;;  %v1672_v13 = vor.u32 4788187, %v1671_v33 }
 0x1e9   : > { %v1983_v24 = vshll.u32 %v1982_v25, 23  ;;  %v2045_v43 = vsel %vm2041_vm14, %v2025_v16, %v7277_v49  ;;  %v2047_v22 = vsel %vm2043_vm15, %v7279_v0, %v2046_v6  ;;  %v894_v5 = vsel %vm10981_vm5, %v7222_v36, %v11271_v18  ;;  %v11280_v18 = vld [vmem:[#allocation46_spill] sm:$0xff] }
 0x1ea   : > { %v1668_v54 = vor.u32 %v1667_v32, %v1666_v50  ;;  %v1979_v17 = vshrl.u32 %v1961_v60, %v1977_v55  ;;  %v2067_v46 = vadd.s32 1, %v7348_v47  ;;  %v1780_v57 = vmul.f32 %v1779_v30, %v1777_v28  ;;  %v11274_v32 = vld [vmem:[#allocation40_spill] sm:$0xff]  ;;  %v11276_v60 = vld [vmem:[#allocation42_spill] sm:$0xff] }
 0x1eb   : > { %v7402_v59 = vshrl.u32 %v2174_v3, 30  ;;  %vm2066_vm9 = vc.u32 %v7354_v41, %v7347_v48  ;;  %v2331_v49 = vadd.s32 1, %v5578_v58  ;;  %v1978_v9 = vshll.u32 %v7152_v63, %v7329_v4 }
 0x1ec   : > { %v5560_v0 = vadd.s32 4294967294, %v1869_v15  ;;  %v2048_v35 = vsel %vm2042_vm8, %v2045_v43, %v2047_v22  ;;  %v7411_v36 = vsel %vm11111_vm6, %v894_v5, %v767_v26  ;;  %v886_v37 = vsel %vm10982_vm4, %v7191_v23, %v11273_v38  ;;  %v11275_v23 = vld [vmem:[#allocation49_spill] sm:$0xff] }
 0x1ed   : > { %11272 = vst [vmem:[#allocation7_spill] sm:$0xff] %v7411_v36  ;;  %v1783_v33 = vsub.s32 4, %v6888_v40  ;;  %v1673_v25 = vand.u32 2147483647, %v1672_v13  ;;  %v1984_v56 = vor.u32 4788187, %v1983_v24  ;;  %v885_v55 = vsel %vm10982_vm4, %v7213_v20, %v11274_v32 }
 0x1ee   : > { %v1675_v63 = vcvt.s32.f32 %v1668_v54  ;;  %v1980_v4 = vor.u32 %v1979_v17, %v1978_v9  ;;  %v2068_v1 = vsel %vm2066_vm9, %v2067_v46, %v7348_v47  ;;  %v2176_v6 = vshll.u32 %v7402_v59, 30  ;;  %v11285_v38 = vld [vmem:[#allocation45_spill] sm:$0xff] }
 0x1ef   : > { %v2064_v28 = vmul.u32 %v7340_v29, %v2048_v35  ;;  %vm2332_vm10 = vcmp.gt.s32.totalorder %v2331_v49, 0  ;;  %v2220_v3 = vand.u32 2139095040, %v7411_v36  ;;  %vm1699_vm11 = vcmp.lt.s32.totalorder %v11275_v23, 0  ;;  %v11283_v35 = vld [vmem:[#allocation48_spill] sm:$0xff] }
 0x1f0   : > { %v1781_v16 = vxor.u32 2147483648, %v1780_v57  ;;  %v1679_v58 = vsub.s32 4, %v7027_v14  ;;  %vm5561_vm12 = vcmp.lt.s32.totalorder %v5560_v0, 0  ;;  %v1784_v20 = vsel %vm1699_vm11, %v1783_v33, %v6888_v40 }
 0x1f1   : > { %v1676_v30 = vmul.f32 %v1675_v63, %v1673_v25  ;;  %v1985_v50 = vand.u32 2147483647, %v1984_v56  ;;  %v7429_v47 = vadd.s32 %v2068_v1, %v2064_v28  ;;  %v7434_v29 = vsel %vm10981_vm5, %v7226_v21, %v11276_v60 }
 0x1f2   : > { %v11277_v15 = vand.u32 2147483647, %v11275_v23  ;;  %vm1595_vm14 = vcmp.lt.s32.totalorder %v6606_v8, 0  ;;  %v2333_v24 = vsel %vm2332_vm10, %v2331_v49, 0  ;;  %v1987_v43 = vcvt.s32.f32 %v1980_v4 }
 0x1f3   : > { %v7443_v40 = vsel %vm5561_vm12, 0, %v5560_v0  ;;  %v7446_v22 = vsub.s32 %v7344_v45, %v2176_v6  ;;  %v2221_v26 = vshrl.u32 %v2220_v3, 23  ;;  %v7451_v21 = vsel %vm10981_vm5, %v7324_v19, %v11280_v18  ;;  %v11281_v0 = vld [vmem:[#allocation43_spill] sm:$0xff]  ;;  %v11296_v18 = vld [vmem:[#allocation12_spill] sm:$0xff] }
 0x1f4   : > { %vm7438_vm13 = vcmp.le.f32.partialorder %v11277_v15, 0.7853982  ;;  %v1782_v5 = vsel %vm1699_vm11, %v1781_v16, %v1780_v57  ;;  %v1680_v17 = vsel %vm1595_vm14, %v1679_v58, %v7027_v14  ;;  %v1677_v46 = vxor.u32 2147483648, %v1676_v30 }
 0x1f5   : > { %v7457_v54 = vsel %vm7438_vm13, 0, %v1784_v20  ;;  %v1988_v45 = vmul.f32 %v1987_v43, %v1985_v50  ;;  %v2070_v49 = vadd.s32 536870912, %v7429_v47  ;;  %v2335_v9 = vand.u32 31, %v2333_v24  ;;  %v11294_v50 = vld [vmem:[#allocation51_spill] sm:$0xff] }
 0x1f6   : > { %v7466_v19 = vsel %vm10981_vm5, %v7360_v34, %v11281_v0  ;;  %v7471_v57 = vsel %vm10981_vm5, %v7369_v53, %v11283_v35  ;;  %v7476_v33 = vsel %vm10981_vm5, %v7374_v12, %v11285_v38  ;;  %v1877_v14 = vsub.s32 4294967266, %v7443_v40  ;;  %v11290_v53 = vld [vmem:[#allocation50_spill] sm:$0xff] }
 0x1f7   : > { %11282 = vst [vmem:[#allocation4_spill] sm:$0xff] %v7466_v19  ;;  %11284 = vst [vmem:[#allocation8_spill] sm:$0xff] %v7471_v57  ;;  %v1790_v25 = vadd.s32 3, %v7457_v54  ;;  %v11287_v56 = vand.u32 2147483647, %v6606_v8  ;;  %v2179_v34 = vsub.s32 0, %v7446_v22  ;;  %v7490_v4 = vsel %vm10981_vm5, %v7380_v61, %v11290_v53 }
 0x1f8   : > { %11286 = vst [vmem:[#allocation6_spill] sm:$0xff] %v7476_v33  ;;  %v5574_v63 = vadd.s32 4294967169, %v2221_v26  ;;  %11291 = vst [vmem:[#allocation9_spill] sm:$0xff] %v7490_v4  ;;  %v1785_v12 = vsel %vm7438_vm13, %v11275_v23, %v1782_v5  ;;  %v1991_v6 = vsub.s32 4, %v7089_v42  ;;  %v1678_v28 = vsel %vm1595_vm14, %v1677_v46, %v1676_v30  ;;  %v11292_v61 = vld [vmem:[#allocation47_spill] sm:$0xff]  ;;  %v11297_v5 = vld [vmem:[#allocation5_spill] sm:$0xff] }
 0x1f9   : > { %vm7482_vm15 = vcmp.le.f32.partialorder %v11287_v56, 0.7853982  ;;  %v1989_v3 = vxor.u32 2147483648, %v1988_v45  ;;  %v7502_v16 = vshrl.u32 %v2070_v49, 30  ;;  %v7504_v58 = vsub.s32 32, %v2335_v9 }
 0x1fa   : > { %v7497_v1 = vsel %vm7482_vm15, 0, %v1680_v17  ;;  %v7508_v20 = vsel %vm10981_vm5, %v886_v37, %v11292_v61  ;;  %v7512_v60 = vsel %vm10981_vm5, %v885_v55, %v11294_v50  ;;  %vm1907_vm7 = vcmp.lt.s32.totalorder %v6622_v2, 0 }
 0x1fb   : > { %11293 = vst [vmem:[#allocation10_spill] sm:$0xff] %v7508_v20  ;;  %11295 = vst [vmem:[#allocation14_spill] sm:$0xff] %v7512_v60  ;;  %v1878_v15 = vadd.s32 127, %v1877_v14  ;;  %v7515_v13 = vand.u32 3, %v1790_v25  ;;  %v7518_v30 = vadd.s32 3, %v7497_v1  ;;  %v5571_v43 = vmin.u32 %v2179_v34, %v7446_v22  ;;  %v5877_v34 = vld [vmem:[%s6317_s28 + $0x28] sm:$0xff] }
 0x1fc   : > { %v2227_v26 = vadd.s32 1, %v5574_v63  ;;  %5766 = vcosq.f32 %v1785_v12  ;;  %v1681_v37 = vsel %vm7482_vm15, %v6606_v8, %v1678_v28  ;;  %v1992_v55 = vsel %vm1907_vm7, %v1991_v6, %v7089_v42 }
 0x1fd   : > { %v1857_v17 = vadd.s32 %v11297_v5, %v11296_v18  ;;  %v11298_v46 = vand.u32 2147483647, %v6622_v2  ;;  %v1990_v0 = vsel %vm1907_vm7, %v1989_v3, %v1988_v45  ;;  %v1873_v35 = vsub.s32 32, %v7443_v40 }
 0x1fe   : > { %v2072_v38 = vshll.u32 %v7502_v16, 30  ;;  %v2348_v14 = vshrl.u32 %v11220_v31, %v7504_v58  ;;  %v1879_v25 = vshll.u32 %v1878_v15, 23  ;;  %v11301_v56 = vmov 1326507024  }
 0x1ff   : > { %vm7529_vm8 = vcmp.le.f32.partialorder %v11298_v46, 0.7853982  ;;  %v2351_v32 = vshrl.u32 %v11301_v56, %v7504_v58  ;;  %v974_v63 = vmul.f32 256.0, %v5877_v34  ;;  %v2181_v53 = vclz %v5571_v43 }
 0x200   : > { %v7541_v6 = vshrl.u32 %v2333_v24, 5  ;;  %v11302_v28 = vmov 2102212464   ;;  %vm2228_vm9 = vcmp.gt.s32.totalorder %v2227_v26, 0  ;;  %v2339_v3 = vshrl.u32 %v11223_v7, %v7504_v58 }
 0x201   : > { %v2347_v45 = vshll.u32 %v11302_v28, %v2335_v9  ;;  %v2342_v61 = vshrl.u32 %v11226_v10, %v7504_v58  ;;  %v2345_v50 = vshrl.u32 %v11302_v28, %v7504_v58  ;;  %v2350_v15 = vshll.u32 %v11220_v31, %v2335_v9  ;;  %1251 = vrot.lane.b32.xlu1 %v974_v63, %s5922_s22 }
 0x202   : > { %v1875_v18 = vshrl.u32 %v1857_v17, %v1873_v35  ;;  %v7553_v24 = vsub.s32 %v7429_v47, %v2072_v38  ;;  %v2338_v43 = vshll.u32 %v11221_v39, %v2335_v9  ;;  %v2341_v46 = vshll.u32 %v11223_v7, %v2335_v9 }
 0x203   : > { %v2349_v5 = vor.u32 %v2348_v14, %v2347_v45  ;;  %v2344_v34 = vshll.u32 %v11226_v10, %v2335_v9  ;;  %v2352_v52 = vor.u32 %v2351_v32, %v2350_v15  ;;  %v2229_v42 = vsel %vm2228_vm9, %v2227_v26, 0 }
 0x204   : > { %v1874_v60 = vshll.u32 %v7297_v51, %v7443_v40  ;;  %v1880_v20 = vor.u32 4788187, %v1879_v25  ;;  %v5572_v4 = vadd.s32 4294967294, %v2181_v53  ;;  %v11303_v63 = vand.u32 2147483647, %v7311_v62 }
 0x205   : > { %v7562_v35 = vor.u32 %v2339_v3, %v2338_v43  ;;  %v7564_v47 = vor.u32 %v2342_v61, %v2341_v46  ;;  %v2346_v38 = vor.u32 %v2345_v50, %v2344_v34  ;;  %vm2356_vm10 = vcmp.lt.s32.totalorder %v7541_v6, 4 }
 0x206   : > { %v2328_v17 = vand.u32 8388607, %v11303_v63  ;;  %5768 = vsinq.f32 %v1785_v12  ;;  %v2075_v9 = vsub.s32 0, %v7553_v24  ;;  %v2362_v26 = vsel %vm2356_vm10, %v2349_v5, 920167782  ;;  %v7570_v51 = vpop.eup %5766 }
 0x207   : > { %v2231_v14 = vand.u32 31, %v2229_v42  ;;  %11304 = vst [vmem:[#allocation11_spill] sm:$0xff] %v7570_v51  ;;  %5770 = vcosq.f32 %v1681_v37  ;;  %v7574_v40 = vsel %vm7529_vm8, 0, %v1992_v55  ;;  %v1876_v25 = vor.u32 %v1875_v18, %v1874_v60 }
 0x208   : > { %v2366_v32 = vsel %vm2356_vm10, %v2352_v52, 1326507024  ;;  %v7581_v12 = vsel %vm7529_vm8, %v6622_v2, %v1990_v0  ;;  %vm5573_vm11 = vcmp.lt.s32.totalorder %v5572_v4, 0  ;;  %vm2353_vm12 = vcmp.lt.s32.totalorder %v7541_v6, 1 }
 0x209   : > { %vm2355_vm13 = vcmp.lt.s32.totalorder %v7541_v6, 3  ;;  %v1881_v53 = vand.u32 2147483647, %v1880_v20  ;;  %v2329_v45 = vor.u32 8388608, %v2328_v17  ;;  %v2361_v60 = vsel %vm2353_vm12, %v7562_v35, %v7564_v47 }
 0x20a   : > { %v2363_v52 = vsel %vm2355_vm13, %v2346_v38, %v2362_v26  ;;  %v5567_v55 = vmin.u32 %v2075_v9, %v7553_v24  ;;  %v2365_v49 = vsel %vm2353_vm12, %v7564_v47, %v2346_v38  ;;  %v2367_v0 = vsel %vm2355_vm13, %v2349_v5, %v2366_v32  ;;  %v11307_v5 = vld [vmem:[#allocation54_spill] sm:$0xff] }
 0x20b   : > { %v7597_v3 = vsub.s32 32, %v2231_v14  ;;  %5772 = vsinq.f32 %v1681_v37  ;;  %v1883_v20 = vcvt.s32.f32 %v1876_v25  ;;  %v7599_v61 = vsel %vm5573_vm11, 0, %v5572_v4 }
 0x20c   : > { %vm2354_vm14 = vcmp.lt.s32.totalorder %v7541_v6, 2  ;;  %v7603_v50 = vand.u32 3, %v7518_v30  ;;  %5774 = vcosq.f32 %v7581_v12  ;;  %v7607_v15 = vadd.s32 3, %v7574_v40 }
 0x20d   : > { %v2364_v18 = vsel %vm2354_vm14, %v2361_v60, %v2363_v52  ;;  %v7611_v43 = vmul.f32 %v1883_v20, %v1881_v53  ;;  %v2368_v37 = vsel %vm2354_vm14, %v2365_v49, %v2367_v0  ;;  %v7615_v4 = vshll.u32 %v2329_v45, 8 }
 0x20e   : > { %v2185_v30 = vsub.s32 32, %v7599_v61  ;;  %v2189_v46 = vsub.s32 4294967266, %v7599_v61  ;;  %v2077_v34 = vclz %v5567_v55  ;;  %v2244_v63 = vshrl.u32 %v11220_v31, %v7597_v3 }
 0x20f   : > { %v2358_v17 = vsel %vm2356_vm10, %v2346_v38, 2102212464  ;;  %v7625_v9 = vmul.u32.u64.low %v7615_v4, %v2364_v18  ;;  %v7626_v26 = vmul.u32.u64.high %v7615_v4, %v2364_v18, %v7625_v9  ;;  %v2247_v25 = vshrl.u32 %v11301_v56, %v7597_v3 }
 0x210   : > { %v7631_v32 = vpop.eup %5768  ;;  %v7634_v53 = vmul.u32.u64.low %v7615_v4, %v2368_v37  ;;  %v7635_v45 = vmul.u32.u64.high %v7615_v4, %v2368_v37, %v7634_v53  ;;  %v7637_v60 = vshrl.u32 %v2229_v42, 5  ;;  %v2243_v52 = vshll.u32 %v11302_v28, %v2231_v14 }
 0x211   : > { %11305 = vst [vmem:[#allocation16_spill] sm:$0xff] %v7631_v32  ;;  %v7640_v55 = vpop.eup %5770  ;;  %v2235_v38 = vshrl.u32 %v11223_v7, %v7597_v3  ;;  %v2238_v49 = vshrl.u32 %v11226_v10, %v7597_v3  ;;  %v2241_v0 = vshrl.u32 %v11302_v28, %v7597_v3  ;;  %v2246_v20 = vshll.u32 %v11220_v31, %v2231_v14 }
 0x212   : > { %11306 = vst [vmem:[#allocation13_spill] sm:$0xff] %v7640_v55  ;;  %v2190_v18 = vadd.s32 127, %v2189_v46  ;;  %v5568_v37 = vadd.s32 4294967294, %v2077_v34  ;;  %v2337_v42 = vshrl.u32 %v11221_v39, %v7504_v58  ;;  %v2245_v53 = vor.u32 %v2244_v63, %v2243_v52 }
 0x213   : > { %vm1803_vm15 = vcmp.lt.s32.totalorder %v11307_v5, 0  ;;  %v2234_v33 = vshll.u32 %v11221_v39, %v2231_v14  ;;  %v2237_v57 = vshll.u32 %v11223_v7, %v2231_v14  ;;  %v2240_v19 = vshll.u32 %v11226_v10, %v2231_v14 }
 0x214   : > { %v2248_v62 = vor.u32 %v2247_v25, %v2246_v20  ;;  %v2169_v28 = vadd.s32 %v7246_v27, %v7254_v44  ;;  %v2357_v46 = vsel %vm2353_vm12, %v2337_v42, %v7562_v35  ;;  %v2359_v58 = vsel %vm2355_vm13, %v7564_v47, %v2358_v17  ;;  %v773_v17 = vpop.permute.xlu1 %772 }
 0x215   : > { %v11308_v34 = vand.u32 2147483647, %v7411_v36  ;;  %v7665_v52 = vpop.eup %5772  ;;  %v7667_v7 = vor.u32 %v2235_v38, %v2234_v33  ;;  %v7669_v14 = vor.u32 %v2238_v49, %v2237_v57  ;;  %v7671_v25 = vor.u32 %v2241_v0, %v2240_v19  ;;  %v5878_v0 = vld [vmem:[%s6317_s28 + $0x20] sm:$0xff] }
 0x216   : > { %11309 = vst [vmem:[#allocation18_spill] sm:$0xff] %v7665_v52  ;;  %vm2252_vm7 = vcmp.lt.s32.totalorder %v7637_v60, 4  ;;  %v7674_v27 = vpop.eup %5774  ;;  %v1885_v44 = vxor.u32 2147483648, %v7611_v43  ;;  %v2187_v35 = vshrl.u32 %v2169_v28, %v2185_v30  ;;  %v2191_v20 = vshll.u32 %v2190_v18, 23 }
 0x217   : > { %v2224_v63 = vand.u32 8388607, %v11308_v34  ;;  %11310 = vst [vmem:[#allocation15_spill] sm:$0xff] %v7674_v27  ;;  %v2258_v47 = vsel %vm2252_vm7, %v2245_v53, 920167782  ;;  %vm5569_vm9 = vcmp.lt.s32.totalorder %v5568_v37, 0  ;;  %v2360_v19 = vsel %vm2354_vm14, %v2357_v46, %v2359_v58 }
 0x218   : > { %v11311_v33 = vand.u32 2147483647, %v11307_v5  ;;  %v2379_v38 = vadd.s32 1, %v7626_v26  ;;  %v2262_v28 = vsel %vm2252_vm7, %v2248_v62, 1326507024  ;;  %vm2378_vm10 = vc.u32 %v7635_v45, %v7625_v9 }
 0x219   : > { %v2225_v30 = vor.u32 8388608, %v2224_v63  ;;  %vm2249_vm11 = vcmp.lt.s32.totalorder %v7637_v60, 1  ;;  %vm2251_vm12 = vcmp.lt.s32.totalorder %v7637_v60, 3  ;;  %vm1793_vm13 = vcmp.eq.s32.totalorder %v7515_v13, 0 }
 0x21a   : > { %vm7681_vm8 = vcmp.le.f32.partialorder %v11311_v33, 0.7853982  ;;  %vm1796_vm5 = vcmp.eq.s32.totalorder %v7515_v13, 2  ;;  %v2257_v6 = vsel %vm2249_vm11, %v7667_v7, %v7669_v14  ;;  %v2259_v62 = vsel %vm2251_vm12, %v7671_v25, %v2258_v47 }
 0x21b   : > { %v7705_v49 = vsel %vm11111_vm6, %v7434_v29, %v773_v17  ;;  %v973_v18 = vmul.f32 256.0, %v5878_v0  ;;  %5776 = vsinq.f32 %v7581_v12  ;;  %v7710_v42 = vsel %vm5569_vm9, 0, %v5568_v37 }
 0x21c   : > { %11314 = vst [vmem:[#allocation19_spill] sm:$0xff] %v7705_v49  ;;  %v2261_v46 = vsel %vm2249_vm11, %v7669_v14, %v7671_v25  ;;  %v2263_v58 = vsel %vm2251_vm12, %v2245_v53, %v2262_v28  ;;  %v2186_v34 = vshll.u32 %v7446_v22, %v7599_v61  ;;  %v2192_v29 = vor.u32 4788187, %v2191_v20 }
 0x21d   : > { %v2380_v12 = vsel %vm2378_vm10, %v2379_v38, %v7626_v26  ;;  %vm2250_vm14 = vcmp.lt.s32.totalorder %v7637_v60, 2  ;;  %1249 = vrot.lane.b32.xlu0 %v973_v18, %s5922_s22  ;;  %vm1792_vm9 = vcmp.lt.s32.totalorder %v7515_v13, 2  ;;  %v1886_v37 = vsel %vm1803_vm15, %v1885_v44, %v7611_v43 }
 0x21e   : > { %v2376_v53 = vmul.u32 %v7615_v4, %v2360_v19  ;;  %v2260_v22 = vsel %vm2250_vm14, %v2257_v6, %v2259_v62  ;;  %v2532_v61 = vand.u32 2139095040, %v7705_v49  ;;  %vm1689_vm4 = vcmp.eq.s32.totalorder %v7603_v50, 0 }
 0x21f   : > { %v2188_v26 = vor.u32 %v2187_v35, %v2186_v34  ;;  %v2085_v63 = vsub.s32 4294967266, %v7710_v42  ;;  %v2264_v20 = vsel %vm2250_vm14, %v2261_v46, %v2263_v58  ;;  %v7738_v47 = vshll.u32 %v2225_v30, 8 }
 0x220   : > { %v10992_v17 = vxor.u32 2147483648, %v7631_v32  ;;  %v10991_v43 = vxor.u32 2147483648, %v7570_v51  ;;  %vm1692_vm10 = vcmp.eq.s32.totalorder %v7603_v50, 2  ;;  %v7743_v4 = vadd.s32 %v2380_v12, %v2376_v53 }
 0x221   : > { %v1887_v44 = vsub.s32 4, %v7243_v11  ;;  %v2193_v33 = vand.u32 2147483647, %v2192_v29  ;;  %v7747_v35 = vmul.u32.u64.low %v7738_v47, %v2260_v22  ;;  %v7748_v19 = vmul.u32.u64.high %v7738_v47, %v2260_v22, %v7747_v35 }
 0x222   : > { %v1889_v38 = vsel %vm7681_vm8, %v11307_v5, %v1886_v37  ;;  %v7755_v28 = vmul.u32.u64.low %v7738_v47, %v2264_v20  ;;  %v7756_v30 = vmul.u32.u64.high %v7738_v47, %v2264_v20, %v7755_v28  ;;  %v2533_v6 = vshrl.u32 %v2532_v61, 23 }
 0x223   : > { %v10989_v62 = vxor.u32 2147483648, %v7640_v55  ;;  %v7760_v0 = vand.u32 3, %v7607_v15  ;;  %v2195_v18 = vcvt.s32.f32 %v2188_v26  ;;  %v2086_v46 = vadd.s32 127, %v2085_v63 }
 0x224   : > { %vm1789_vm3 = vweird.f32 %v11275_v23  ;;  %v1795_v58 = vsel %vm1793_vm13, %v7570_v51, %v10992_v17  ;;  %v1798_v34 = vsel %vm1796_vm5, %v10991_v43, %v7631_v32  ;;  %v10990_v29 = vxor.u32 2147483648, %v7665_v52 }
 0x225   : > { %v2382_v15 = vadd.s32 536870912, %v7743_v4  ;;  %vm1688_vm2 = vcmp.lt.s32.totalorder %v7603_v50, 2  ;;  %5778 = vcosq.f32 %v1889_v38  ;;  %v2196_v12 = vmul.f32 %v2195_v18, %v2193_v33  ;;  %v7780_v22 = vpop.eup %5776  ;;  %v11316_v33 = vld [vmem:[#allocation55_spill] sm:$0xff] }
 0x226   : > { %v2081_v37 = vsub.s32 32, %v7710_v42  ;;  %v2254_v53 = vsel %vm2252_vm7, %v7671_v25, 2102212464  ;;  %11315 = vst [vmem:[#allocation17_spill] sm:$0xff] %v7780_v22  ;;  %v1888_v61 = vsel %vm1803_vm15, %v1887_v44, %v7243_v11  ;;  %5780 = vsinq.f32 %v1889_v38 }
 0x227   : > { %v2233_v26 = vshrl.u32 %v11221_v39, %v7597_v3  ;;  %v5586_v63 = vadd.s32 4294967169, %v2533_v6  ;;  %v1799_v20 = vsel %vm1792_vm9, %v1795_v58, %v1798_v34  ;;  %v1694_v25 = vsel %vm1692_vm10, %v10989_v62, %v7665_v52 }
 0x228   : > { %v11317_v28 = vand.u32 2147483647, %v11316_v33  ;;  %v2065_v11 = vadd.s32 %v7347_v48, %v7354_v41  ;;  %v2087_v3 = vshll.u32 %v2086_v46, 23  ;;  %v1691_v13 = vsel %vm1689_vm4, %v7640_v55, %v10990_v29 }
 0x229   : > { %v7807_v44 = vshrl.u32 %v2382_v15, 30  ;;  %v2253_v38 = vsel %vm2249_vm11, %v2233_v26, %v7667_v7  ;;  %v2255_v6 = vsel %vm2251_vm12, %v7669_v14, %v2254_v53  ;;  %vm1685_vm15 = vweird.f32 %v6606_v8 }
 0x22a   : > { %vm7796_vm5 = vcmp.le.f32.partialorder %v11317_v28, 0.7853982  ;;  %v7818_v48 = vsel %vm7681_vm8, 0, %v1888_v61  ;;  %v2197_v41 = vxor.u32 2147483648, %v2196_v12  ;;  %v2083_v46 = vshrl.u32 %v2065_v11, %v2081_v37 }
 0x22b   : > { %v2275_v58 = vadd.s32 1, %v7748_v19  ;;  %v10988_v34 = vxor.u32 2147483648, %v7780_v22  ;;  %v10987_v15 = vxor.u32 2147483648, %v7674_v27  ;;  %vm2274_vm4 = vc.u32 %v7756_v30, %v7747_v35 }
 0x22c   : > { %v2539_v7 = vadd.s32 1, %v5586_v63  ;;  %v2199_v14 = vsub.s32 4, %v7402_v59  ;;  %v2082_v53 = vshll.u32 %v7553_v24, %v7710_v42  ;;  %v2088_v57 = vor.u32 4788187, %v2087_v3 }
 0x22d   : > { %v2256_v61 = vsel %vm2250_vm14, %v2253_v38, %v2255_v6  ;;  %vm2001_vm7 = vcmp.eq.s32.totalorder %v7760_v0, 0  ;;  %vm2004_vm8 = vcmp.eq.s32.totalorder %v7760_v0, 2  ;;  %vm2115_vm11 = vcmp.lt.s32.totalorder %v11316_v33, 0 }
 0x22e   : > { %v2384_v37 = vshll.u32 %v7807_v44, 30  ;;  %v7836_v26 = vsel %vm1789_vm3, nan, %v1799_v20  ;;  %v2198_v63 = vsel %vm2115_vm11, %v2197_v41, %v2196_v12  ;;  %v2084_v28 = vor.u32 %v2083_v46, %v2082_v53 }
 0x22f   : > { %11320 = vst [vmem:[#allocation20_spill] sm:$0xff] %v7836_v26  ;;  %v2276_v24 = vsel %vm2274_vm4, %v2275_v58, %v7748_v19  ;;  %v1695_v60 = vsel %vm1688_vm2, %v1691_v13, %v1694_v25  ;;  %v1894_v42 = vadd.s32 3, %v7818_v48  ;;  %v2272_v11 = vmul.u32 %v7738_v47, %v2256_v61  ;;  %v7843_v3 = vpop.eup %5778 }
 0x230   : > { %vm2540_vm12 = vcmp.gt.s32.totalorder %v2539_v7, 0  ;;  %11321 = vst [vmem:[#allocation21_spill] sm:$0xff] %v7843_v3  ;;  %v2003_v38 = vsel %vm2001_vm7, %v7674_v27, %v10988_v34  ;;  %v2006_v12 = vsel %vm2004_vm8, %v10987_v15, %v7780_v22  ;;  %v2200_v19 = vsel %vm2115_vm11, %v2199_v14, %v7402_v59  ;;  %v7852_v50 = vpop.eup %5780 }
 0x231   : > { %v2089_v20 = vand.u32 2147483647, %v2088_v57  ;;  %11322 = vst [vmem:[#allocation24_spill] sm:$0xff] %v7852_v50  ;;  %vm11122_vm2 = vweird.f32 %v6622_v2  ;;  %v2201_v47 = vsel %vm7796_vm5, %v11316_v33, %v2198_v63  ;;  %v7859_v25 = vsub.s32 %v7743_v4, %v2384_v37  ;;  %v771_v63 = vpop.permute.xlu0 %770 }
 0x232   : > { %v7861_v13 = vadd.s32 %v2276_v24, %v2272_v11  ;;  %v4986_v6 = vmul.f32 2.0, %v7836_v26  ;;  %vm2000_vm13 = vcmp.lt.s32.totalorder %v7760_v0, 2  ;;  %v2091_v41 = vcvt.s32.f32 %v2084_v28 }
 0x233   : > { %v2541_v59 = vsel %vm2540_vm12, %v2539_v7, 0  ;;  %v7867_v46 = vsel %vm1685_vm15, nan, %v1695_v60  ;;  %v2007_v58 = vsel %vm2000_vm13, %v2003_v38, %v2006_v12  ;;  %v1895_v14 = vand.u32 3, %v1894_v42 }
 0x234   : > { %11323 = vst [vmem:[#allocation22_spill] sm:$0xff] %v7867_v46  ;;  %v7871_v53 = vsel %vm7796_vm5, 0, %v2200_v19  ;;  %v10986_v4 = vxor.u32 2147483648, %v7852_v50  ;;  %v10985_v57 = vxor.u32 2147483648, %v7843_v3  ;;  %5782 = vcosq.f32 %v2201_v47 }
 0x235   : > { %v2092_v61 = vmul.f32 %v2091_v41, %v2089_v20  ;;  %vm11121_vm14 = vweird.f32 %v11307_v5  ;;  %v2387_v0 = vsub.s32 0, %v7859_v25  ;;  %v2278_v7 = vadd.s32 536870912, %v7861_v13 }
 0x236   : > { %v2543_v37 = vand.u32 31, %v2541_v59  ;;  %v7879_v28 = vand.u32 3, %v7457_v54  ;;  %v7882_v18 = vmul.f32 %v4986_v6, %v7836_v26  ;;  %v7886_v24 = vsel %vm11122_vm2, nan, %v2007_v58 }
 0x237   : > { %11326 = vst [vmem:[#allocation28_spill] sm:$0xff] %v7886_v24  ;;  %5784 = vsinq.f32 %v2201_v47  ;;  %v4985_v60 = vmul.f32 2.0, %v7867_v46  ;;  %vm1897_vm9 = vcmp.eq.s32.totalorder %v1895_v14, 0  ;;  %vm1900_vm10 = vcmp.eq.s32.totalorder %v1895_v14, 2 }
 0x238   : > { %11324 = vst [vmem:[#allocation26_spill] sm:$0xff] %v7879_v28  ;;  %11325 = vst [vmem:[#allocation23_spill] sm:$0xff] %v7882_v18  ;;  %v2206_v42 = vadd.s32 3, %v7871_v53  ;;  %v1899_v11 = vsel %vm1897_vm9, %v7843_v3, %v10986_v4  ;;  %v1902_v54 = vsel %vm1900_vm10, %v10985_v57, %v7852_v50  ;;  %v2093_v38 = vxor.u32 2147483648, %v2092_v61 }
 0x239   : > { %v7898_v12 = vsel %vm11111_vm6, %v7451_v21, %v771_v63  ;;  %v4988_v19 = vmul.f32 2.0, %v7886_v24  ;;  %v5579_v20 = vmin.u32 %v2387_v0, %v7859_v25  ;;  %v7902_v47 = vshrl.u32 %v2278_v7, 30  ;;  %v11330_v63 = vld [vmem:[#allocation2_spill] sm:$0xff] }
 0x23a   : > { %11327 = vst [vmem:[#allocation25_spill] sm:$0xff] %v7898_v12  ;;  %v7904_v6 = vsub.s32 32, %v2543_v37  ;;  %v7907_v41 = vand.u32 3, %v7497_v1  ;;  %v7910_v58 = vand.u32 3, %v7574_v40  ;;  %vm1896_vm5 = vcmp.lt.s32.totalorder %v1895_v14, 2 }
 0x23b   : > { %v2095_v57 = vsub.s32 4, %v7502_v16  ;;  %v1903_v4 = vsel %vm1896_vm5, %v1899_v11, %v1902_v54  ;;  %v7913_v21 = vand.u32 3, %v2206_v42  ;;  %vm2011_vm4 = vcmp.lt.s32.totalorder %v11330_v63, 0 }
 0x23c   : > { %11328 = vst [vmem:[#allocation29_spill] sm:$0xff] %v7907_v41  ;;  %11329 = vst [vmem:[#allocation27_spill] sm:$0xff] %v7910_v58  ;;  %v2428_v0 = vand.u32 2139095040, %v7898_v12  ;;  %v7919_v15 = vmul.f32 %v4985_v60, %v7867_v46  ;;  %v11332_v1 = vand.u32 2147483647, %v11330_v63  ;;  %v2094_v14 = vsel %vm2011_vm4, %v2093_v38, %v2092_v61 }
 0x23d   : > { %v7928_v11 = vmul.f32 %v4988_v19, %v7886_v24  ;;  %v2389_v42 = vclz %v5579_v20  ;;  %v2280_v54 = vshll.u32 %v7902_v47, 30  ;;  %v2556_v34 = vshrl.u32 %v11220_v31, %v7904_v6 }
 0x23e   : > { %11331 = vst [vmem:[#allocation30_spill] sm:$0xff] %v7919_v15  ;;  %vm7923_vm7 = vcmp.le.f32.partialorder %v11332_v1, 0.7853982  ;;  %v7933_v7 = vpop.eup %5782  ;;  %v7937_v60 = vsel %vm11121_vm14, nan, %v1903_v4  ;;  %v2096_v1 = vsel %vm2011_vm4, %v2095_v57, %v7502_v16  ;;  %v2559_v61 = vshrl.u32 %v11301_v56, %v7904_v6  ;;  %v8061_v15 = vld [vmem:[%s6317_s28 + $0x30] sm:$0xff] }
 0x23f   : > { %11335 = vst [vmem:[#allocation31_spill] sm:$0xff] %v7928_v11  ;;  %11336 = vst [vmem:[#allocation34_spill] sm:$0xff] %v7933_v7  ;;  %vm2209_vm8 = vcmp.eq.s32.totalorder %v7913_v21, 0  ;;  %v2097_v38 = vsel %vm7923_vm7, %v11330_v63, %v2094_v14  ;;  %v7947_v19 = vshrl.u32 %v2541_v59, 5  ;;  %v11338_v20 = vmov 2102212464  }
 0x240   : > { %11337 = vst [vmem:[#allocation32_spill] sm:$0xff] %v7937_v60  ;;  %v2555_v29 = vshll.u32 %v11338_v20, %v2543_v37  ;;  %v2429_v43 = vshrl.u32 %v2428_v0, 23  ;;  %v11340_v16 = vmov 2475754826   ;;  %v2550_v17 = vshrl.u32 %v11226_v10, %v7904_v6 }
 0x241   : > { %v7950_v4 = vpop.eup %5784  ;;  %v2547_v57 = vshrl.u32 %v11340_v16, %v7904_v6  ;;  %v2553_v62 = vshrl.u32 %v11338_v20, %v7904_v6  ;;  %v2558_v24 = vshll.u32 %v11220_v31, %v2543_v37  ;;  %v5580_v59 = vadd.s32 4294967294, %v2389_v42 }
 0x242   : > { %11339 = vst [vmem:[#allocation41_spill] sm:$0xff] %v7950_v4  ;;  %v7961_v46 = vsub.s32 %v7861_v13, %v2280_v54  ;;  %v2557_v0 = vor.u32 %v2556_v34, %v2555_v29  ;;  %v2546_v26 = vshll.u32 %v11221_v39, %v2543_v37  ;;  %v2549_v18 = vshll.u32 %v11340_v16, %v2543_v37 }
 0x243   : > { %v2552_v5 = vshll.u32 %v11226_v10, %v2543_v37  ;;  %v2560_v2 = vor.u32 %v2559_v61, %v2558_v24  ;;  %v11005_v8 = vxor.u32 2147483648, %v7950_v4  ;;  %5786 = vcosq.f32 %v2097_v38 }
 0x244   : > { %v11341_v23 = vand.u32 2147483647, %v7705_v49  ;;  %v5582_v50 = vadd.s32 4294967169, %v2429_v43  ;;  %v7969_v14 = vor.u32 %v2547_v57, %v2546_v26  ;;  %v7971_v42 = vor.u32 %v2550_v17, %v2549_v18 }
 0x245   : > { %v2554_v13 = vor.u32 %v2553_v62, %v2552_v5  ;;  %vm2564_vm11 = vcmp.lt.s32.totalorder %v7947_v19, 4  ;;  %vm2212_vm12 = vcmp.eq.s32.totalorder %v7913_v21, 2  ;;  %5788 = vsinq.f32 %v2097_v38 }
 0x246   : > { %v2536_v3 = vand.u32 8388607, %v11341_v23  ;;  %v2283_v29 = vsub.s32 0, %v7961_v46  ;;  %v2570_v34 = vsel %vm2564_vm11, %v2557_v0, 920167782  ;;  %v4987_v37 = vmul.f32 2.0, %v7937_v60 }
 0x247   : > { %vm11034_vm13 = vweird.f32 %v11316_v33  ;;  %v7982_v23 = vsel %vm7923_vm7, 0, %v2096_v1  ;;  %vm5581_vm9 = vcmp.lt.s32.totalorder %v5580_v59, 0  ;;  %v2574_v5 = vsel %vm2564_vm11, %v2560_v2, 1326507024 }
 0x248   : > { %v11342_v17 = vxor.u32 2147483648, %v7933_v7  ;;  %vm2561_vm10 = vcmp.lt.s32.totalorder %v7947_v19, 1  ;;  %vm2563_vm5 = vcmp.lt.s32.totalorder %v7947_v19, 3  ;;  %v2435_v62 = vadd.s32 1, %v5582_v50 }
 0x249   : > { %v2211_v26 = vsel %vm2209_vm8, %v7933_v7, %v11005_v8  ;;  %v2537_v18 = vor.u32 8388608, %v2536_v3  ;;  %v2569_v2 = vsel %vm2561_vm10, %v7969_v14, %v7971_v42  ;;  %v2571_v24 = vsel %vm2563_vm5, %v2554_v13, %v2570_v34 }
 0x24a   : > { %v2214_v43 = vsel %vm2212_vm12, %v11342_v17, %v7950_v4  ;;  %v2392_v40 = vsel %vm5581_vm9, 0, %v5580_v59  ;;  %v5575_v54 = vmin.u32 %v2283_v29, %v7961_v46  ;;  %v2573_v50 = vsel %vm2561_vm10, %v7971_v42, %v2554_v13  ;;  %v777_v17 = vpop.permute.xlu1 %776 }
 0x24b   : > { %v2575_v1 = vsel %vm2563_vm5, %v2557_v0, %v2574_v5  ;;  %v8011_v38 = vand.u32 3, %v7818_v48  ;;  %vm2562_vm4 = vcmp.lt.s32.totalorder %v7947_v19, 2  ;;  %vm2208_vm7 = vcmp.lt.s32.totalorder %v7913_v21, 2 }
 0x24c   : > { %v2102_v57 = vadd.s32 3, %v7982_v23  ;;  %v2572_v59 = vsel %vm2562_vm4, %v2569_v2, %v2571_v24  ;;  %vm2436_vm8 = vcmp.gt.s32.totalorder %v2435_v62, 0  ;;  %v2215_v29 = vsel %vm2208_vm7, %v2211_v26, %v2214_v43  ;;  %v8030_v43 = vpop.permute.xlu0 %774 }
 0x24d   : > { %11343 = vst [vmem:[#allocation36_spill] sm:$0xff] %v8011_v38  ;;  %v2393_v34 = vsub.s32 32, %v2392_v40  ;;  %v2576_v0 = vsel %vm2562_vm4, %v2573_v50, %v2575_v1  ;;  %v8020_v5 = vshll.u32 %v2537_v18, 8  ;;  %v8022_v48 = vpop.eup %5786  ;;  %v8025_v61 = vmul.f32 %v4987_v37, %v7937_v60 }
 0x24e   : > { %11344 = vst [vmem:[#allocation33_spill] sm:$0xff] %v8022_v48  ;;  %v8028_v21 = vand.u32 3, %v7871_v53  ;;  %v2397_v2 = vsub.s32 4294967266, %v2392_v40  ;;  %v2285_v24 = vclz %v5575_v54  ;;  %v2377_v26 = vadd.s32 %v7625_v9, %v7635_v45  ;;  %v11350_v54 = vld [vmem:[#allocation3_spill] sm:$0xff]  ;;  %v11352_v45 = vld [vmem:[#allocation4_spill] sm:$0xff] }
 0x24f   : > { %11345 = vst [vmem:[#allocation38_spill] sm:$0xff] %v8025_v61  ;;  %v8035_v18 = vmul.u32.u64.low %v8020_v5, %v2572_v59  ;;  %v8036_v50 = vmul.u32.u64.high %v8020_v5, %v2572_v59, %v8035_v18  ;;  %v8039_v1 = vsel %vm2436_vm8, %v2435_v62, 0  ;;  %v8041_v37 = vpop.eup %5788  ;;  %v8045_v53 = vsel %vm11034_vm13, nan, %v2215_v29  ;;  %v8057_v62 = vld [vmem:[%s6317_s28 + $0x38] sm:$0xff] }
 0x250   : > { %11346 = vst [vmem:[#allocation35_spill] sm:$0xff] %v8028_v21  ;;  %11348 = vst [vmem:[#allocation44_spill] sm:$0xff] %v8041_v37  ;;  %v2103_v3 = vand.u32 3, %v2102_v57  ;;  %vm2323_vm12 = vcmp.lt.s32.totalorder %v11350_v54, 0  ;;  %v8049_v8 = vmul.u32.u64.low %v8020_v5, %v2576_v0  ;;  %v8050_v60 = vmul.u32.u64.high %v8020_v5, %v2576_v0, %v8049_v8 }
 0x251   : > { %11347 = vst [vmem:[#allocation39_spill] sm:$0xff] %v8035_v18  ;;  %11349 = vst [vmem:[#allocation37_spill] sm:$0xff] %v8045_v53  ;;  %v2395_v9 = vshrl.u32 %v2377_v26, %v2393_v34  ;;  %v8054_v59 = vsel %vm11111_vm6, %v11352_v45, %v777_v17  ;;  %v976_v11 = vmul.f32 256.0, %v8057_v62  ;;  %v975_v29 = vmul.f32 256.0, %v8061_v15  ;;  %v8074_v45 = vpop.permute.xlu1 %780 }
 0x252   : > { %11351 = vst [vmem:[#allocation40_spill] sm:$0xff] %v8050_v60  ;;  %11353 = vst [vmem:[#allocation42_spill] sm:$0xff] %v8054_v59  ;;  %v2398_v57 = vadd.s32 127, %v2397_v2  ;;  %v5576_v33 = vadd.s32 4294967294, %v2285_v24  ;;  %v2566_v7 = vsel %vm2564_vm11, %v2554_v13, 2102212464  ;;  %v2545_v26 = vshrl.u32 %v11221_v39, %v7904_v6  ;;  %v8080_v24 = vpop.permute.xlu0 %778 }
 0x253   : > { %v8067_v8 = vand.u32 31, %v8039_v1  ;;  %1255 = vrot.lane.b32.xlu1 %v976_v11, %s5922_s22  ;;  %1253 = vrot.lane.b32.xlu0 %v975_v29, %s5922_s22  ;;  %vm2105_vm9 = vcmp.eq.s32.totalorder %v2103_v3, 0  ;;  %vm2108_vm11 = vcmp.eq.s32.totalorder %v2103_v3, 2  ;;  %v2394_v13 = vshll.u32 %v7859_v25, %v2392_v40 }
 0x254   : > { %v2740_v2 = vand.u32 2139095040, %v8054_v59  ;;  %v4990_v34 = vmul.f32 2.0, %v8045_v53  ;;  %v2407_v17 = vsub.s32 4, %v7807_v44  ;;  %v2565_v6 = vsel %vm2561_vm10, %v2545_v26, %v7969_v14  ;;  %v8101_v26 = vld [vmem:[%s6317_s28 + $0x48] sm:$0xff] }
 0x255   : > { %v2567_v11 = vsel %vm2563_vm5, %v7971_v42, %v2566_v7  ;;  %v2396_v29 = vor.u32 %v2395_v9, %v2394_v13  ;;  %v2399_v0 = vshll.u32 %v2398_v57, 23  ;;  %vm5577_vm7 = vcmp.lt.s32.totalorder %v5576_v33, 0 }
 0x256   : > { %v8091_v25 = vsub.s32 32, %v8067_v8  ;;  %v11354_v40 = vxor.u32 2147483648, %v8041_v37  ;;  %v11355_v4 = vxor.u32 2147483648, %v8022_v48  ;;  %v2587_v14 = vadd.s32 1, %v8036_v50 }
 0x257   : > { %v978_v7 = vmul.f32 256.0, %v8101_v26  ;;  %v8105_v42 = vand.u32 3, %v7982_v23  ;;  %v2568_v9 = vsel %vm2562_vm4, %v2565_v6, %v2567_v11  ;;  %vm2586_vm10 = vc.u32 %v8050_v60, %v8035_v18  ;;  %v11361_v6 = vld [vmem:[#allocation8_spill] sm:$0xff] }
 0x258   : > { %v2107_v61 = vsel %vm2105_vm9, %v8022_v48, %v11354_v40  ;;  %v2110_v21 = vsel %vm2108_vm11, %v11355_v4, %v8041_v37  ;;  %v2741_v57 = vshrl.u32 %v2740_v2, 23  ;;  %v8112_v13 = vmul.f32 %v4990_v34, %v8045_v53  ;;  %v8119_v48 = vpop.permute.xlu1 %784 }
 0x259   : > { %11356 = vst [vmem:[#allocation46_spill] sm:$0xff] %v8105_v42  ;;  %vm2104_vm5 = vcmp.lt.s32.totalorder %v2103_v3, 2  ;;  %v2408_v4 = vsel %vm2323_vm12, %v2407_v17, %v7807_v44  ;;  %v8117_v40 = vsel %vm5577_vm7, 0, %v5576_v33  ;;  %1259 = vrot.lane.b32.xlu1 %v978_v7, %s5922_s22  ;;  %vm11033_vm4 = vweird.f32 %v11330_v63  ;;  %v8131_v33 = vpop.permute.xlu0 %782 }
 0x25a   : > { %11357 = vst [vmem:[#allocation43_spill] sm:$0xff] %v8112_v13  ;;  %v2111_v19 = vsel %vm2104_vm5, %v2107_v61, %v2110_v21  ;;  %v11358_v23 = vand.u32 2147483647, %v11350_v54  ;;  %v2400_v3 = vor.u32 4788187, %v2399_v0  ;;  %v2403_v34 = vcvt.s32.f32 %v2396_v29 }
 0x25b   : > { %v2452_v44 = vshrl.u32 %v11220_v31, %v8091_v25  ;;  %v2584_v17 = vmul.u32 %v8020_v5, %v2568_v9  ;;  %v2588_v61 = vsel %vm2586_vm10, %v2587_v14, %v8036_v50  ;;  %v8142_v11 = vsel %vm11111_vm6, %v11361_v6, %v8030_v43 }
 0x25c   : > { %vm8125_vm8 = vcmp.le.f32.partialorder %v11358_v23, 0.7853982  ;;  %11362 = vst [vmem:[#allocation48_spill] sm:$0xff] %v8142_v11  ;;  %v2293_v0 = vsub.s32 4294967266, %v8117_v40  ;;  %v2451_v29 = vshll.u32 %v11338_v20, %v8067_v8  ;;  %v2455_v5 = vshrl.u32 %v11301_v56, %v8091_v25  ;;  %v8169_v38 = vpop.permute.xlu1 %1051 }
 0x25d   : > { %v5594_v7 = vadd.s32 4294967169, %v2741_v57  ;;  %v8150_v9 = vshrl.u32 %v8039_v1, 5  ;;  %v2443_v50 = vshrl.u32 %v11340_v16, %v8091_v25  ;;  %v2446_v14 = vshrl.u32 %v11226_v10, %v8091_v25  ;;  %11363 = vst [vmem:[#allocation45_spill] sm:$0xff] %v8169_v38  ;;  %v8173_v22 = vpop.permute.xlu0 %1049 }
 0x25e   : > { %v2449_v43 = vshrl.u32 %v11338_v20, %v8091_v25  ;;  %v8158_v23 = vadd.s32 %v2588_v61, %v2584_v17  ;;  %v2453_v6 = vor.u32 %v2452_v44, %v2451_v29  ;;  %v2454_v21 = vshll.u32 %v11220_v31, %v8067_v8  ;;  %11365 = vst [vmem:[#allocation50_spill] sm:$0xff] %v8173_v22 }
 0x25f   : > { %v2636_v57 = vand.u32 2139095040, %v8142_v11  ;;  %v2401_v53 = vand.u32 2147483647, %v2400_v3  ;;  %v2442_v1 = vshll.u32 %v11221_v39, %v8067_v8  ;;  %v2445_v37 = vshll.u32 %v11340_v16, %v8067_v8 }
 0x260   : > { %v2448_v42 = vshll.u32 %v11226_v10, %v8067_v8  ;;  %v2294_v17 = vadd.s32 127, %v2293_v0  ;;  %v11364_v44 = vand.u32 2147483647, %v7898_v12  ;;  %v2456_v29 = vor.u32 %v2455_v5, %v2454_v21 }
 0x261   : > { %v2747_v27 = vadd.s32 1, %v5594_v7  ;;  %v8175_v3 = vor.u32 %v2443_v50, %v2442_v1  ;;  %v8177_v58 = vor.u32 %v2446_v14, %v2445_v37  ;;  %vm2460_vm9 = vcmp.lt.s32.totalorder %v8150_v9, 4 }
 0x262   : > { %v2432_v61 = vand.u32 8388607, %v11364_v44  ;;  %v2450_v55 = vor.u32 %v2449_v43, %v2448_v42  ;;  %v2289_v52 = vsub.s32 32, %v8117_v40  ;;  %v2590_v8 = vadd.s32 536870912, %v8158_v23 }
 0x263   : > { %v2466_v0 = vsel %vm2460_vm9, %v2453_v6, 920167782  ;;  %v2637_v41 = vshrl.u32 %v2636_v57, 23  ;;  %v8186_v21 = vsel %vm11033_vm4, nan, %v2111_v19  ;;  %v2404_v5 = vmul.f32 %v2403_v34, %v2401_v53  ;;  %v8203_v34 = vpop.permute.xlu1 %1055  ;;  %v8208_v57 = vpop.permute.xlu0 %1053 }
 0x264   : > { %11366 = vst [vmem:[#allocation47_spill] sm:$0xff] %v8186_v21  ;;  %v2410_v37 = vsel %vm8125_vm8, 0, %v2408_v4  ;;  %vm2219_vm11 = vcmp.lt.s32.totalorder %v7411_v36, 0  ;;  %v2273_v42 = vadd.s32 %v7747_v35, %v7756_v30  ;;  %vm2457_vm7 = vcmp.lt.s32.totalorder %v8150_v9, 1  ;;  %11367 = vst [vmem:[#allocation51_spill] sm:$0xff] %v8203_v34 }
 0x265   : > { %vm2459_vm10 = vcmp.lt.s32.totalorder %v8150_v9, 3  ;;  %v2470_v7 = vsel %vm2460_vm9, %v2456_v29, 1326507024  ;;  %vm2748_vm5 = vcmp.gt.s32.totalorder %v2747_v27, 0  ;;  %v2295_v50 = vshll.u32 %v2294_v17, 23  ;;  %11369 = vst [vmem:[#allocation5_spill] sm:$0xff] %v8208_v57 }
 0x266   : > { %v2433_v19 = vor.u32 8388608, %v2432_v61  ;;  %v2465_v53 = vsel %vm2457_vm7, %v8175_v3, %v8177_v58  ;;  %v2467_v4 = vsel %vm2459_vm10, %v2450_v55, %v2466_v0  ;;  %v4989_v35 = vmul.f32 2.0, %v8186_v21 }
 0x267   : > { %v2291_v30 = vshrl.u32 %v2273_v42, %v2289_v52  ;;  %v8206_v14 = vshrl.u32 %v2590_v8, 30  ;;  %v5590_v43 = vadd.s32 4294967169, %v2637_v41  ;;  %v11370_v1 = vand.u32 2147483647, %v7411_v36 }
 0x268   : > { %v11371_v17 = vmov 0  ;;  %vm2458_vm13 = vcmp.lt.s32.totalorder %v8150_v9, 2  ;;  %v2469_v44 = vsel %vm2457_vm7, %v8177_v58, %v2450_v55  ;;  %v2471_v52 = vsel %vm2459_vm10, %v2453_v6, %v2470_v7 }
 0x269   : > { %11368 = vst [vmem:[#allocation12_spill] sm:$0xff] %v8206_v14  ;;  %vm8212_vm4 = vcmp.le.f32.partialorder %v11370_v1, 0.7853982  ;;  %v2749_v61 = vsel %vm2748_vm5, %v2747_v27, 0  ;;  %v2405_v29 = vxor.u32 2147483648, %v2404_v5  ;;  %v2303_v8 = vsub.s32 4, %v7902_v47 }
 0x26a   : > { %v11372_v17 = vsel %vm8212_vm4, 4294967295, %v11371_v17  ;;  %v2468_v0 = vsel %vm2458_vm13, %v2465_v53, %v2467_v4  ;;  %v2414_v42 = vadd.s32 3, %v2410_v37  ;;  %v2290_v1 = vshll.u32 %v7961_v46, %v8117_v40  ;;  %v8241_v46 = vpop.permute.xlu1 %1059 }
 0x26b   : > { %11373 = vst [vmem:[#allocation4_spill] sm:$0xff] %v11372_v17  ;;  %v2296_v63 = vor.u32 4788187, %v2295_v50  ;;  %v8228_v51 = vshll.u32 %v2433_v19, 8  ;;  %v2592_v32 = vshll.u32 %v8206_v14, 30  ;;  %v2472_v27 = vsel %vm2458_vm13, %v2469_v44, %v2471_v52  ;;  %11376 = vst [vmem:[#allocation57_spill] sm:$0xff] %v8241_v46 }
 0x26c   : > { %v2751_v6 = vand.u32 31, %v2749_v61  ;;  %v2643_v7 = vadd.s32 1, %v5590_v43  ;;  %v8234_v41 = vmul.f32 %v4989_v35, %v8186_v21  ;;  %v2292_v13 = vor.u32 %v2291_v30, %v2290_v1  ;;  %v11377_v35 = vld [vmem:[#allocation6_spill] sm:$0xff]  ;;  %v8254_v43 = vpop.permute.xlu0 %1057 }
 0x26d   : > { %v8237_v53 = vmul.u32.u64.low %v8228_v51, %v2468_v0  ;;  %v8238_v4 = vmul.u32.u64.high %v8228_v51, %v2468_v0, %v8237_v53  ;;  %v2406_v40 = vsel %vm2323_vm12, %v2405_v29, %v2404_v5  ;;  %v2304_v50 = vsel %vm2219_vm11, %v2303_v8, %v7902_v47  ;;  %11379 = vst [vmem:[#allocation58_spill] sm:$0xff] %v8254_v43 }
 0x26e   : > { %11374 = vst [vmem:[#allocation8_spill] sm:$0xff] %v8234_v41  ;;  %v11041_v19 = vand.u32 2147483647, %v8054_v59  ;;  %v8252_v30 = vsel %vm11111_vm6, %v11377_v35, %v8074_v45  ;;  %v2297_v44 = vand.u32 2147483647, %v2296_v63  ;;  %v8263_v29 = vsub.s32 %v8158_v23, %v2592_v32  ;;  %v8294_v35 = vpop.permute.xlu1 %1063 }
 0x26f   : > { %11375 = vst [vmem:[#allocation56_spill] sm:$0xff] %v8237_v53  ;;  %11378 = vst [vmem:[#allocation6_spill] sm:$0xff] %v8252_v30  ;;  %v2462_v52 = vsel %vm2460_vm9, %v2450_v55, 2102212464  ;;  %v8259_v0 = vmul.u32.u64.low %v8228_v51, %v2472_v27  ;;  %v8260_v5 = vmul.u32.u64.high %v8228_v51, %v2472_v27, %v8259_v0  ;;  %v2441_v47 = vshrl.u32 %v11221_v39, %v8091_v25 }
 0x270   : > { %11381 = vst [vmem:[#allocation60_spill] sm:$0xff] %v8263_v29  ;;  %v8267_v8 = vsub.s32 32, %v2751_v6  ;;  %vm2644_vm12 = vcmp.gt.s32.totalorder %v2643_v7, 0  ;;  %v8269_v45 = vand.u32 3, %v2414_v42  ;;  %v8271_v63 = vand.u32 3, %v2410_v37  ;;  %11385 = vst [vmem:[#allocation64_spill] sm:$0xff] %v8294_v35 }
 0x271   : > { %11380 = vst [vmem:[#allocation59_spill] sm:$0xff] %v8260_v5  ;;  %v2299_v1 = vcvt.s32.f32 %v2292_v13  ;;  %v2948_v55 = vand.u32 2139095040, %v8252_v30  ;;  %v8277_v32 = vsel %vm8212_vm4, 0, %v2304_v50  ;;  %v2461_v25 = vsel %vm2457_vm7, %v2441_v47, %v8175_v3 }
 0x272   : > { %11382 = vst [vmem:[#allocation61_spill] sm:$0xff] %v8269_v45  ;;  %11383 = vst [vmem:[#allocation62_spill] sm:$0xff] %v8271_v63  ;;  %v2463_v23 = vsel %vm2459_vm10, %v8177_v58, %v2462_v52  ;;  %v8288_v13 = vsel %vm8125_vm8, %v11350_v54, %v2406_v40  ;;  %v2744_v42 = vand.u32 8388607, %v11041_v19  ;;  %v2645_v50 = vsel %vm2644_vm12, %v2643_v7, 0  ;;  %v8302_v52 = vld [vmem:[%s6317_s28 + $0x40] sm:$0xff]  ;;  %v8305_v40 = vpop.permute.xlu0 %1061 }
 0x273   : > { %11384 = vst [vmem:[#allocation63_spill] sm:$0xff] %v8277_v32  ;;  %v8290_v37 = vmul.f32 %v2299_v1, %v2297_v44  ;;  %v2595_v0 = vsub.s32 0, %v8263_v29  ;;  %v2764_v3 = vshrl.u32 %v11220_v31, %v8267_v8  ;;  %v2767_v58 = vshrl.u32 %v11301_v56, %v8267_v8  ;;  %11386 = vst [vmem:[#allocation65_spill] sm:$0xff] %v8305_v40 }
 0x274   : > { %v977_v2 = vmul.f32 256.0, %v8302_v52  ;;  %v2464_v44 = vsel %vm2458_vm13, %v2461_v25, %v2463_v23  ;;  %v2483_v7 = vadd.s32 1, %v8238_v4  ;;  %v2763_v47 = vshll.u32 %v11338_v20, %v2751_v6 }
 0x275   : > { %v2949_v1 = vshrl.u32 %v2948_v55, 23  ;;  %v2755_v27 = vshrl.u32 %v11340_v16, %v8267_v8  ;;  %v2758_v19 = vshrl.u32 %v11226_v10, %v8267_v8  ;;  %v2766_v21 = vshll.u32 %v11220_v31, %v2751_v6 }
 0x276   : > { %v2647_v41 = vand.u32 31, %v2645_v50  ;;  %1257 = vrot.lane.b32.xlu0 %v977_v2, %s5922_s22  ;;  %vm2482_vm8 = vc.u32 %v8260_v5, %v8237_v53  ;;  %v2745_v9 = vor.u32 8388608, %v2744_v42  ;;  %v8319_v25 = vshrl.u32 %v2749_v61, 5  ;;  %v8330_v42 = vpop.permute.xlu1 %1067  ;;  %v8335_v22 = vpop.permute.xlu0 %1065 }
 0x277   : > { %v2761_v55 = vshrl.u32 %v11338_v20, %v8267_v8  ;;  %v2754_v23 = vshll.u32 %v11221_v39, %v2751_v6  ;;  %v2757_v63 = vshll.u32 %v11340_v16, %v2751_v6  ;;  %v2765_v28 = vor.u32 %v2764_v3, %v2763_v47  ;;  %11387 = vst [vmem:[#allocation66_spill] sm:$0xff] %v8330_v42 }
 0x278   : > { %v2768_v40 = vor.u32 %v2767_v58, %v2766_v21  ;;  %5790 = vcosq.f32 %v8288_v13  ;;  %v8327_v35 = vadd.s32 3, %v8277_v32  ;;  %v2760_v2 = vshll.u32 %v11226_v10, %v2751_v6  ;;  %11388 = vst [vmem:[#allocation67_spill] sm:$0xff] %v8335_v22 }
 0x279   : > { %v5602_v43 = vadd.s32 4294967169, %v2949_v1  ;;  %v2484_v61 = vsel %vm2482_vm8, %v2483_v7, %v8238_v4  ;;  %v2756_v46 = vor.u32 %v2755_v27, %v2754_v23  ;;  %v2759_v57 = vor.u32 %v2758_v19, %v2757_v63 }
 0x27a   : > { %v8333_v34 = vsub.s32 32, %v2647_v41  ;;  %v2480_v3 = vmul.u32 %v8228_v51, %v2464_v44  ;;  %v2762_v58 = vor.u32 %v2761_v55, %v2760_v2  ;;  %vm2772_vm13 = vcmp.lt.s32.totalorder %v8319_v25, 4 }
 0x27b   : > { %v8341_v6 = vmin.u32 %v2595_v0, %v8263_v29  ;;  %v2778_v47 = vsel %vm2772_vm13, %v2765_v28, 920167782  ;;  %v2782_v4 = vsel %vm2772_vm13, %v2768_v40, 1326507024  ;;  %v8347_v19 = vshll.u32 %v2745_v9, 8  ;;  %v8367_v9 = vpop.permute.xlu1 %1071 }
 0x27c   : > { %v8349_v63 = vadd.s32 %v2484_v61, %v2480_v3  ;;  %vm2769_vm9 = vcmp.lt.s32.totalorder %v8319_v25, 1  ;;  %v11049_v51 = vand.u32 2147483647, %v8142_v11  ;;  %v2955_v27 = vadd.s32 1, %v5602_v43  ;;  %11389 = vst [vmem:[#allocation68_spill] sm:$0xff] %v8367_v9  ;;  %v11390_v61 = vld [vmem:[#allocation9_spill] sm:$0xff] }
 0x27d   : > { %vm2770_vm7 = vcmp.lt.s32.totalorder %v8319_v25, 2  ;;  %vm2771_vm10 = vcmp.lt.s32.totalorder %v8319_v25, 3  ;;  %v2777_v0 = vsel %vm2769_vm9, %v2756_v46, %v2759_v57  ;;  %v2660_v44 = vshrl.u32 %v11220_v31, %v8333_v34 }
 0x27e   : > { %v2779_v40 = vsel %vm2771_vm10, %v2762_v58, %v2778_v47  ;;  %v2781_v7 = vsel %vm2769_vm9, %v2759_v57, %v2762_v58  ;;  %v2783_v1 = vsel %vm2771_vm10, %v2765_v28, %v2782_v4  ;;  %v2663_v43 = vshrl.u32 %v11301_v56, %v8333_v34  ;;  %v8379_v47 = vpop.permute.xlu0 %1069 }
 0x27f   : > { %v8369_v55 = vshrl.u32 %v2645_v50, 5  ;;  %v2651_v23 = vshrl.u32 %v11340_v16, %v8333_v34  ;;  %v2659_v2 = vshll.u32 %v11338_v20, %v2647_v41  ;;  %v8377_v3 = vsel %vm11111_vm6, %v11390_v61, %v8080_v24  ;;  %11392 = vst [vmem:[#allocation69_spill] sm:$0xff] %v8379_v47  ;;  %v8403_v12 = vpop.permute.xlu1 %1075 }
 0x280   : > { %11391 = vst [vmem:[#allocation9_spill] sm:$0xff] %v8377_v3  ;;  %v2654_v28 = vshrl.u32 %v11226_v10, %v8333_v34  ;;  %v2657_v4 = vshrl.u32 %v11338_v20, %v8333_v34  ;;  %v2662_v50 = vshll.u32 %v11220_v31, %v2647_v41  ;;  %vm2956_vm5 = vcmp.gt.s32.totalorder %v2955_v27, 0  ;;  %11394 = vst [vmem:[#allocation71_spill] sm:$0xff] %v8403_v12 }
 0x281   : > { %v2780_v21 = vsel %vm2770_vm7, %v2777_v0, %v2779_v40  ;;  %v2640_v9 = vand.u32 8388607, %v11049_v51  ;;  %v2650_v24 = vshll.u32 %v11221_v39, %v2647_v41  ;;  %v2661_v61 = vor.u32 %v2660_v44, %v2659_v2 }
 0x282   : > { %v8391_v22 = vpop.eup %5790  ;;  %v2653_v47 = vshll.u32 %v11340_v16, %v2647_v41  ;;  %v2656_v42 = vshll.u32 %v11226_v10, %v2647_v41  ;;  %v2664_v38 = vor.u32 %v2663_v43, %v2662_v50  ;;  %v2844_v32 = vand.u32 2139095040, %v8377_v3 }
 0x283   : > { %11393 = vst [vmem:[#allocation70_spill] sm:$0xff] %v8391_v22  ;;  %v2753_v59 = vshrl.u32 %v11221_v39, %v8267_v8  ;;  %v2774_v0 = vsel %vm2772_vm13, %v2762_v58, 2102212464  ;;  %v2784_v40 = vsel %vm2770_vm7, %v2781_v7, %v2783_v1  ;;  %v2957_v51 = vsel %vm2956_vm5, %v2955_v27, 0  ;;  %v8414_v7 = vpop.permute.xlu0 %1073 }
 0x284   : > { %v2652_v44 = vor.u32 %v2651_v23, %v2650_v24  ;;  %v2655_v2 = vor.u32 %v2654_v28, %v2653_v47  ;;  %v2658_v11 = vor.u32 %v2657_v4, %v2656_v42  ;;  %vm2668_vm12 = vcmp.lt.s32.totalorder %v8369_v55, 4  ;;  %11396 = vst [vmem:[#allocation73_spill] sm:$0xff] %v8414_v7  ;;  %v8442_v24 = vpop.permute.xlu1 %1079 }
 0x285   : > { %v2773_v41 = vsel %vm2769_vm9, %v2753_v59, %v2756_v46  ;;  %v8408_v43 = vmul.u32.u64.low %v8347_v19, %v2780_v21  ;;  %v8409_v8 = vmul.u32.u64.high %v8347_v19, %v2780_v21, %v8408_v43  ;;  %v2674_v58 = vsel %vm2668_vm12, %v2661_v61, 920167782  ;;  %11398 = vst [vmem:[#allocation75_spill] sm:$0xff] %v8442_v24 }
 0x286   : > { %v2775_v42 = vsel %vm2771_vm10, %v2759_v57, %v2774_v0  ;;  %v2678_v27 = vsel %vm2668_vm12, %v2664_v38, 1326507024  ;;  %v2959_v1 = vand.u32 31, %v2957_v51  ;;  %v2845_v23 = vshrl.u32 %v2844_v32, 23 }
 0x287   : > { %11395 = vst [vmem:[#allocation72_spill] sm:$0xff] %v8408_v43  ;;  %v8421_v59 = vmul.u32.u64.low %v8347_v19, %v2784_v40  ;;  %v8422_v46 = vmul.u32.u64.high %v8347_v19, %v2784_v40, %v8421_v59  ;;  %vm2665_vm8 = vcmp.lt.s32.totalorder %v8369_v55, 1  ;;  %vm2667_vm13 = vcmp.lt.s32.totalorder %v8369_v55, 3 }
 0x288   : > { %v2597_v21 = vclz %v8341_v6  ;;  %v2641_v47 = vor.u32 8388608, %v2640_v9  ;;  %v2673_v28 = vsel %vm2665_vm8, %v2652_v44, %v2655_v2  ;;  %v2675_v57 = vsel %vm2667_vm13, %v2658_v11, %v2674_v58 }
 0x289   : > { %11397 = vst [vmem:[#allocation74_spill] sm:$0xff] %v8422_v46  ;;  %5792 = vsinq.f32 %v8288_v13  ;;  %v2486_v38 = vadd.s32 536870912, %v8349_v63  ;;  %v2677_v32 = vsel %vm2665_vm8, %v2655_v2, %v2658_v11  ;;  %v2679_v4 = vsel %vm2667_vm13, %v2661_v61, %v2678_v27 }
 0x28a   : > { %v2776_v6 = vsel %vm2770_vm7, %v2773_v41, %v2775_v42  ;;  %vm2666_vm9 = vcmp.lt.s32.totalorder %v8369_v55, 2  ;;  %v8440_v9 = vsub.s32 32, %v2959_v1  ;;  %v5598_v50 = vadd.s32 4294967169, %v2845_v23  ;;  %v8457_v41 = vpop.permute.xlu0 %1077  ;;  %v11403_v23 = vld [vmem:[#allocation10_spill] sm:$0xff] }
 0x28b   : > { %v11399_v0 = vxor.u32 2147483648, %v8290_v37  ;;  %v8453_v61 = vand.u32 3, %v8327_v35  ;;  %v2676_v25 = vsel %vm2666_vm9, %v2673_v28, %v2675_v57  ;;  %11402 = vst [vmem:[#allocation78_spill] sm:$0xff] %v8457_v41  ;;  %v8459_v58 = vadd.s32 4294967294, %v2597_v21 }
 0x28c   : > { %v2680_v42 = vsel %vm2666_vm9, %v2677_v32, %v2679_v4  ;;  %v8463_v27 = vshll.u32 %v2641_v47, 8  ;;  %v8470_v59 = vshrl.u32 %v2486_v38, 30  ;;  %v2792_v35 = vmul.u32 %v8347_v19, %v2776_v6 }
 0x28d   : > { %v8450_v40 = vsel %vm2219_vm11, %v11399_v0, %v8290_v37  ;;  %11401 = vst [vmem:[#allocation77_spill] sm:$0xff] %v8453_v61  ;;  %v8468_v37 = vsel %vm11111_vm6, %v11403_v23, %v8119_v48  ;;  %v2795_v28 = vadd.s32 1, %v8409_v8  ;;  %v2649_v21 = vshrl.u32 %v11221_v39, %v8333_v34 }
 0x28e   : > { %11400 = vst [vmem:[#allocation76_spill] sm:$0xff] %v8450_v40  ;;  %11404 = vst [vmem:[#allocation10_spill] sm:$0xff] %v8468_v37  ;;  %v8477_v57 = vmul.u32.u64.low %v8463_v27, %v2676_v25  ;;  %v8478_v0 = vmul.u32.u64.high %v8463_v27, %v2676_v25, %v8477_v57  ;;  %v2975_v47 = vshrl.u32 %v11301_v56, %v8440_v9  ;;  %v2851_v32 = vadd.s32 1, %v5598_v50  ;;  %v8496_v50 = vpop.permute.xlu1 %1115  ;;  %v8506_v13 = vpop.permute.xlu0 %1113 }
 0x28f   : > { %11405 = vst [vmem:[#allocation79_spill] sm:$0xff] %v8470_v59  ;;  %v2670_v48 = vsel %vm2668_vm12, %v2658_v11, 2102212464  ;;  %v8486_v38 = vmul.u32.u64.low %v8463_v27, %v2680_v42  ;;  %v8487_v19 = vmul.u32.u64.high %v8463_v27, %v2680_v42, %v8486_v38  ;;  %v3156_v4 = vand.u32 2139095040, %v8468_v37  ;;  %11408 = vst [vmem:[#allocation82_spill] sm:$0xff] %v8496_v50 }
 0x290   : > { %11406 = vst [vmem:[#allocation80_spill] sm:$0xff] %v8477_v57  ;;  %vm2794_vm11 = vc.u32 %v8422_v46, %v8408_v43  ;;  %v2972_v6 = vshrl.u32 %v11220_v31, %v8440_v9  ;;  %v2974_v25 = vshll.u32 %v11220_v31, %v2959_v1  ;;  %v2669_v11 = vsel %vm2665_vm8, %v2649_v21, %v2652_v44 }
 0x291   : > { %11407 = vst [vmem:[#allocation81_spill] sm:$0xff] %v8487_v19  ;;  %v8500_v23 = vshrl.u32 %v2957_v51, 5  ;;  %v2966_v42 = vshrl.u32 %v11226_v10, %v8440_v9  ;;  %v2969_v38 = vshrl.u32 %v11338_v20, %v8440_v9  ;;  %11409 = vst [vmem:[#allocation83_spill] sm:$0xff] %v8506_v13  ;;  %v2671_v34 = vsel %vm2667_vm13, %v2655_v2, %v2670_v48 }
 0x292   : > { %v2971_v41 = vshll.u32 %v11338_v20, %v2959_v1  ;;  %v2976_v24 = vor.u32 %v2975_v47, %v2974_v25  ;;  %vm2852_vm7 = vcmp.gt.s32.totalorder %v2851_v32, 0  ;;  %v2963_v51 = vshrl.u32 %v11340_v16, %v8440_v9 }
 0x293   : > { %v8511_v50 = vpop.eup %5792  ;;  %v2965_v44 = vshll.u32 %v11340_v16, %v2959_v1  ;;  %v2968_v21 = vshll.u32 %v11226_v10, %v2959_v1  ;;  %v3157_v7 = vshrl.u32 %v3156_v4, 23  ;;  %v2796_v13 = vsel %vm2794_vm11, %v2795_v28, %v8409_v8  ;;  %v8533_v28 = vpop.permute.xlu1 %1119 }
 0x294   : > { %11410 = vst [vmem:[#allocation84_spill] sm:$0xff] %v8511_v50  ;;  %v11411_v2 = vand.u32 2147483647, %v8252_v30  ;;  %v2962_v47 = vshll.u32 %v11221_v39, %v2959_v1  ;;  %v2973_v25 = vor.u32 %v2972_v6, %v2971_v41  ;;  %vm2980_vm10 = vcmp.lt.s32.totalorder %v8500_v23, 4  ;;  %11412 = vst [vmem:[#allocation85_spill] sm:$0xff] %v8533_v28  ;;  %v8539_v6 = vpop.permute.xlu0 %1117 }
 0x295   : > { %v2967_v12 = vor.u32 %v2966_v42, %v2965_v44  ;;  %v2970_v53 = vor.u32 %v2969_v38, %v2968_v21  ;;  %v8525_v5 = vsel %vm2852_vm7, %v2851_v32, 0  ;;  %v2488_v61 = vshll.u32 %v8470_v59, 30  ;;  %11413 = vst [vmem:[#allocation86_spill] sm:$0xff] %v8539_v6  ;;  %v8557_v38 = vld [vmem:[%s6317_s28 + $0x58] sm:$0xff] }
 0x296   : > { %v2952_v48 = vand.u32 8388607, %v11411_v2  ;;  %v2672_v4 = vsel %vm2666_vm9, %v2669_v11, %v2671_v34  ;;  %v2691_v43 = vadd.s32 1, %v8478_v0  ;;  %v2990_v8 = vsel %vm2980_vm10, %v2976_v24, 1326507024  ;;  %v8565_v2 = vld [vmem:[%s6317_s28 + $0x50] sm:$0xff] }
 0x297   : > { %v8535_v1 = vadd.s32 %v2796_v13, %v2792_v35  ;;  %vm2690_vm5 = vc.u32 %v8487_v19, %v8477_v57  ;;  %v2964_v41 = vor.u32 %v2963_v51, %v2962_v47  ;;  %v5610_v32 = vadd.s32 4294967169, %v3157_v7 }
 0x298   : > { %vm2977_vm12 = vcmp.lt.s32.totalorder %v8500_v23, 1  ;;  %vm2979_vm8 = vcmp.lt.s32.totalorder %v8500_v23, 3  ;;  %v2986_v55 = vsel %vm2980_vm10, %v2973_v25, 920167782  ;;  %v8546_v24 = vand.u32 31, %v8525_v5 }
 0x299   : > { %v2688_v13 = vmul.u32 %v8463_v27, %v2672_v4  ;;  %v2953_v35 = vor.u32 8388608, %v2952_v48  ;;  %v2989_v34 = vsel %vm2977_vm12, %v2967_v12, %v2970_v53  ;;  %v2991_v7 = vsel %vm2979_vm8, %v2973_v25, %v2990_v8  ;;  %v8578_v4 = vpop.permute.xlu1 %1123 }
 0x29a   : > { %v2692_v11 = vsel %vm2690_vm5, %v2691_v43, %v8478_v0  ;;  %vm2978_vm13 = vcmp.lt.s32.totalorder %v8500_v23, 2  ;;  %v11058_v42 = vand.u32 2147483647, %v8377_v3  ;;  %v980_v51 = vmul.f32 256.0, %v8557_v38  ;;  %11414 = vst [vmem:[#allocation87_spill] sm:$0xff] %v8578_v4 }
 0x29b   : > { %v2985_v27 = vsel %vm2977_vm12, %v2964_v41, %v2967_v12  ;;  %v2987_v44 = vsel %vm2979_vm8, %v2970_v53, %v2986_v55  ;;  %v3163_v21 = vadd.s32 1, %v5610_v32  ;;  %v979_v43 = vmul.f32 256.0, %v8565_v2  ;;  %v8590_v55 = vld [vmem:[%s6317_s28 + $0x60] sm:$0xff] }
 0x29c   : > { %v8569_v0 = vsub.s32 %v8349_v63, %v2488_v61  ;;  %v2798_v48 = vadd.s32 536870912, %v8535_v1  ;;  %v2992_v47 = vsel %vm2978_vm13, %v2989_v34, %v2991_v7  ;;  %v8575_v25 = vsub.s32 32, %v8546_v24  ;;  %1263 = vrot.lane.b32.xlu1 %v980_v51, %s5922_s22  ;;  %v8586_v63 = vld [vmem:[%s6317_s28 + $0x68] sm:$0xff]  ;;  %v8593_v7 = vpop.permute.xlu0 %1121 }
 0x29d   : > { %v8580_v8 = vadd.s32 %v2692_v11, %v2688_v13  ;;  %v8582_v32 = vshll.u32 %v2953_v35, 8  ;;  %1261 = vrot.lane.b32.xlu0 %v979_v43, %s5922_s22  ;;  %v982_v61 = vmul.f32 256.0, %v8586_v63  ;;  %v981_v34 = vmul.f32 256.0, %v8590_v55  ;;  %11415 = vst [vmem:[#allocation88_spill] sm:$0xff] %v8593_v7  ;;  %v11416_v7 = vld [vmem:[#allocation14_spill] sm:$0xff] }
 0x29e   : > { %v2961_v51 = vshrl.u32 %v11221_v39, %v8440_v9  ;;  %v2982_v13 = vsel %vm2980_vm10, %v2970_v53, 2102212464  ;;  %v2988_v35 = vsel %vm2978_vm13, %v2985_v27, %v2987_v44  ;;  %v8603_v11 = vand.u32 8388607, %v11058_v42  ;;  %v8622_v42 = vld [vmem:[%s6317_s28 + $0x78] sm:$0xff] }
 0x29f   : > { %v8606_v43 = vmul.u32.u64.low %v8582_v32, %v2992_v47  ;;  %v8607_v4 = vmul.u32.u64.high %v8582_v32, %v2992_v47, %v8606_v43  ;;  %vm3164_vm9 = vcmp.gt.s32.totalorder %v3163_v21, 0  ;;  %v8612_v9 = vsel %vm11111_vm6, %v11416_v7, %v8131_v33 }
 0x2a0   : > { %11417 = vst [vmem:[#allocation14_spill] sm:$0xff] %v8612_v9  ;;  %v2981_v53 = vsel %vm2977_vm12, %v2961_v51, %v2964_v41  ;;  %v2868_v27 = vshrl.u32 %v11220_v31, %v8575_v25  ;;  %v2871_v44 = vshrl.u32 %v11301_v56, %v8575_v25  ;;  %1267 = vrot.lane.b32.xlu1 %v982_v61, %s5922_s22  ;;  %v984_v47 = vmul.f32 256.0, %v8622_v42  ;;  %v8634_v41 = vld [vmem:[%s6317_s28 + $0x70] sm:$0xff]  ;;  %v8655_v59 = vpop.permute.xlu0 %1125 }
 0x2a1   : > { %v2983_v43 = vsel %vm2979_vm8, %v2967_v12, %v2982_v13  ;;  %v8628_v33 = vmul.u32.u64.low %v8582_v32, %v2988_v35  ;;  %v8629_v7 = vmul.u32.u64.high %v8582_v32, %v2988_v35, %v8628_v33  ;;  %1265 = vrot.lane.b32.xlu0 %v981_v34, %s5922_s22  ;;  %v983_v51 = vmul.f32 256.0, %v8634_v41  ;;  %v8644_v13 = vpop.permute.xlu1 %1127  ;;  %11419 = vst [vmem:[#allocation90_spill] sm:$0xff] %v8655_v59 }
 0x2a2   : > { %v2867_v61 = vshll.u32 %v11338_v20, %v8546_v24  ;;  %v2870_v6 = vshll.u32 %v11220_v31, %v8546_v24  ;;  %v8641_v28 = vsel %vm3164_vm9, %v3163_v21, 0  ;;  %v3052_v12 = vand.u32 2139095040, %v8612_v9  ;;  %11418 = vst [vmem:[#allocation89_spill] sm:$0xff] %v8644_v13 }
 0x2a3   : > { %v8647_v34 = vshrl.u32 %v8525_v5, 5  ;;  %v2859_v35 = vshrl.u32 %v11340_v16, %v8575_v25  ;;  %v2862_v3 = vshrl.u32 %v11226_v10, %v8575_v25  ;;  %v2865_v30 = vshrl.u32 %v11338_v20, %v8575_v25  ;;  %v8661_v5 = vld [vmem:[%s6317_s28 + $0x8] sm:$0xff] }
 0x2a4   : > { %v2858_v21 = vshll.u32 %v11221_v39, %v8546_v24  ;;  %v2869_v57 = vor.u32 %v2868_v27, %v2867_v61  ;;  %v2872_v13 = vor.u32 %v2871_v44, %v2870_v6  ;;  %1271 = vrot.lane.b32.xlu1 %v984_v47, %s5922_s22  ;;  %v986_v19 = vmul.f32 1024.0, %v8661_v5  ;;  %v8673_v27 = vld [vmem:[%s6317_s28] sm:$0xff] }
 0x2a5   : > { %v2861_v46 = vshll.u32 %v11340_v16, %v8546_v24  ;;  %v2864_v14 = vshll.u32 %v11226_v10, %v8546_v24  ;;  %v8669_v29 = vand.u32 31, %v8641_v28  ;;  %1269 = vrot.lane.b32.xlu0 %v983_v51, %s5922_s22  ;;  %v985_v6 = vmul.f32 1024.0, %v8673_v27 }
 0x2a6   : > { %v8677_v47 = vshrl.u32 %v2798_v48, 30  ;;  %v8681_v61 = vsel %vm2978_vm13, %v2981_v53, %v2983_v43  ;;  %v3053_v59 = vshrl.u32 %v3052_v12, 23  ;;  %v8683_v24 = vor.u32 %v2859_v35, %v2858_v21  ;;  %v8697_v53 = vld [vmem:[%s6317_s28 + $0x18] sm:$0xff]  ;;  %v8715_v12 = vpop.permute.xlu0 %1129 }
 0x2a7   : > { %v8685_v49 = vor.u32 %v2862_v3, %v2861_v46  ;;  %v8687_v54 = vor.u32 %v2865_v30, %v2864_v14  ;;  %vm2876_vm11 = vcmp.lt.s32.totalorder %v8647_v34, 4  ;;  %v2849_v51 = vor.u32 8388608, %v8603_v11  ;;  %v8700_v3 = vpop.permute.xlu1 %1131  ;;  %v8712_v11 = vld [vmem:[%s6317_s28 + $0x10] sm:$0xff]  ;;  %11422 = vst [vmem:[#allocation93_spill] sm:$0xff] %v8715_v12  ;;  %v8740_v12 = vld [vmem:[%s6317_s28 + $0x28] sm:$0xff] }
 0x2a8   : > { %v2882_v48 = vsel %vm2876_vm11, %v2869_v57, 920167782  ;;  %v2886_v23 = vsel %vm2876_vm11, %v2872_v13, 1326507024  ;;  %1307 = vrot.lane.b32.xlu1 %v986_v19, %s5923_s23  ;;  %v988_v43 = vmul.f32 1024.0, %v8697_v53  ;;  %11420 = vst [vmem:[#allocation91_spill] sm:$0xff] %v8700_v3  ;;  %vm3002_vm7 = vc.u32 %v8607_v4, %v8628_v33 }
 0x2a9   : > { %v8703_v14 = vadd.s32 536870912, %v8580_v8  ;;  %v8708_v46 = vsub.s32 32, %v8669_v29  ;;  %1305 = vrot.lane.b32.xlu0 %v985_v6, %s5923_s23  ;;  %11421 = vst [vmem:[#allocation92_spill] sm:$0xff] %v8712_v11  ;;  %v987_v19 = vmul.f32 1024.0, %v8712_v11  ;;  %vm2873_vm10 = vcmp.lt.s32.totalorder %v8647_v34, 1  ;;  %11423 = vst [vmem:[#allocation94_spill] sm:$0xff] %v8740_v12 }
 0x2aa   : > { %vm2875_vm5 = vcmp.lt.s32.totalorder %v8647_v34, 3  ;;  %v5606_v13 = vadd.s32 4294967169, %v3053_v59  ;;  %v2881_v35 = vsel %vm2873_vm10, %v8683_v24, %v8685_v49  ;;  %v2885_v6 = vsel %vm2873_vm10, %v8685_v49, %v8687_v54 }
 0x2ab   : > { %v2883_v21 = vsel %vm2875_vm5, %v8687_v54, %v2882_v48  ;;  %v2887_v44 = vsel %vm2875_vm5, %v2869_v57, %v2886_v23  ;;  %v3003_v30 = vadd.s32 1, %v8629_v7  ;;  %vm2874_vm12 = vcmp.lt.s32.totalorder %v8647_v34, 2  ;;  %v8750_v23 = vld [vmem:[%s6317_s28 + $0x20] sm:$0xff]  ;;  %v8760_v40 = vpop.permute.xlu1 %1135 }
 0x2ac   : > { %v8736_v59 = vshll.u32 %v2849_v51, 8  ;;  %1311 = vrot.lane.b32.xlu1 %v988_v43, %s5923_s23  ;;  %v990_v48 = vmul.f32 1024.0, %v8740_v12  ;;  %v3180_v22 = vshrl.u32 %v11220_v31, %v8708_v46  ;;  %v3183_v57 = vshrl.u32 %v11301_v56, %v8708_v46  ;;  %11424 = vst [vmem:[#allocation95_spill] sm:$0xff] %v8750_v23  ;;  %11425 = vst [vmem:[#allocation96_spill] sm:$0xff] %v8760_v40 }
 0x2ad   : > { %1309 = vrot.lane.b32.xlu0 %v987_v19, %s5923_s23  ;;  %v989_v51 = vmul.f32 1024.0, %v8750_v23  ;;  %vm5589_vm8 = vcmp.lt.s32.totalorder %v8459_v58, 0  ;;  %v2884_v43 = vsel %vm2874_vm12, %v2881_v35, %v2883_v21  ;;  %v2888_v3 = vsel %vm2874_vm12, %v2885_v6, %v2887_v44  ;;  %v8770_v21 = vpop.permute.xlu0 %1133 }
 0x2ae   : > { %v3171_v17 = vshrl.u32 %v11340_v16, %v8708_v46  ;;  %v3059_v36 = vadd.s32 1, %v5606_v13  ;;  %v3174_v19 = vshrl.u32 %v11226_v10, %v8708_v46  ;;  %v3177_v50 = vshrl.u32 %v11338_v20, %v8708_v46  ;;  %11426 = vst [vmem:[#allocation97_spill] sm:$0xff] %v8770_v21 }
 0x2af   : > { %v3179_v23 = vshll.u32 %v11338_v20, %v8669_v29  ;;  %v3182_v35 = vshll.u32 %v11220_v31, %v8669_v29  ;;  %v8773_v44 = vshrl.u32 %v8641_v28, 5  ;;  %v3170_v13 = vshll.u32 %v11221_v39, %v8669_v29 }
 0x2b0   : > { %v3173_v6 = vshll.u32 %v11340_v16, %v8669_v29  ;;  %1315 = vrot.lane.b32.xlu1 %v990_v48, %s5923_s23  ;;  %v992_v40 = vmul.f32 1024.0, %v8057_v62  ;;  %v3176_v18 = vshll.u32 %v11226_v10, %v8669_v29  ;;  %v991_v28 = vmul.f32 1024.0, %v8061_v15 }
 0x2b1   : > { %v3181_v60 = vor.u32 %v3180_v22, %v3179_v23  ;;  %v3184_v12 = vor.u32 %v3183_v57, %v3182_v35  ;;  %1313 = vrot.lane.b32.xlu0 %v989_v51, %s5923_s23  ;;  %v3004_v21 = vsel %vm3002_vm7, %v3003_v30, %v8629_v7  ;;  %vm3060_vm13 = vcmp.gt.s32.totalorder %v3059_v36, 0  ;;  %v8809_v30 = vpop.permute.xlu1 %1139 }
 0x2b2   : > { %v8790_v45 = vmul.u32.u64.low %v8736_v59, %v2884_v43  ;;  %v8791_v11 = vmul.u32.u64.high %v8736_v59, %v2884_v43, %v8790_v45  ;;  %v11427_v62 = vand.u32 2147483647, %v8468_v37  ;;  %v8796_v22 = vor.u32 %v3171_v17, %v3170_v13  ;;  %11428 = vst [vmem:[#allocation98_spill] sm:$0xff] %v8809_v30 }
 0x2b3   : > { %v8798_v48 = vor.u32 %v3174_v19, %v3173_v6  ;;  %v8800_v57 = vor.u32 %v3177_v50, %v3176_v18  ;;  %v8803_v15 = vmul.u32.u64.low %v8736_v59, %v2888_v3  ;;  %v8804_v23 = vmul.u32.u64.high %v8736_v59, %v2888_v3, %v8803_v15  ;;  %v8819_v3 = vpop.permute.xlu0 %1137 }
 0x2b4   : > { %v3160_v29 = vand.u32 8388607, %v11427_v62  ;;  %vm3188_vm9 = vcmp.lt.s32.totalorder %v8773_v44, 4  ;;  %1319 = vrot.lane.b32.xlu1 %v992_v40, %s5923_s23  ;;  %v994_v7 = vmul.f32 1024.0, %v8101_v26  ;;  %v8815_v18 = vsel %vm3060_vm13, %v3059_v36, 0  ;;  %11429 = vst [vmem:[#allocation99_spill] sm:$0xff] %v8819_v3 }
 0x2b5   : > { %v3194_v17 = vsel %vm3188_vm9, %v3181_v60, 920167782  ;;  %v3198_v51 = vsel %vm3188_vm9, %v3184_v12, 1326507024  ;;  %1317 = vrot.lane.b32.xlu0 %v991_v28, %s5923_s23  ;;  %v993_v50 = vmul.f32 1024.0, %v8302_v52  ;;  %v11430_v40 = vmul.u32 %v8582_v32, %v8681_v61  ;;  %v8872_v15 = vpop.permute.xlu1 %1143 }
 0x2b6   : > { %v2857_v43 = vshrl.u32 %v11221_v39, %v8575_v25  ;;  %v2878_v12 = vsel %vm2876_vm11, %v8687_v54, 2102212464  ;;  %vm3185_vm7 = vcmp.lt.s32.totalorder %v8773_v44, 1  ;;  %v3161_v36 = vor.u32 8388608, %v3160_v29  ;;  %11433 = vst [vmem:[#allocation101_spill] sm:$0xff] %v8872_v15 }
 0x2b7   : > { %v8824_v26 = vadd.s32 %v3004_v21, %v11430_v40  ;;  %vm3187_vm13 = vcmp.lt.s32.totalorder %v8773_v44, 3  ;;  %v3193_v19 = vsel %vm3185_vm7, %v8796_v22, %v8798_v48  ;;  %v3197_v32 = vsel %vm3185_vm7, %v8798_v48, %v8800_v57 }
 0x2b8   : > { %v3195_v25 = vsel %vm3187_vm13, %v8800_v57, %v3194_v17  ;;  %v3199_v54 = vsel %vm3187_vm13, %v3181_v60, %v3198_v51  ;;  %v3063_v61 = vand.u32 31, %v8815_v18  ;;  %1323 = vrot.lane.b32.xlu1 %v994_v7, %s5923_s23  ;;  %v996_v35 = vmul.f32 1024.0, %v8557_v38 }
 0x2b9   : > { %v8852_v21 = vsel %vm5589_vm8, 0, %v8459_v58  ;;  %v11431_v13 = vsub.s32 0, %v8569_v0  ;;  %v2800_v28 = vshll.u32 %v8677_v47, 30  ;;  %1321 = vrot.lane.b32.xlu0 %v993_v50, %s5923_s23  ;;  %v995_v60 = vmul.f32 1024.0, %v8565_v2  ;;  %v8880_v50 = vpop.permute.xlu0 %1141 }
 0x2ba   : > { %v8863_v62 = vshrl.u32 %v8703_v14, 30  ;;  %v2877_v29 = vsel %vm2873_vm10, %v2857_v43, %v8683_v24  ;;  %v2879_v58 = vsel %vm2875_vm5, %v8685_v49, %v2878_v12  ;;  %vm3186_vm11 = vcmp.lt.s32.totalorder %v8773_v44, 2  ;;  %11434 = vst [vmem:[#allocation102_spill] sm:$0xff] %v8880_v50 }
 0x2bb   : > { %v8857_v6 = vmin.u32 %v11431_v13, %v8569_v0  ;;  %v3006_v7 = vadd.s32 536870912, %v8824_v26  ;;  %v2899_v17 = vadd.s32 1, %v8791_v11  ;;  %v3196_v14 = vsel %vm3186_vm11, %v3193_v19, %v3195_v25 }
 0x2bc   : > { %11432 = vst [vmem:[#allocation100_spill] sm:$0xff] %v8863_v62  ;;  %v3200_v51 = vsel %vm3186_vm11, %v3197_v32, %v3199_v54  ;;  %vm2898_vm10 = vc.u32 %v8804_v23, %v8790_v45  ;;  %v8884_v49 = vshll.u32 %v3161_v36, 8  ;;  %v8886_v24 = vsub.s32 32, %v3063_v61  ;;  %1327 = vrot.lane.b32.xlu1 %v996_v35, %s5923_s23 }
 0x2bd   : > { %v998_v40 = vmul.f32 1024.0, %v8586_v63  ;;  %v2880_v19 = vsel %vm2874_vm12, %v2877_v29, %v2879_v58  ;;  %1325 = vrot.lane.b32.xlu0 %v995_v60, %s5923_s23  ;;  %v997_v32 = vmul.f32 1024.0, %v8590_v55  ;;  %v8906_v13 = vsub.s32 %v8535_v1, %v2800_v28  ;;  %v8919_v1 = vpop.permute.xlu1 %1179 }
 0x2be   : > { %v8897_v36 = vmul.u32.u64.low %v8884_v49, %v3200_v51  ;;  %v8898_v25 = vmul.u32.u64.high %v8884_v49, %v3200_v51, %v8897_v36  ;;  %v8901_v54 = vmul.u32.u64.low %v8884_v49, %v3196_v14  ;;  %v8902_v35 = vmul.u32.u64.high %v8884_v49, %v3196_v14, %v8901_v54  ;;  %11437 = vst [vmem:[#allocation105_spill] sm:$0xff] %v8919_v1  ;;  %v11453_v1 = vld [vmem:[#allocation7_spill] sm:$0xff] }
 0x2bf   : > { %v2696_v12 = vshll.u32 %v8863_v62, 30  ;;  %v8909_v34 = vshrl.u32 %v3006_v7, 30  ;;  %v2900_v60 = vsel %vm2898_vm10, %v2899_v17, %v8791_v11  ;;  %v2896_v29 = vmul.u32 %v8736_v59, %v2880_v19  ;;  %v8929_v7 = vpop.permute.xlu0 %1177 }
 0x2c0   : > { %11435 = vst [vmem:[#allocation103_spill] sm:$0xff] %v8901_v54  ;;  %v3169_v58 = vshrl.u32 %v11221_v39, %v8708_v46  ;;  %v3076_v51 = vshrl.u32 %v11220_v31, %v8886_v24  ;;  %1331 = vrot.lane.b32.xlu1 %v998_v40, %s5923_s23  ;;  %v1000_v14 = vmul.f32 1024.0, %v8622_v42  ;;  %v3190_v28 = vsel %vm3188_vm9, %v8800_v57, 2102212464  ;;  %11438 = vst [vmem:[#allocation106_spill] sm:$0xff] %v8929_v7 }
 0x2c1   : > { %11436 = vst [vmem:[#allocation104_spill] sm:$0xff] %v8909_v34  ;;  %v3079_v59 = vshrl.u32 %v11301_v56, %v8886_v24  ;;  %1329 = vrot.lane.b32.xlu0 %v997_v32, %s5923_s23  ;;  %v999_v46 = vmul.f32 1024.0, %v8634_v41  ;;  %v8931_v17 = vadd.s32 %v2900_v60, %v2896_v29  ;;  %v8937_v19 = vshrl.u32 %v8815_v18, 5 }
 0x2c2   : > { %v3189_v40 = vsel %vm3185_vm7, %v3169_v58, %v8796_v22  ;;  %v3075_v57 = vshll.u32 %v11338_v20, %v3063_v61  ;;  %v3067_v56 = vshrl.u32 %v11340_v16, %v8886_v24  ;;  %v3070_v32 = vshrl.u32 %v11226_v10, %v8886_v24 }
 0x2c3   : > { %v3073_v36 = vshrl.u32 %v11338_v20, %v8886_v24  ;;  %v3078_v60 = vshll.u32 %v11220_v31, %v3063_v61  ;;  %v3191_v22 = vsel %vm3187_vm13, %v8798_v48, %v3190_v28  ;;  %v3066_v18 = vshll.u32 %v11221_v39, %v3063_v61  ;;  %v8963_v28 = vpop.permute.xlu1 %1183 }
 0x2c4   : > { %v3077_v29 = vor.u32 %v3076_v51, %v3075_v57  ;;  %1335 = vrot.lane.b32.xlu1 %v1000_v14, %s5923_s23  ;;  %v1002_v58 = vmul.f32 4096.0, %v8661_v5  ;;  %v3069_v43 = vshll.u32 %v11340_v16, %v3063_v61  ;;  %v3072_v11 = vshll.u32 %v11226_v10, %v3063_v61  ;;  %11440 = vst [vmem:[#allocation107_spill] sm:$0xff] %v8963_v28 }
 0x2c5   : > { %v3080_v7 = vor.u32 %v3079_v59, %v3078_v60  ;;  %1333 = vrot.lane.b32.xlu0 %v999_v46, %s5923_s23  ;;  %v1001_v31 = vmul.f32 4096.0, %v8673_v27  ;;  %v2902_v20 = vadd.s32 536870912, %v8931_v17  ;;  %vm3210_vm5 = vc.u32 %v8898_v25, %v8901_v54  ;;  %v8972_v59 = vpop.permute.xlu0 %1181 }
 0x2c6   : > { %v3211_v48 = vadd.s32 1, %v8902_v35  ;;  %v11439_v51 = vand.u32 2147483647, %v8612_v9  ;;  %v8965_v16 = vor.u32 %v3067_v56, %v3066_v18  ;;  %v8967_v10 = vor.u32 %v3070_v32, %v3069_v43  ;;  %11441 = vst [vmem:[#allocation108_spill] sm:$0xff] %v8972_v59  ;;  %v11460_v9 = vld [vmem:[#allocation70_spill] sm:$0xff] }
 0x2c7   : > { %v8969_v61 = vor.u32 %v3073_v36, %v3072_v11  ;;  %vm3084_vm12 = vcmp.lt.s32.totalorder %v8937_v19, 4  ;;  %v3008_v46 = vshll.u32 %v8909_v34, 30  ;;  %v3192_v57 = vsel %vm3186_vm11, %v3189_v40, %v3191_v22  ;;  %v11442_v36 = vld [vmem:[#allocation92_spill] sm:$0xff]  ;;  %v11443_v40 = vld [vmem:[#allocation61_spill] sm:$0xff] }
 0x2c8   : > { %v3056_v14 = vand.u32 8388607, %v11439_v51  ;;  %v3090_v60 = vsel %vm3084_vm12, %v3077_v29, 920167782  ;;  %1371 = vrot.lane.b32.xlu1 %v1002_v58, %s5924_s24  ;;  %v1004_v56 = vmul.f32 4096.0, %v8697_v53  ;;  %v2803_v43 = vsub.s32 0, %v8906_v13  ;;  %v9018_v51 = vpop.permute.xlu1 %1187 }
 0x2c9   : > { %v8983_v11 = vsub.s32 %v8580_v8, %v2696_v12  ;;  %v3094_v32 = vsel %vm3084_vm12, %v3080_v7, 1326507024  ;;  %1369 = vrot.lane.b32.xlu0 %v1001_v31, %s5924_s24  ;;  %v1003_v44 = vmul.f32 4096.0, %v11442_v36  ;;  %vm2417_vm8 = vcmp.eq.s32.totalorder %v11443_v40, 0  ;;  %11446 = vst [vmem:[#allocation61_spill] sm:$0xff] %v9018_v51  ;;  %v9027_v28 = vpop.permute.xlu0 %1185 }
 0x2ca   : > { %vm2420_vm9 = vcmp.eq.s32.totalorder %v11443_v40, 2  ;;  %v8991_v22 = vshrl.u32 %v2902_v20, 30  ;;  %v3212_v18 = vsel %vm3210_vm5, %v3211_v48, %v8902_v35  ;;  %vm3081_vm7 = vcmp.lt.s32.totalorder %v8937_v19, 1  ;;  %v11445_v20 = vld [vmem:[#allocation94_spill] sm:$0xff] }
 0x2cb   : > { %vm3083_vm13 = vcmp.lt.s32.totalorder %v8937_v19, 3  ;;  %v3208_v8 = vmul.u32 %v8884_v49, %v3192_v57  ;;  %v3057_v12 = vor.u32 8388608, %v3056_v14  ;;  %v3089_v7 = vsel %vm3081_vm7, %v8965_v16, %v8967_v10  ;;  %v11447_v14 = vld [vmem:[#allocation40_spill] sm:$0xff]  ;;  %v11448_v57 = vld [vmem:[#allocation39_spill] sm:$0xff]  ;;  %11450 = vst [vmem:[#allocation94_spill] sm:$0xff] %v9027_v28 }
 0x2cc   : > { %11444 = vst [vmem:[#allocation92_spill] sm:$0xff] %v8991_v22  ;;  %v3091_v58 = vsel %vm3083_vm13, %v8969_v61, %v3090_v60  ;;  %v9008_v31 = vsub.s32 %v8824_v26, %v3008_v46  ;;  %v3093_v35 = vsel %vm3081_vm7, %v8967_v10, %v8969_v61  ;;  %v3095_v49 = vsel %vm3083_vm13, %v3077_v29, %v3094_v32  ;;  %v11449_v26 = vld [vmem:[#allocation95_spill] sm:$0xff]  ;;  %v11451_v29 = vld [vmem:[#allocation84_spill] sm:$0xff] }
 0x2cd   : > { %1375 = vrot.lane.b32.xlu1 %v1004_v56, %s5924_s24  ;;  %v1006_v48 = vmul.f32 4096.0, %v11445_v20  ;;  %v2585_v60 = vadd.s32 %v11448_v57, %v11447_v14  ;;  %v9022_v59 = vadd.s32 %v3212_v18, %v3208_v8  ;;  %vm3082_vm11 = vcmp.lt.s32.totalorder %v8937_v19, 2  ;;  %1373 = vrot.lane.b32.xlu0 %v1003_v44, %s5924_s24  ;;  %v11452_v32 = vld [vmem:[#allocation76_spill] sm:$0xff]  ;;  %v9086_v62 = vpop.permute.xlu0 %1189 }
 0x2ce   : > { %v1005_v46 = vmul.f32 4096.0, %v11449_v26  ;;  %v2305_v51 = vsel %vm8212_vm4, %v11453_v1, %v11452_v32  ;;  %v2904_v18 = vshll.u32 %v8991_v22, 30  ;;  %v3092_v8 = vsel %vm3082_vm11, %v3089_v7, %v3091_v58  ;;  %v9050_v7 = vld [vmem:[%s6317_s28 + $0x38] sm:$0xff]  ;;  %11462 = vst [vmem:[#allocation95_spill] sm:$0xff] %v9086_v62 }
 0x2cf   : > { %v11455_v14 = vsub.s32 4294967266, %v8852_v21  ;;  %v2699_v57 = vsub.s32 0, %v8983_v11  ;;  %v3096_v28 = vsel %vm3082_vm11, %v3093_v35, %v3095_v49  ;;  %v9042_v56 = vshll.u32 %v3057_v12, 8 }
 0x2d0   : > { %v11456_v15 = vclz %v8857_v6  ;;  %v5595_v32 = vmin.u32 %v2803_v43, %v8906_v13  ;;  %v3011_v3 = vsub.s32 0, %v9008_v31  ;;  %v1008_v58 = vmul.f32 4096.0, %v9050_v7  ;;  %v9061_v6 = vld [vmem:[%s6317_s28 + $0x30] sm:$0xff] }
 0x2d1   : > { %v2606_v44 = vadd.s32 127, %v11455_v14  ;;  %1379 = vrot.lane.b32.xlu1 %v1006_v48, %s5924_s24  ;;  %v3214_v14 = vadd.s32 536870912, %v9022_v59  ;;  %v9055_v30 = vmul.u32.u64.low %v9042_v56, %v3092_v8  ;;  %v9056_v35 = vmul.u32.u64.high %v9042_v56, %v3092_v8, %v9055_v30  ;;  %1377 = vrot.lane.b32.xlu0 %v1005_v46, %s5924_s24  ;;  %v9073_v8 = vpop.permute.xlu1 %1191 }
 0x2d2   : > { %v5584_v50 = vadd.s32 4294967294, %v11456_v15  ;;  %v1007_v15 = vmul.f32 4096.0, %v9061_v6  ;;  %vm2416_vm4 = vcmp.lt.s32.totalorder %v11443_v40, 2  ;;  %v2601_v43 = vsub.s32 32, %v8852_v21  ;;  %11458 = vst [vmem:[#allocation39_spill] sm:$0xff] %v9073_v8 }
 0x2d3   : > { %11457 = vst [vmem:[#allocation40_spill] sm:$0xff] %v9055_v30  ;;  %v9067_v12 = vsub.s32 %v8931_v17, %v2904_v18  ;;  %v9070_v49 = vmul.u32.u64.low %v9042_v56, %v3096_v28  ;;  %v9071_v48 = vmul.u32.u64.high %v9042_v56, %v3096_v28, %v9070_v49  ;;  %v11459_v46 = vxor.u32 2147483648, %v11451_v29 }
 0x2d4   : > { %v11461_v22 = vxor.u32 2147483648, %v11460_v9  ;;  %v2607_v17 = vshll.u32 %v2606_v44, 23  ;;  %v5591_v18 = vmin.u32 %v2699_v57, %v8983_v11  ;;  %5794 = vcosq.f32 %v2305_v51  ;;  %v9090_v49 = vld [vmem:[%s6317_s28 + $0x48] sm:$0xff] }
 0x2d5   : > { %v2419_v37 = vsel %vm2417_vm8, %v11460_v9, %v11459_v46  ;;  %vm5585_vm10 = vcmp.lt.s32.totalorder %v5584_v50, 0  ;;  %v2805_v28 = vclz %v5595_v32  ;;  %1383 = vrot.lane.b32.xlu1 %v1008_v58, %s5924_s24  ;;  %v1010_v46 = vmul.f32 4096.0, %v9090_v49  ;;  %1381 = vrot.lane.b32.xlu0 %v1007_v15, %s5924_s24  ;;  %v11464_v57 = vld [vmem:[#allocation3_spill] sm:$0xff] }
 0x2d6   : > { %v2422_v34 = vsel %vm2420_vm9, %v11461_v22, %v11451_v29  ;;  %v5603_v8 = vmin.u32 %v3011_v3, %v9008_v31  ;;  %v9094_v9 = vshrl.u32 %v3214_v14, 30  ;;  %v3086_v22 = vsel %vm3084_vm12, %v8969_v61, 2102212464  ;;  %v11465_v3 = vld [vmem:[#allocation19_spill] sm:$0xff]  ;;  %v11466_v14 = vld [vmem:[#allocation60_spill] sm:$0xff] }
 0x2d7   : > { %v1009_v44 = vmul.f32 4096.0, %v8302_v52  ;;  %vm11120_vm5 = vweird.f32 %v11464_v57  ;;  %5796 = vsinq.f32 %v2305_v51  ;;  %v2603_v32 = vshrl.u32 %v2585_v60, %v2601_v43 }
 0x2d8   : > { %11463 = vst [vmem:[#allocation76_spill] sm:$0xff] %v9094_v9  ;;  %v2907_v58 = vsub.s32 0, %v9067_v12  ;;  %v3065_v29 = vshrl.u32 %v11221_v39, %v8886_v24  ;;  %vm2531_vm8 = vcmp.lt.s32.totalorder %v11465_v3, 0  ;;  %v2602_v62 = vshll.u32 %v11466_v14, %v8852_v21  ;;  %v9119_v24 = vpop.permute.xlu1 %1195 }
 0x2d9   : > { %v2608_v54 = vor.u32 4788187, %v2607_v17  ;;  %v9109_v61 = vsel %vm5585_vm10, 0, %v5584_v50  ;;  %v2701_v15 = vclz %v5591_v18  ;;  %v5596_v52 = vadd.s32 4294967294, %v2805_v28  ;;  %1387 = vrot.lane.b32.xlu1 %v1010_v46, %s5924_s24  ;;  %11467 = vst [vmem:[#allocation4_spill] sm:$0xff] %v9119_v24  ;;  %1385 = vrot.lane.b32.xlu0 %v1009_v44, %s5924_s24 }
 0x2da   : > { %v3085_v51 = vsel %vm3081_vm7, %v3065_v29, %v8965_v16  ;;  %v3087_v60 = vsel %vm3083_vm13, %v8967_v10, %v3086_v22  ;;  %v1012_v39 = vmul.f32 4096.0, %v8557_v38  ;;  %v3013_v21 = vclz %v5603_v8  ;;  %v9125_v16 = vpop.permute.xlu0 %1193  ;;  %v11472_v22 = vld [vmem:[#allocation12_spill] sm:$0xff] }
 0x2db   : > { %v3216_v50 = vshll.u32 %v9094_v9, 30  ;;  %v3107_v43 = vadd.s32 1, %v9056_v35  ;;  %v1011_v17 = vmul.f32 4096.0, %v8565_v2  ;;  %11468 = vst [vmem:[#allocation60_spill] sm:$0xff] %v9125_v16  ;;  %v11469_v29 = vand.u32 2147483647, %v11465_v3 }
 0x2dc   : > { %v2604_v18 = vor.u32 %v2603_v32, %v2602_v62  ;;  %v2501_v28 = vsub.s32 4294967266, %v9109_v61  ;;  %v5599_v8 = vmin.u32 %v2907_v58, %v9067_v12  ;;  %vm3106_vm9 = vc.u32 %v9071_v48, %v9055_v30 }
 0x2dd   : > { %vm9129_vm12 = vcmp.le.f32.partialorder %v11469_v29, 0.7853982  ;;  %v2423_v46 = vsel %vm2416_vm4, %v2419_v37, %v2422_v34  ;;  %v2615_v44 = vsub.s32 4, %v11472_v22  ;;  %v5592_v14 = vadd.s32 4294967294, %v2701_v15  ;;  %1391 = vrot.lane.b32.xlu1 %v1012_v39, %s5924_s24  ;;  %1389 = vrot.lane.b32.xlu0 %v1011_v17, %s5924_s24  ;;  %v9155_v39 = vpop.permute.xlu1 %1199 }
 0x2de   : > { %v3088_v29 = vsel %vm3082_vm11, %v3085_v51, %v3087_v60  ;;  %v2609_v16 = vand.u32 2147483647, %v2608_v54  ;;  %v2497_v24 = vsub.s32 32, %v9109_v61  ;;  %vm5597_vm7 = vcmp.lt.s32.totalorder %v5596_v52, 0  ;;  %v9151_v19 = vpop.eup %5794  ;;  %v11474_v54 = vld [vmem:[#allocation77_spill] sm:$0xff]  ;;  %v9167_v17 = vpop.permute.xlu0 %1197 }
 0x2df   : > { %v1014_v62 = vmul.f32 4096.0, %v8586_v63  ;;  %v5604_v32 = vadd.s32 4294967294, %v3013_v21  ;;  %v9146_v58 = vsub.s32 %v9022_v59, %v3216_v50  ;;  %v3108_v37 = vsel %vm3106_vm9, %v3107_v43, %v9056_v35  ;;  %11473 = vst [vmem:[#allocation12_spill] sm:$0xff] %v9151_v19  ;;  %11475 = vst [vmem:[#allocation77_spill] sm:$0xff] %v9155_v39  ;;  %v11477_v35 = vld [vmem:[#allocation59_spill] sm:$0xff]  ;;  %v11478_v21 = vld [vmem:[#allocation56_spill] sm:$0xff] }
 0x2e0   : > { %v1013_v34 = vmul.f32 4096.0, %v8590_v55  ;;  %vm2316_vm13 = vcmp.eq.s32.totalorder %v11474_v54, 2  ;;  %v2611_v40 = vcvt.s32.f32 %v2604_v18  ;;  %v2502_v15 = vadd.s32 127, %v2501_v28  ;;  %11479 = vst [vmem:[#allocation59_spill] sm:$0xff] %v9167_v17 }
 0x2e1   : > { %v2909_v51 = vclz %v5599_v8  ;;  %v3104_v60 = vmul.u32 %v9042_v56, %v3088_v29  ;;  %v9159_v59 = vsel %vm11120_vm5, nan, %v2423_v46  ;;  %vm2313_vm11 = vcmp.eq.s32.totalorder %v11474_v54, 0  ;;  %v9169_v18 = vpop.eup %5796  ;;  %1395 = vrot.lane.b32.xlu1 %v1014_v62, %s5924_s24 }
 0x2e2   : > { %11476 = vst [vmem:[#allocation109_spill] sm:$0xff] %v9159_v59  ;;  %v2481_v50 = vadd.s32 %v11478_v21, %v11477_v35  ;;  %v9165_v43 = vsel %vm5597_vm7, 0, %v5596_v52  ;;  %vm5593_vm4 = vcmp.lt.s32.totalorder %v5592_v14, 0  ;;  %11480 = vst [vmem:[#allocation56_spill] sm:$0xff] %v9169_v18  ;;  %v2612_v56 = vmul.f32 %v2611_v40, %v2609_v16  ;;  %1393 = vrot.lane.b32.xlu0 %v1013_v34, %s5924_s24 }
 0x2e3   : > { %v2616_v28 = vsel %vm2531_vm8, %v2615_v44, %v11472_v22  ;;  %v9174_v8 = vadd.s32 %v3108_v37, %v3104_v60  ;;  %v1016_v46 = vmul.f32 4096.0, %v8622_v42  ;;  %vm5605_vm10 = vcmp.lt.s32.totalorder %v5604_v32, 0  ;;  %v9200_v60 = vpop.permute.xlu1 %1203 }
 0x2e4   : > { %v2499_v29 = vshrl.u32 %v2481_v50, %v2497_v24  ;;  %v3219_v52 = vsub.s32 0, %v9146_v58  ;;  %v1015_v35 = vmul.f32 4096.0, %v8634_v41  ;;  %v2503_v21 = vshll.u32 %v2502_v15, 23  ;;  %11482 = vst [vmem:[#allocation111_spill] sm:$0xff] %v9200_v60 }
 0x2e5   : > { %v2813_v16 = vsub.s32 4294967266, %v9165_v43  ;;  %v9182_v40 = vsel %vm5593_vm4, 0, %v5592_v14  ;;  %v5600_v22 = vadd.s32 4294967294, %v2909_v51  ;;  %v9185_v44 = vmul.f32 2.0, %v9159_v59  ;;  %1399 = vrot.lane.b32.xlu1 %v1016_v46, %s5924_s24 }
 0x2e6   : > { %v9191_v37 = vsel %vm9129_vm12, 0, %v2616_v28  ;;  %v2498_v34 = vshll.u32 %v8569_v0, %v9109_v61  ;;  %v9195_v15 = vsel %vm5605_vm10, 0, %v5604_v32  ;;  %v3110_v14 = vadd.s32 536870912, %v9174_v8  ;;  %1397 = vrot.lane.b32.xlu0 %v1015_v35, %s5924_s24  ;;  %v9207_v61 = vpop.permute.xlu0 %1201 }
 0x2e7   : > { %11481 = vst [vmem:[#allocation110_spill] sm:$0xff] %v9191_v37  ;;  %v1018_v51 = vmul.f32 16384.0, %v8661_v5  ;;  %vm2312_vm9 = vcmp.lt.s32.totalorder %v11474_v54, 2  ;;  %v2613_v50 = vxor.u32 2147483648, %v2612_v56  ;;  %v2709_v62 = vsub.s32 4294967266, %v9182_v40  ;;  %11483 = vst [vmem:[#allocation112_spill] sm:$0xff] %v9207_v61 }
 0x2e8   : > { %v5611_v28 = vmin.u32 %v3219_v52, %v9146_v58  ;;  %v1017_v0 = vmul.f32 16384.0, %v8673_v27  ;;  %v2500_v32 = vor.u32 %v2499_v29, %v2498_v34  ;;  %v2504_v24 = vor.u32 4788187, %v2503_v21  ;;  %v11486_v21 = vld [vmem:[#allocation74_spill] sm:$0xff] }
 0x2e9   : > { %v2814_v46 = vadd.s32 127, %v2813_v16  ;;  %vm5601_vm7 = vcmp.lt.s32.totalorder %v5600_v22, 0  ;;  %v11484_v5 = vxor.u32 2147483648, %v9151_v19  ;;  %v9215_v60 = vadd.s32 3, %v9191_v37  ;;  %v11487_v16 = vld [vmem:[#allocation72_spill] sm:$0xff]  ;;  %1435 = vrot.lane.b32.xlu1 %v1018_v51, %s5925_s25 }
 0x2ea   : > { %v2809_v52 = vsub.s32 32, %v9165_v43  ;;  %v3021_v35 = vsub.s32 4294967266, %v9195_v15  ;;  %v11485_v27 = vxor.u32 2147483648, %v9169_v18  ;;  %v2793_v34 = vadd.s32 %v11487_v16, %v11486_v21  ;;  %1433 = vrot.lane.b32.xlu0 %v1017_v0, %s5925_s25  ;;  %v11488_v0 = vld [vmem:[#allocation81_spill] sm:$0xff]  ;;  %v11489_v16 = vld [vmem:[#allocation80_spill] sm:$0xff] }
 0x2eb   : > { %v2318_v57 = vsel %vm2316_vm13, %v11484_v5, %v9169_v18  ;;  %v9226_v61 = vshrl.u32 %v3110_v14, 30  ;;  %v1020_v5 = vmul.f32 16384.0, %v8697_v53  ;;  %v2710_v17 = vadd.s32 127, %v2709_v62  ;;  %v9236_v14 = vpop.permute.xlu1 %1207 }
 0x2ec   : > { %v2315_v29 = vsel %vm2313_vm11, %v9151_v19, %v11485_v27  ;;  %v9230_v39 = vsel %vm5601_vm7, 0, %v5600_v22  ;;  %v3221_v37 = vclz %v5611_v28  ;;  %v1019_v18 = vmul.f32 16384.0, %v11442_v36  ;;  %v9241_v28 = vpop.permute.xlu0 %1205 }
 0x2ed   : > { %v2614_v27 = vsel %vm2531_vm8, %v2613_v50, %v2612_v56  ;;  %v2505_v19 = vand.u32 2147483647, %v2504_v24  ;;  %v2507_v9 = vcvt.s32.f32 %v2500_v32  ;;  %v2815_v21 = vshll.u32 %v2814_v46, 23  ;;  %1439 = vrot.lane.b32.xlu1 %v1020_v5, %s5925_s25  ;;  %v11490_v50 = vld [vmem:[#allocation25_spill] sm:$0xff] }
 0x2ee   : > { %v2810_v51 = vshll.u32 %v8906_v13, %v9165_v43  ;;  %v2811_v53 = vshrl.u32 %v2793_v34, %v2809_v52  ;;  %v2705_v22 = vsub.s32 32, %v9182_v40  ;;  %v3022_v62 = vadd.s32 127, %v3021_v35  ;;  %1437 = vrot.lane.b32.xlu0 %v1019_v18, %s5925_s25 }
 0x2ef   : > { %v2689_v36 = vadd.s32 %v11489_v16, %v11488_v0  ;;  %v2917_v30 = vsub.s32 4294967266, %v9230_v39  ;;  %v3112_v56 = vshll.u32 %v9226_v61, 30  ;;  %v1022_v24 = vmul.f32 16384.0, %v11445_v20  ;;  %v9267_v10 = vpop.permute.xlu1 %1243 }
 0x2f0   : > { %vm2427_vm8 = vcmp.lt.s32.totalorder %v11490_v50, 0  ;;  %v2711_v13 = vshll.u32 %v2710_v17, 23  ;;  %v3017_v43 = vsub.s32 32, %v9195_v15  ;;  %v5612_v32 = vadd.s32 4294967294, %v3221_v37 }
 0x2f1   : > { %v1021_v46 = vmul.f32 16384.0, %v11449_v26  ;;  %v2319_v52 = vsel %vm2312_vm9, %v2315_v29, %v2318_v57  ;;  %v2617_v35 = vsel %vm9129_vm12, %v11465_v3, %v2614_v27  ;;  %v2508_v34 = vmul.f32 %v2507_v9, %v2505_v19  ;;  %1443 = vrot.lane.b32.xlu1 %v1022_v24, %s5925_s25  ;;  %v9278_v19 = vpop.permute.xlu0 %1241 }
 0x2f2   : > { %v2816_v5 = vor.u32 4788187, %v2815_v21  ;;  %v2812_v20 = vor.u32 %v2811_v53, %v2810_v51  ;;  %v2707_v0 = vshrl.u32 %v2689_v36, %v2705_v22  ;;  %v3001_v17 = vadd.s32 %v8628_v33, %v8607_v4 }
 0x2f3   : > { %v3023_v16 = vshll.u32 %v3022_v62, 23  ;;  %v2706_v18 = vshll.u32 %v8983_v11, %v9182_v40  ;;  %v2918_v37 = vadd.s32 127, %v2917_v30  ;;  %v9263_v26 = vsub.s32 %v9174_v8, %v3112_v56  ;;  %1441 = vrot.lane.b32.xlu0 %v1021_v46, %s5925_s25 }
 0x2f4   : > { %v1024_v57 = vmul.f32 16384.0, %v9050_v7  ;;  %vm11119_vm12 = vweird.f32 %v11453_v1  ;;  %v11491_v9 = vand.u32 2147483647, %v11490_v50  ;;  %v2712_v33 = vor.u32 4788187, %v2711_v13 }
 0x2f5   : > { %v3019_v11 = vshrl.u32 %v3001_v17, %v3017_v43  ;;  %vm5613_vm11 = vcmp.lt.s32.totalorder %v5612_v32, 0  ;;  %v1023_v30 = vmul.f32 16384.0, %v9061_v6  ;;  %5798 = vcosq.f32 %v2617_v35  ;;  %v9292_v43 = vld [vmem:[%s6317_s28 + $0x40] sm:$0xff] }
 0x2f6   : > { %vm9272_vm13 = vcmp.le.f32.partialorder %v11491_v9, 0.7853982  ;;  %v2509_v54 = vxor.u32 2147483648, %v2508_v34  ;;  %v2817_v8 = vand.u32 2147483647, %v2816_v5  ;;  %v2913_v40 = vsub.s32 32, %v9230_v39  ;;  %1447 = vrot.lane.b32.xlu1 %v1024_v57, %s5925_s25  ;;  %v9299_v5 = vpop.permute.xlu1 %1247 }
 0x2f7   : > { %v2708_v29 = vor.u32 %v2707_v0, %v2706_v18  ;;  %v3018_v27 = vshll.u32 %v9008_v31, %v9195_v15  ;;  %v3024_v21 = vor.u32 4788187, %v3023_v16  ;;  %v2897_v51 = vadd.s32 %v8790_v45, %v8804_v23  ;;  %1445 = vrot.lane.b32.xlu0 %v1023_v30, %s5925_s25  ;;  %v11494_v23 = vld [vmem:[#allocation79_spill] sm:$0xff]  ;;  %v9302_v18 = vpop.permute.xlu0 %1245 }
 0x2f8   : > { %v2919_v53 = vshll.u32 %v2918_v37, 23  ;;  %v9285_v22 = vsel %vm5613_vm11, 0, %v5612_v32  ;;  %v3115_v62 = vsub.s32 0, %v9263_v26  ;;  %v1026_v36 = vmul.f32 16384.0, %v9090_v49  ;;  %v11495_v32 = vld [vmem:[#allocation42_spill] sm:$0xff] }
 0x2f9   : > { %v2819_v56 = vcvt.s32.f32 %v2812_v20  ;;  %v2713_v24 = vand.u32 2147483647, %v2712_v33  ;;  %v3020_v13 = vor.u32 %v3019_v11, %v3018_v27  ;;  %v1025_v31 = vmul.f32 16384.0, %v9292_v43 }
 0x2fa   : > { %5800 = vsinq.f32 %v2617_v35  ;;  %v2510_v45 = vsel %vm2427_vm8, %v2509_v54, %v2508_v34  ;;  %v2511_v15 = vsub.s32 4, %v11494_v23  ;;  %vm2739_vm4 = vcmp.lt.s32.totalorder %v11495_v32, 0  ;;  %1451 = vrot.lane.b32.xlu1 %v1026_v36, %s5925_s25 }
 0x2fb   : > { %v2915_v46 = vshrl.u32 %v2897_v51, %v2913_v40  ;;  %v2820_v20 = vmul.f32 %v2819_v56, %v2817_v8  ;;  %v2715_v0 = vcvt.s32.f32 %v2708_v29  ;;  %v3025_v17 = vand.u32 2147483647, %v3024_v21  ;;  %1449 = vrot.lane.b32.xlu0 %v1025_v31, %s5925_s25  ;;  %v11500_v51 = vld [vmem:[#allocation48_spill] sm:$0xff]  ;;  %v9340_v56 = vpop.permute.xlu1 %1251 }
 0x2fc   : > { %v3229_v16 = vsub.s32 4294967266, %v9285_v22  ;;  %v2914_v35 = vshll.u32 %v9067_v12, %v9230_v39  ;;  %v2920_v37 = vor.u32 4788187, %v2919_v53  ;;  %v5607_v34 = vmin.u32 %v3115_v62, %v9263_v26 }
 0x2fd   : > { %v1028_v57 = vmul.f32 16384.0, %v8557_v38  ;;  %v11496_v9 = vand.u32 2147483647, %v11495_v32  ;;  %v2716_v11 = vmul.f32 %v2715_v0, %v2713_v24  ;;  %v3027_v30 = vcvt.s32.f32 %v3020_v13 }
 0x2fe   : > { %v1027_v54 = vmul.f32 16384.0, %v8565_v2  ;;  %v9319_v12 = vsel %vm11119_vm12, nan, %v2319_v52  ;;  %v9322_v39 = vand.u32 3, %v9215_v60  ;;  %v2513_v38 = vsel %vm9272_vm13, %v11490_v50, %v2510_v45  ;;  %v9345_v45 = vpop.permute.xlu0 %1249 }
 0x2ff   : > { %vm9311_vm10 = vcmp.le.f32.partialorder %v11496_v9, 0.7853982  ;;  %11499 = vst [vmem:[#allocation74_spill] sm:$0xff] %v9319_v12  ;;  %v2916_v8 = vor.u32 %v2915_v46, %v2914_v35  ;;  %v2512_v40 = vsel %vm2427_vm8, %v2511_v15, %v11494_v23  ;;  %v2821_v29 = vxor.u32 2147483648, %v2820_v20  ;;  %v9330_v2 = vpop.eup %5798  ;;  %1455 = vrot.lane.b32.xlu1 %v1028_v57, %s5925_s25 }
 0x300   : > { %v3028_v27 = vmul.f32 %v3027_v30, %v3025_v17  ;;  %v3230_v21 = vadd.s32 127, %v3229_v16  ;;  %v11501_v52 = vand.u32 2147483647, %v11500_v51  ;;  %v2921_v60 = vand.u32 2147483647, %v2920_v37  ;;  %1453 = vrot.lane.b32.xlu0 %v1027_v54, %s5925_s25  ;;  %v11504_v17 = vld [vmem:[#allocation103_spill] sm:$0xff] }
 0x301   : > { %v3117_v62 = vclz %v5607_v34  ;;  %v1030_v36 = vmul.f32 16384.0, %v8586_v63  ;;  %5802 = vcosq.f32 %v2513_v38  ;;  %v2717_v24 = vxor.u32 2147483648, %v2716_v11 }
 0x302   : > { %vm9334_vm9 = vcmp.le.f32.partialorder %v11501_v52, 0.7853982  ;;  %v3225_v13 = vsub.s32 32, %v9285_v22  ;;  %v1029_v31 = vmul.f32 16384.0, %v8590_v55  ;;  %v9349_v23 = vsel %vm9272_vm13, 0, %v2512_v40  ;;  %v9376_v40 = vpop.permute.xlu1 %1255 }
 0x303   : > { %5804 = vsinq.f32 %v2513_v38  ;;  %v2823_v15 = vsub.s32 4, %v8677_v47  ;;  %v2923_v63 = vcvt.s32.f32 %v2916_v8  ;;  %vm2628_vm7 = vcmp.eq.s32.totalorder %v9322_v39, 2  ;;  %1459 = vrot.lane.b32.xlu1 %v1030_v36, %s5925_s25  ;;  %v11505_v38 = vld [vmem:[#allocation100_spill] sm:$0xff]  ;;  %v11506_v8 = vld [vmem:[#allocation6_spill] sm:$0xff] }
 0x304   : > { %v2822_v46 = vsel %vm2739_vm4, %v2821_v29, %v2820_v20  ;;  %v3029_v0 = vxor.u32 2147483648, %v3028_v27  ;;  %v3209_v16 = vadd.s32 %v11504_v17, %v8898_v25  ;;  %v3231_v55 = vshll.u32 %v3230_v21, 23  ;;  %v9357_v35 = vpop.eup %5800  ;;  %1457 = vrot.lane.b32.xlu0 %v1029_v31, %s5925_s25 }
 0x305   : > { %vm2625_vm8 = vcmp.eq.s32.totalorder %v9322_v39, 0  ;;  %vm2635_vm13 = vcmp.lt.s32.totalorder %v11500_v51, 0  ;;  %v2924_v4 = vmul.f32 %v2923_v63, %v2921_v60  ;;  %v5608_v37 = vadd.s32 4294967294, %v3117_v62 }
 0x306   : > { %v1032_v34 = vmul.f32 16384.0, %v8622_v42  ;;  %v2518_v57 = vadd.s32 3, %v9349_v23  ;;  %v2718_v20 = vsel %vm2635_vm13, %v2717_v24, %v2716_v11  ;;  %v3227_v9 = vshrl.u32 %v3209_v16, %v3225_v13  ;;  %v11510_v13 = vld [vmem:[#allocation9_spill] sm:$0xff] }
 0x307   : > { %v1031_v25 = vmul.f32 16384.0, %v8634_v41  ;;  %v2824_v30 = vsel %vm2739_vm4, %v2823_v15, %v8677_v47  ;;  %v2825_v54 = vsel %vm9311_vm10, %v11495_v32, %v2822_v46  ;;  %v2719_v42 = vsub.s32 4, %v11505_v38  ;;  %v9383_v47 = vpop.permute.xlu0 %1253  ;;  %v11512_v15 = vld [vmem:[#allocation104_spill] sm:$0xff] }
 0x308   : > { %vm2947_vm11 = vcmp.lt.s32.totalorder %v11506_v8, 0  ;;  %v11113_v11 = vxor.u32 2147483648, %v9330_v2  ;;  %v3226_v41 = vshll.u32 %v9146_v58, %v9285_v22  ;;  %v3232_v21 = vor.u32 4788187, %v3231_v55  ;;  %1463 = vrot.lane.b32.xlu1 %v1032_v34, %s5925_s25 }
 0x309   : > { %v3030_v29 = vsel %vm2947_vm11, %v3029_v0, %v3028_v27  ;;  %v11115_v52 = vxor.u32 2147483648, %v9357_v35  ;;  %v2721_v60 = vsel %vm9334_vm9, %v11500_v51, %v2718_v20  ;;  %v2925_v62 = vxor.u32 2147483648, %v2924_v4  ;;  %1461 = vrot.lane.b32.xlu0 %v1031_v25, %s5925_s25  ;;  %v9424_v20 = vpop.permute.xlu1 %1259 }
 0x30a   : > { %vm5609_vm4 = vcmp.lt.s32.totalorder %v5608_v37, 0  ;;  %v9392_v36 = vsel %vm9311_vm10, 0, %v2824_v30  ;;  %5806 = vcosq.f32 %v2825_v54  ;;  %v11507_v58 = vand.u32 2147483647, %v11506_v8 }
 0x30b   : > { %v3228_v27 = vor.u32 %v3227_v9, %v3226_v41  ;;  %5808 = vsinq.f32 %v2825_v54  ;;  %v2720_v24 = vsel %vm2635_vm13, %v2719_v42, %v11505_v38  ;;  %vm2843_vm10 = vcmp.lt.s32.totalorder %v11510_v13, 0  ;;  %v9408_v31 = vpop.eup %5802  ;;  %v9432_v30 = vpop.permute.xlu0 %1257 }
 0x30c   : > { %vm9396_vm6 = vcmp.le.f32.partialorder %v11507_v58, 0.7853982  ;;  %11511 = vst [vmem:[#allocation72_spill] sm:$0xff] %v9408_v31  ;;  %5810 = vcosq.f32 %v2721_v60  ;;  %v3031_v63 = vsub.s32 4, %v11512_v15  ;;  %v3233_v46 = vand.u32 2147483647, %v3232_v21 }
 0x30d   : > { %v3033_v33 = vsel %vm9396_vm6, %v11506_v8, %v3030_v29  ;;  %v9411_v0 = vsel %vm5609_vm4, 0, %v5608_v37  ;;  %v9413_v17 = vpop.eup %5804  ;;  %v4991_v16 = vmul.f32 2.0, %v9319_v12  ;;  %vm11118_vm13 = vweird.f32 %v11465_v3  ;;  %11513 = vst [vmem:[#allocation81_spill] sm:$0xff] %v9432_v30 }
 0x30e   : > { %v2630_v55 = vsel %vm2628_vm7, %v11113_v11, %v9357_v35  ;;  %5812 = vsinq.f32 %v2721_v60  ;;  %v2926_v34 = vsel %vm2843_vm10, %v2925_v62, %v2924_v4  ;;  %v2627_v37 = vsel %vm2625_vm8, %v9330_v2, %v11115_v52  ;;  %v11526_v52 = vld [vmem:[#allocation40_spill] sm:$0xff] }
 0x30f   : > { %v2830_v9 = vadd.s32 3, %v9392_v36  ;;  %5814 = vcosq.f32 %v3033_v33  ;;  %v3235_v25 = vcvt.s32.f32 %v3228_v27  ;;  %v9436_v54 = vsel %vm9334_vm9, 0, %v2720_v24 }
 0x310   : > { %5816 = vsinq.f32 %v3033_v33  ;;  %v11514_v4 = vand.u32 2147483647, %v11510_v13  ;;  %v3125_v42 = vsub.s32 4294967266, %v9411_v0  ;;  %v2519_v29 = vand.u32 3, %v2518_v57  ;;  %v11519_v33 = vld [vmem:[#allocation92_spill] sm:$0xff] }
 0x311   : > { %v3032_v41 = vsel %vm2947_vm11, %v3031_v63, %v11512_v15  ;;  %v3236_v21 = vmul.f32 %v3235_v25, %v3233_v46  ;;  %v9453_v60 = vmul.f32 %v9185_v44, %v9159_v59  ;;  %vm2624_vm9 = vcmp.lt.s32.totalorder %v9322_v39, 2  ;;  %v9469_v46 = vpop.permute.xlu1 %1263 }
 0x312   : > { %vm9440_vm7 = vcmp.le.f32.partialorder %v11514_v4, 0.7853982  ;;  %v11112_v62 = vxor.u32 2147483648, %v9413_v17  ;;  %v11114_v58 = vxor.u32 2147483648, %v9408_v31  ;;  %v9459_v57 = vmul.f32 %v4991_v16, %v9319_v12  ;;  %11520 = vst [vmem:[#allocation79_spill] sm:$0xff] %v9469_v46 }
 0x313   : > { %v2929_v53 = vsel %vm9440_vm7, %v11510_v13, %v2926_v34  ;;  %11517 = vst [vmem:[#allocation80_spill] sm:$0xff] %v9453_v60  ;;  %v2631_v27 = vsel %vm2624_vm9, %v2627_v37, %v2630_v55  ;;  %v2726_v24 = vadd.s32 3, %v9436_v54  ;;  %v2927_v15 = vsub.s32 4, %v11519_v33  ;;  %v9473_v55 = vpop.permute.xlu0 %1261 }
 0x314   : > { %11518 = vst [vmem:[#allocation25_spill] sm:$0xff] %v9459_v57  ;;  %v9463_v63 = vand.u32 3, %v2830_v9  ;;  %v9467_v44 = vsel %vm9396_vm6, 0, %v3032_v41  ;;  %5818 = vcosq.f32 %v2929_v53  ;;  %v3126_v39 = vadd.s32 127, %v3125_v42  ;;  %v9471_v34 = vpop.eup %5806  ;;  %11522 = vst [vmem:[#allocation103_spill] sm:$0xff] %v9473_v55 }
 0x315   : > { %11521 = vst [vmem:[#allocation42_spill] sm:$0xff] %v9471_v34  ;;  %vm2521_vm8 = vcmp.eq.s32.totalorder %v2519_v29, 0  ;;  %vm2524_vm11 = vcmp.eq.s32.totalorder %v2519_v29, 2  ;;  %5820 = vsinq.f32 %v2929_v53  ;;  %v3237_v16 = vxor.u32 2147483648, %v3236_v21  ;;  %v9475_v37 = vpop.eup %5808 }
 0x316   : > { %11523 = vst [vmem:[#allocation100_spill] sm:$0xff] %v9475_v37  ;;  %vm2520_vm4 = vcmp.lt.s32.totalorder %v2519_v29, 2  ;;  %v2523_v22 = vsel %vm2521_vm8, %v9408_v31, %v11112_v62  ;;  %v2526_v9 = vsel %vm2524_vm11, %v11114_v58, %v9413_v17  ;;  %v3121_v25 = vsub.s32 32, %v9411_v0  ;;  %v9484_v4 = vpop.eup %5810  ;;  %v11525_v58 = vld [vmem:[#allocation10_spill] sm:$0xff] }
 0x317   : > { %v9488_v42 = vsel %vm11118_vm13, nan, %v2631_v27  ;;  %v9490_v41 = vand.u32 3, %v2726_v24  ;;  %v3038_v53 = vadd.s32 3, %v9467_v44  ;;  %v2928_v62 = vsel %vm2843_vm10, %v2927_v15, %v11519_v33  ;;  %v9502_v27 = vpop.permute.xlu1 %1267  ;;  %v9511_v15 = vpop.permute.xlu0 %1265 }
 0x318   : > { %11524 = vst [vmem:[#allocation104_spill] sm:$0xff] %v9488_v42  ;;  %v9496_v11 = vpop.eup %5812  ;;  %vm2832_vm6 = vcmp.lt.s32.totalorder %v9463_v63, 2  ;;  %vm3155_vm9 = vcmp.lt.s32.totalorder %v11525_v58, 0  ;;  %v3105_v12 = vadd.s32 %v11526_v52, %v9071_v48  ;;  %v3127_v59 = vshll.u32 %v3126_v39, 23  ;;  %11527 = vst [vmem:[#allocation92_spill] sm:$0xff] %v9502_v27 }
 0x319   : > { %v9504_v24 = vpop.eup %5814  ;;  %v2527_v55 = vsel %vm2520_vm4, %v2523_v22, %v2526_v9  ;;  %vm2833_vm8 = vcmp.eq.s32.totalorder %v9463_v63, 0  ;;  %vm2836_vm10 = vcmp.eq.s32.totalorder %v9463_v63, 2  ;;  %v3238_v33 = vsel %vm3155_vm9, %v3237_v16, %v3236_v21  ;;  %11528 = vst [vmem:[#allocation40_spill] sm:$0xff] %v9511_v15 }
 0x31a   : > { %v9513_v46 = vpop.eup %5816  ;;  %vm2517_vm11 = vweird.f32 %v11490_v50  ;;  %v9520_v29 = vsel %vm9440_vm7, 0, %v2928_v62  ;;  %v3123_v39 = vshrl.u32 %v3105_v12, %v3121_v25  ;;  %vm2829_vm4 = vweird.f32 %v11495_v32 }
 0x31b   : > { %vm2728_vm13 = vcmp.lt.s32.totalorder %v9490_v41, 2  ;;  %v3039_v16 = vand.u32 3, %v3038_v53  ;;  %v11529_v22 = vand.u32 2147483647, %v11525_v58  ;;  %v3122_v12 = vshll.u32 %v9263_v26, %v9411_v0  ;;  %v9537_v25 = vpop.permute.xlu1 %1271  ;;  %v9543_v48 = vpop.permute.xlu0 %1269  ;;  %v11536_v53 = vld [vmem:[#allocation76_spill] sm:$0xff] }
 0x31c   : > { %v3128_v62 = vor.u32 4788187, %v3127_v59  ;;  %11532 = vst [vmem:[#allocation113_spill] sm:$0xff] %v9537_v25  ;;  %vm2729_vm7 = vcmp.eq.s32.totalorder %v9490_v41, 0  ;;  %v2934_v21 = vadd.s32 3, %v9520_v29  ;;  %11533 = vst [vmem:[#allocation114_spill] sm:$0xff] %v9543_v48 }
 0x31d   : > { %vm9527_vm12 = vcmp.le.f32.partialorder %v11529_v22, 0.7853982  ;;  %v11535_v26 = vxor.u32 2147483648, %v9471_v34  ;;  %v3239_v22 = vsub.s32 4, %v11536_v53  ;;  %v3124_v25 = vor.u32 %v3123_v39, %v3122_v12 }
 0x31e   : > { %v3241_v38 = vsel %vm9527_vm12, %v11525_v58, %v3238_v33  ;;  %v9545_v52 = vpop.eup %5818  ;;  %v11534_v33 = vxor.u32 2147483648, %v9475_v37  ;;  %vm2732_vm5 = vcmp.eq.s32.totalorder %v9490_v41, 2  ;;  %vm3041_vm14 = vcmp.eq.s32.totalorder %v3039_v16, 0 }
 0x31f   : > { %v2838_v0 = vsel %vm2836_vm10, %v11535_v26, %v9475_v37  ;;  %v9558_v15 = vpop.eup %5820  ;;  %vm3044_vm2 = vcmp.eq.s32.totalorder %v3039_v16, 2  ;;  %5822 = vcosq.f32 %v3241_v38  ;;  %v11537_v48 = vxor.u32 2147483648, %v9496_v11  ;;  %v9567_v3 = vpop.permute.xlu1 %1307 }
 0x320   : > { %v2835_v59 = vsel %vm2833_vm8, %v9471_v34, %v11534_v33  ;;  %v11538_v27 = vxor.u32 2147483648, %v9484_v4  ;;  %5824 = vsinq.f32 %v3241_v38  ;;  %v3129_v26 = vand.u32 2147483647, %v3128_v62  ;;  %11539 = vst [vmem:[#allocation76_spill] sm:$0xff] %v9567_v3  ;;  %v9577_v31 = vpop.permute.xlu0 %1305  ;;  %v5909_v3 = vld [vmem:[%s6317_s28 + $0x78] sm:$0xff] }
 0x321   : > { %v2731_v33 = vsel %vm2729_vm7, %v9484_v4, %v11537_v48  ;;  %v2839_v39 = vsel %vm2832_vm6, %v2835_v59, %v2838_v0  ;;  %v11540_v12 = vxor.u32 2147483648, %v9513_v46  ;;  %v11541_v34 = vxor.u32 2147483648, %v9504_v24  ;;  %11542 = vst [vmem:[#allocation115_spill] sm:$0xff] %v9577_v31  ;;  %v5908_v31 = vld [vmem:[%s6317_s28 + $0x60] sm:$0xff] }
 0x322   : > { %v2734_v30 = vsel %vm2732_vm5, %v11538_v27, %v9496_v11  ;;  %v2935_v48 = vand.u32 3, %v2934_v21  ;;  %v11131_v27 = vxor.u32 2147483648, %v9558_v15  ;;  %v3240_v63 = vsel %vm3155_vm9, %v3239_v22, %v11536_v53  ;;  %v11549_v22 = vld [vmem:[#allocation63_spill] sm:$0xff] }
 0x323   : > { %v3043_v1 = vsel %vm3041_vm14, %v9504_v24, %v11540_v12  ;;  %v3046_v37 = vsel %vm3044_vm2, %v11541_v34, %v9513_v46  ;;  %v3131_v62 = vcvt.s32.f32 %v3124_v25  ;;  %v4994_v59 = vmul.f32 2.0, %v9488_v42  ;;  %v9596_v53 = vpop.permute.xlu1 %1311 }
 0x324   : > { %v9587_v0 = vsel %vm2517_vm11, nan, %v2527_v55  ;;  %v2735_v34 = vsel %vm2728_vm13, %v2731_v33, %v2734_v30  ;;  %vm3040_vm2 = vcmp.lt.s32.totalorder %v3039_v16, 2  ;;  %v9593_v21 = vsel %vm2829_vm4, nan, %v2839_v39  ;;  %11545 = vst [vmem:[#allocation118_spill] sm:$0xff] %v9596_v53  ;;  %v9603_v30 = vpop.permute.xlu0 %1309 }
 0x325   : > { %11543 = vst [vmem:[#allocation116_spill] sm:$0xff] %v9587_v0  ;;  %11544 = vst [vmem:[#allocation117_spill] sm:$0xff] %v9593_v21  ;;  %vm2725_vm14 = vweird.f32 %v11500_v51  ;;  %v3047_v12 = vsel %vm3040_vm2, %v3043_v1, %v3046_v37  ;;  %v3132_v38 = vmul.f32 %v3131_v62, %v3129_v26  ;;  %vm3037_vm5 = vweird.f32 %v11506_v8 }
 0x326   : > { %vm2937_vm6 = vcmp.eq.s32.totalorder %v2935_v48, 0  ;;  %vm2940_vm9 = vcmp.eq.s32.totalorder %v2935_v48, 2  ;;  %v9601_v55 = vsel %vm9527_vm12, 0, %v3240_v63  ;;  %11546 = vst [vmem:[#allocation119_spill] sm:$0xff] %v9603_v30  ;;  %v4993_v41 = vmul.f32 2.0, %v9587_v0 }
 0x327   : > { %v9608_v16 = vsel %vm2725_vm14, nan, %v2735_v34  ;;  %v2939_v1 = vsel %vm2937_vm6, %v9545_v52, %v11131_v27  ;;  %v11548_v37 = vxor.u32 2147483648, %v9545_v52  ;;  %v9617_v9 = vand.u32 3, %v11549_v22  ;;  %v9629_v27 = vpop.permute.xlu1 %1315  ;;  %v11554_v22 = vld [vmem:[#allocation110_spill] sm:$0xff] }
 0x328   : > { %11547 = vst [vmem:[#allocation120_spill] sm:$0xff] %v9608_v16  ;;  %v9620_v33 = vmul.f32 %v4994_v59, %v9488_v42  ;;  %v4996_v26 = vmul.f32 2.0, %v9593_v21  ;;  %v9625_v39 = vsel %vm3037_vm5, nan, %v3047_v12  ;;  %vm2936_vm12 = vcmp.lt.s32.totalorder %v2935_v48, 2  ;;  %11552 = vst [vmem:[#allocation122_spill] sm:$0xff] %v9629_v27  ;;  %v9638_v12 = vpop.permute.xlu0 %1313 }
 0x329   : > { %v2942_v25 = vsel %vm2940_vm9, %v11548_v37, %v9558_v15  ;;  %11551 = vst [vmem:[#allocation121_spill] sm:$0xff] %v9625_v39  ;;  %v3246_v62 = vadd.s32 3, %v9601_v55  ;;  %v3133_v34 = vxor.u32 2147483648, %v3132_v38  ;;  %v9631_v37 = vpop.eup %5822  ;;  %v9634_v30 = vand.u32 3, %v11554_v22  ;;  %11555 = vst [vmem:[#allocation110_spill] sm:$0xff] %v9638_v12 }
 0x32a   : > { %11550 = vst [vmem:[#allocation63_spill] sm:$0xff] %v9620_v33  ;;  %11553 = vst [vmem:[#allocation123_spill] sm:$0xff] %v9631_v37  ;;  %v4995_v59 = vmul.f32 2.0, %v9608_v16  ;;  %v2943_v42 = vsel %vm2936_vm12, %v2939_v1, %v2942_v25  ;;  %v3135_v53 = vsub.s32 4, %v9226_v61  ;;  %v9640_v8 = vpop.eup %5824  ;;  %v9644_v63 = vand.u32 3, %v9349_v23  ;;  %v11559_v25 = vld [vmem:[#allocation14_spill] sm:$0xff] }
 0x32b   : > { %11556 = vst [vmem:[#allocation124_spill] sm:$0xff] %v9640_v8  ;;  %v9647_v60 = vmul.f32 %v4993_v41, %v9587_v0  ;;  %v4998_v22 = vmul.f32 2.0, %v9625_v39  ;;  %v9652_v1 = vmul.f32 %v4996_v26, %v9593_v21  ;;  %vm11160_vm13 = vweird.f32 %v11510_v13  ;;  %v9663_v0 = vpop.permute.xlu1 %1319  ;;  %v11585_v13 = vld [vmem:[#allocation71_spill] sm:$0xff] }
 0x32c   : > { %vm3051_vm8 = vcmp.lt.s32.totalorder %v11559_v25, 0  ;;  %v9657_v12 = vand.u32 3, %v9392_v36  ;;  %v9661_v23 = vsel %vm11160_vm13, nan, %v2943_v42  ;;  %v3247_v41 = vand.u32 3, %v3246_v62  ;;  %11561 = vst [vmem:[#allocation127_spill] sm:$0xff] %v9663_v0  ;;  %v9671_v57 = vpop.permute.xlu0 %1317  ;;  %v11583_v0 = vld [vmem:[#allocation69_spill] sm:$0xff] }
 0x32d   : > { %11557 = vst [vmem:[#allocation125_spill] sm:$0xff] %v9647_v60  ;;  %11558 = vst [vmem:[#allocation126_spill] sm:$0xff] %v9652_v1  ;;  %v3134_v48 = vsel %vm3051_vm8, %v3133_v34, %v3132_v38  ;;  %v9666_v27 = vmul.f32 %v4995_v59, %v9608_v16  ;;  %v11141_v26 = vxor.u32 2147483648, %v9640_v8  ;;  %v11144_v21 = vxor.u32 2147483648, %v9631_v37  ;;  %v5899_v34 = vld [vmem:[%s6317_s28 + $0x8] sm:$0xff] }
 0x32e   : > { %11560 = vst [vmem:[#allocation14_spill] sm:$0xff] %v9661_v23  ;;  %v3136_v33 = vsel %vm3051_vm8, %v3135_v53, %v9226_v61  ;;  %11563 = vst [vmem:[#allocation129_spill] sm:$0xff] %v9671_v57  ;;  %v9675_v42 = vand.u32 3, %v9436_v54  ;;  %v9678_v38 = vmul.f32 %v4998_v22, %v9625_v39  ;;  %v11565_v62 = vand.u32 2147483647, %v11559_v25  ;;  %v11582_v57 = vld [vmem:[#allocation68_spill] sm:$0xff] }
 0x32f   : > { %11562 = vst [vmem:[#allocation128_spill] sm:$0xff] %v9666_v27  ;;  %v9684_v59 = vand.u32 3, %v9467_v44  ;;  %v4997_v61 = vmul.f32 2.0, %v9661_v23  ;;  %vm11158_vm7 = vweird.f32 %v11525_v58  ;;  %vm3249_vm2 = vcmp.eq.s32.totalorder %v3247_v41, 0  ;;  %v9689_v22 = vpop.permute.xlu1 %1323  ;;  %v11569_v27 = vld [vmem:[#allocation50_spill] sm:$0xff] }
 0x330   : > { %11564 = vst [vmem:[#allocation130_spill] sm:$0xff] %v9678_v38  ;;  %vm3050_vm10 = vcmp.le.f32.partialorder %v11565_v62, 0.7853982  ;;  %vm3252_vm6 = vcmp.eq.s32.totalorder %v3247_v41, 2  ;;  %11566 = vst [vmem:[#allocation131_spill] sm:$0xff] %v9689_v22  ;;  %v3251_v62 = vsel %vm3249_vm2, %v9631_v37, %v11141_v26  ;;  %v9701_v16 = vpop.permute.xlu0 %1321  ;;  %v9705_v36 = vand.u32 3, %v9520_v29 }
 0x331   : > { %v3137_v53 = vsel %vm3050_vm10, %v11559_v25, %v3134_v48  ;;  %v3138_v54 = vsel %vm3050_vm10, 0, %v3136_v33  ;;  %v3254_v44 = vsel %vm3252_vm6, %v11144_v21, %v9640_v8  ;;  %v11567_v48 = vld [vmem:[#allocation45_spill] sm:$0xff]  ;;  %v5900_v26 = vld [vmem:[%s6317_s28] sm:$0xff]  ;;  %v9711_v21 = vmul.f32 %v4997_v61, %v9661_v23  ;;  %v11572_v29 = vld [vmem:[#allocation51_spill] sm:$0xff] }
 0x332   : > { %v1482_v39 = vsel %vm802_vm1, %v5899_v34, %v11567_v48  ;;  %11568 = vst [vmem:[#allocation45_spill] sm:$0xff] %v9701_v16  ;;  %5826 = vcosq.f32 %v3137_v53  ;;  %v1481_v1 = vsel %vm802_vm1, %v5900_v26, %v11569_v27  ;;  %vm3248_vm9 = vcmp.lt.s32.totalorder %v3247_v41, 2  ;;  %v5901_v38 = vld [vmem:[%s6317_s28 + $0x18] sm:$0xff]  ;;  %v5902_v16 = vld [vmem:[%s6317_s28 + $0x10] sm:$0xff]  ;;  %v5903_v61 = vld [vmem:[%s6317_s28 + $0x28] sm:$0xff] }
 0x333   : > { %11570 = vst [vmem:[#allocation50_spill] sm:$0xff] %v9711_v21  ;;  %5828 = vsinq.f32 %v3137_v53  ;;  %v3142_v34 = vadd.s32 3, %v3138_v54  ;;  %v3255_v48 = vsel %vm3248_vm9, %v3251_v62, %v3254_v44  ;;  %v9714_v33 = vand.u32 3, %v9601_v55  ;;  %v11573_v22 = vld [vmem:[#allocation5_spill] sm:$0xff]  ;;  %v9722_v26 = vpop.permute.xlu1 %1327  ;;  %v5904_v62 = vld [vmem:[%s6317_s28 + $0x20] sm:$0xff]  ;;  %v11577_v23 = vld [vmem:[#allocation64_spill] sm:$0xff] }
 0x334   : > { %v1484_v60 = vsel %vm802_vm1, %v5901_v38, %v11572_v29  ;;  %v1483_v27 = vsel %vm802_vm1, %v5902_v16, %v11573_v22  ;;  %11574 = vst [vmem:[#allocation51_spill] sm:$0xff] %v9722_v26  ;;  %v11575_v41 = vld [vmem:[#allocation57_spill] sm:$0xff]  ;;  %v11576_v44 = vld [vmem:[#allocation58_spill] sm:$0xff]  ;;  %v1488_v38 = vsel %vm802_vm1, %v9050_v7, %v11577_v23  ;;  %v9736_v22 = vpop.permute.xlu0 %1325  ;;  %v5906_v23 = vld [vmem:[%s6317_s28 + $0x50] sm:$0xff]  ;;  %vm11610_vm8 = vcmask 72704  }
 0x335   : > { %11571 = vst [vmem:[#allocation132_spill] sm:$0xff] %v9714_v33  ;;  %v1486_v53 = vsel %vm802_vm1, %v5903_v61, %v11575_v41  ;;  %v1485_v55 = vsel %vm802_vm1, %v5904_v62, %v11576_v44  ;;  %v11578_v29 = vld [vmem:[#allocation65_spill] sm:$0xff]  ;;  %11579 = vst [vmem:[#allocation5_spill] sm:$0xff] %v9736_v22  ;;  %v11580_v26 = vld [vmem:[#allocation66_spill] sm:$0xff]  ;;  %v9753_v22 = vsel %vm11158_vm7, nan, %v3255_v48 }
 0x336   : > { %v1487_v16 = vsel %vm802_vm1, %v9061_v6, %v11578_v29  ;;  %v1490_v61 = vsel %vm802_vm1, %v9090_v49, %v11580_v26  ;;  %v11581_v41 = vld [vmem:[#allocation67_spill] sm:$0xff]  ;;  %v5905_v44 = vld [vmem:[%s6317_s28 + $0x58] sm:$0xff]  ;;  %v1491_v6 = vsel %vm802_vm1, %v5906_v23, %v11583_v0  ;;  %11584 = vst [vmem:[#allocation57_spill] sm:$0xff] %v9753_v22  ;;  %v9755_v49 = vand.u32 3, %v3142_v34  ;;  %v5910_v29 = vld [vmem:[%s6317_s28 + $0x70] sm:$0xff] }
 0x337   : > { %v1489_v62 = vsel %vm802_vm1, %v9292_v43, %v11581_v41  ;;  %v1492_v7 = vsel %vm802_vm1, %v5905_v44, %v11582_v57  ;;  %v5907_v26 = vld [vmem:[%s6317_s28 + $0x68] sm:$0xff]  ;;  %v9760_v41 = vand.u32 3, %v3138_v54  ;;  %v11587_v57 = vld [vmem:[#allocation73_spill] sm:$0xff]  ;;  %v11589_v21 = vld [vmem:[#allocation78_spill] sm:$0xff]  ;;  %v9771_v34 = vpop.permute.xlu1 %1331 }
 0x338   : > { %v1494_v43 = vsel %vm802_vm1, %v5907_v26, %v11585_v13  ;;  %v1493_v44 = vsel %vm802_vm1, %v5908_v31, %v11587_v57  ;;  %v11588_v0 = vld [vmem:[#allocation75_spill] sm:$0xff]  ;;  %v1495_v48 = vsel %vm802_vm1, %v5910_v29, %v11589_v21  ;;  %11590 = vst [vmem:[#allocation64_spill] sm:$0xff] %v9771_v34  ;;  %v11591_v58 = vld [vmem:[#allocation82_spill] sm:$0xff]  ;;  %v11593_v26 = vld [vmem:[#allocation85_spill] sm:$0xff]  ;;  %v9781_v8 = vpop.permute.xlu0 %1329  ;;  %vm3148_vm12 = vcmp.eq.s32.totalorder %v9755_v49, 2 }
 0x339   : > { %11586 = vst [vmem:[#allocation58_spill] sm:$0xff] %v9760_v41  ;;  %v1496_v23 = vsel %vm802_vm1, %v5909_v3, %v11588_v0  ;;  %v1498_v37 = vsel %vm819_vm0, %v1482_v39, %v11591_v58  ;;  %v11592_v13 = vld [vmem:[#allocation83_spill] sm:$0xff]  ;;  %v1500_v41 = vsel %vm819_vm0, %v1484_v60, %v11593_v26  ;;  %v11594_v31 = vld [vmem:[#allocation86_spill] sm:$0xff]  ;;  %11595 = vst [vmem:[#allocation65_spill] sm:$0xff] %v9781_v8  ;;  %v5000_v3 = vmul.f32 2.0, %v9753_v22 }
 0x33a   : > { %v1497_v54 = vsel %vm819_vm0, %v1481_v1, %v11592_v13  ;;  %v1499_v57 = vsel %vm819_vm0, %v1483_v27, %v11594_v31  ;;  %v11596_v0 = vld [vmem:[#allocation87_spill] sm:$0xff]  ;;  %v11597_v29 = vld [vmem:[#allocation88_spill] sm:$0xff]  ;;  %v11598_v58 = vld [vmem:[#allocation89_spill] sm:$0xff]  ;;  %vm3145_vm1 = vcmp.eq.s32.totalorder %v9755_v49, 0  ;;  %vm3144_vm6 = vcmp.lt.s32.totalorder %v9755_v49, 2 }
 0x33b   : > { %v1502_v21 = vsel %vm819_vm0, %v1486_v53, %v11596_v0  ;;  %v1501_v34 = vsel %vm819_vm0, %v1485_v55, %v11597_v29  ;;  %v1504_v39 = vsel %vm819_vm0, %v1488_v38, %v11598_v58  ;;  %v11599_v60 = vld [vmem:[#allocation90_spill] sm:$0xff]  ;;  %v11600_v27 = vld [vmem:[#allocation91_spill] sm:$0xff]  ;;  %v11601_v26 = vld [vmem:[#allocation93_spill] sm:$0xff] }
 0x33c   : > { %v1503_v1 = vsel %vm819_vm0, %v1487_v16, %v11599_v60  ;;  %v1506_v13 = vsel %vm819_vm0, %v1490_v61, %v11600_v27  ;;  %v1505_v31 = vsel %vm819_vm0, %v1489_v62, %v11601_v26  ;;  %v11602_v53 = vld [vmem:[#allocation96_spill] sm:$0xff]  ;;  %v9800_v55 = vpop.eup %5826  ;;  %v11603_v29 = vld [vmem:[#allocation97_spill] sm:$0xff]  ;;  %v11604_v58 = vld [vmem:[#allocation98_spill] sm:$0xff]  ;;  %v9810_v27 = vpop.permute.xlu1 %1335 }
 0x33d   : > { %v1508_v0 = vsel %vm819_vm0, %v1492_v7, %v11602_v53  ;;  %v1507_v38 = vsel %vm819_vm0, %v1491_v6, %v11603_v29  ;;  %v1510_v8 = vsel %vm819_vm0, %v1494_v43, %v11604_v58  ;;  %v11605_v33 = vld [vmem:[#allocation99_spill] sm:$0xff]  ;;  %v11606_v60 = vld [vmem:[#allocation101_spill] sm:$0xff]  ;;  %11607 = vst [vmem:[#allocation66_spill] sm:$0xff] %v9810_v27  ;;  %v9812_v62 = vpop.eup %5828  ;;  %v11608_v26 = vld [vmem:[#allocation102_spill] sm:$0xff] }
 0x33e   : > { %v1509_v16 = vsel %vm819_vm0, %v1493_v44, %v11605_v33  ;;  %v1512_v61 = vsel %vm819_vm0, %v1496_v23, %v11606_v60  ;;  %v1511_v7 = vsel %vm819_vm0, %v1495_v48, %v11608_v26  ;;  %v11609_v53 = vld [vmem:[#allocation105_spill] sm:$0xff]  ;;  %v11611_v6 = vld [vmem:[#allocation106_spill] sm:$0xff]  ;;  %vm11612_vm10 = vmmov %vm11610_vm8  ;;  %v9822_v33 = vpop.permute.xlu0 %1333  ;;  %v9825_v44 = vmul.f32 %v5000_v3, %v9753_v22 }
 0x33f   : > { %v1514_v51 = vsel %vm11610_vm8, %v1498_v37, %v11609_v53  ;;  %v1513_v29 = vsel %vm11612_vm10, %v1497_v54, %v11611_v6  ;;  %v11613_v43 = vld [vmem:[#allocation107_spill] sm:$0xff]  ;;  %vm11614_vm2 = vmmov %vm11610_vm8  ;;  %11615 = vst [vmem:[#allocation67_spill] sm:$0xff] %v9822_v33  ;;  %v11617_v23 = vld [vmem:[#allocation108_spill] sm:$0xff] }
 0x340   : > { %v1516_v58 = vsel %vm11614_vm2, %v1500_v41, %v11613_v43  ;;  %11616 = vst [vmem:[#allocation68_spill] sm:$0xff] %v9825_v44  ;;  %vm11618_vm9 = vmmov %vm11614_vm2  ;;  %v11619_v48 = vld [vmem:[#allocation61_spill] sm:$0xff]  ;;  %v11621_v37 = vld [vmem:[#allocation94_spill] sm:$0xff] }
 0x341   : > { %v1515_v60 = vsel %vm11618_vm9, %v1499_v57, %v11617_v23  ;;  %vm11620_vm0 = vmmov %vm11614_vm2  ;;  %v11623_v54 = vld [vmem:[#allocation39_spill] sm:$0xff]  ;;  %v11627_v33 = vld [vmem:[#allocation4_spill] sm:$0xff]  ;;  %v11162_v57 = vxor.u32 2147483648, %v9812_v62 }
 0x342   : > { %v1518_v26 = vsel %vm11620_vm0, %v1502_v21, %v11619_v48  ;;  %vm11622_vm8 = vmmov %vm11620_vm0  ;;  %v11625_v41 = vld [vmem:[#allocation95_spill] sm:$0xff]  ;;  %v11629_v22 = vld [vmem:[#allocation60_spill] sm:$0xff]  ;;  %v11161_v21 = vxor.u32 2147483648, %v9800_v55 }
 0x343   : > { %v1517_v53 = vsel %vm11622_vm8, %v1501_v34, %v11621_v37  ;;  %vm11624_vm10 = vmmov %vm11620_vm0  ;;  %v11631_v23 = vld [vmem:[#allocation77_spill] sm:$0xff]  ;;  %v9875_v37 = vpop.permute.xlu0 %1369 }
 0x344   : > { %v1520_v6 = vsel %vm11624_vm10, %v1504_v39, %v11623_v54  ;;  %vm11626_vm2 = vmmov %vm11620_vm0  ;;  %v11633_v39 = vld [vmem:[#allocation59_spill] sm:$0xff] }
 0x345   : > { %v1519_v43 = vsel %vm11626_vm2, %v1503_v1, %v11625_v41  ;;  %vm11628_vm7 = vmmov %vm11620_vm0  ;;  %v9854_v48 = vsel %vm11620_vm0, %v1507_v38, %v11633_v39  ;;  %v9856_v1 = vpop.permute.xlu1 %1371 }
 0x346   : > { %v9840_v3 = vsel %vm11628_vm7, %v1506_v13, %v11627_v33  ;;  %vm11630_vm13 = vmmov %vm11620_vm0  ;;  %vm3141_vm7 = vweird.f32 %v11559_v25  ;;  %v11634_v13 = vld [vmem:[#allocation111_spill] sm:$0xff] }
 0x347   : > { %v9844_v27 = vsel %vm11630_vm13, %v1505_v31, %v11629_v22  ;;  %vm11632_vm9 = vmmov %vm11620_vm0  ;;  %v11636_v31 = vld [vmem:[#allocation112_spill] sm:$0xff] }
 0x348   : > { %v9850_v34 = vsel %vm11632_vm9, %v1508_v0, %v11631_v23  ;;  %vm11635_vm8 = vmmov %vm11620_vm0  ;;  %vm11643_vm9 = vcmask 97280  }
 0x349   : > { %v9861_v22 = vsel %vm11635_vm8, %v1510_v8, %v11634_v13  ;;  %vm11637_vm13 = vmmov %vm11620_vm0  ;;  %v9880_v8 = vsel %vm11643_vm9, %v1514_v51, %v9267_v10  ;;  %v11661_v13 = vld [vmem:[#allocation27_spill] sm:$0xff] }
 0x34a   : > { %v9865_v33 = vsel %vm11637_vm13, %v1509_v16, %v11636_v31  ;;  %vm11639_vm10 = vmmov %vm11620_vm0 }
 0x34b   : > { %11638 = vst [vmem:[#allocation69_spill] sm:$0xff] %v9865_v33  ;;  %v9869_v0 = vsel %vm11639_vm10, %v1512_v61, %v9236_v14  ;;  %vm11641_vm2 = vmmov %vm11620_vm0 }
 0x34c   : > { %11640 = vst [vmem:[#allocation71_spill] sm:$0xff] %v9869_v0  ;;  %v9873_v38 = vsel %vm11641_vm2, %v1511_v7, %v9241_v28  ;;  %vm11644_vm0 = vmmov %vm11643_vm9  ;;  %v11653_v7 = vld [vmem:[#allocation16_spill] sm:$0xff] }
 0x34d   : > { %11642 = vst [vmem:[#allocation73_spill] sm:$0xff] %v9873_v38  ;;  %v9884_v16 = vsel %vm11644_vm0, %v1513_v29, %v9278_v19  ;;  %vm11645_vm8 = vmmov %vm11644_vm0  ;;  %v9918_v51 = vsel %vm11644_vm0, %v1519_v43, %v9383_v47  ;;  %v11654_v29 = vxor.u32 2147483648, %v11653_v7  ;;  %v11660_v43 = vld [vmem:[#allocation13_spill] sm:$0xff] }
 0x34e   : > { %v9888_v14 = vsel %vm11645_vm8, %v1516_v58, %v9299_v5  ;;  %vm11646_vm13 = vmmov %vm11644_vm0  ;;  %v3147_v5 = vsel %vm3145_vm1, %v9800_v55, %v11162_v57  ;;  %11651 = vst [vmem:[#allocation78_spill] sm:$0xff] %v9918_v51  ;;  %v11655_v58 = vld [vmem:[#allocation11_spill] sm:$0xff]  ;;  %v11669_v57 = vld [vmem:[#allocation24_spill] sm:$0xff] }
 0x34f   : > { %v9892_v28 = vsel %vm11646_vm13, %v1515_v60, %v9302_v18  ;;  %vm11647_vm10 = vmmov %vm11644_vm0  ;;  %v3150_v18 = vsel %vm3148_vm12, %v11161_v21, %v9812_v62  ;;  %v11657_v47 = vxor.u32 2147483648, %v11655_v58  ;;  %v11670_v44 = vxor.u32 2147483648, %v11669_v57  ;;  %v11671_v51 = vld [vmem:[#allocation21_spill] sm:$0xff] }
 0x350   : > { %v9896_v61 = vsel %vm11647_vm10, %v1518_v26, %v9340_v56  ;;  %vm11648_vm2 = vmmov %vm11644_vm0  ;;  %v9920_v56 = vpop.permute.xlu1 %1375  ;;  %v11656_v26 = vld [vmem:[#allocation29_spill] sm:$0xff]  ;;  %v3151_v39 = vsel %vm3144_vm6, %v3147_v5, %v3150_v18  ;;  %v11667_v18 = vld [vmem:[#allocation36_spill] sm:$0xff] }
 0x351   : > { %v9900_v10 = vsel %vm11648_vm2, %v1517_v53, %v9345_v45  ;;  %vm11649_vm9 = vmmov %vm11644_vm0  ;;  %v11652_v45 = vld [vmem:[#allocation26_spill] sm:$0xff]  ;;  %vm3352_vm12 = vcmp.eq.s32.totalorder %v11656_v26, 0  ;;  %vm3351_vm10 = vcmp.lt.s32.totalorder %v11656_v26, 2  ;;  %vm3355_vm2 = vcmp.eq.s32.totalorder %v11656_v26, 2 }
 0x352   : > { %v9904_v19 = vsel %vm11649_vm9, %v1520_v6, %v9376_v40  ;;  %vm3455_vm8 = vcmp.eq.s32.totalorder %v11652_v45, 0  ;;  %v9923_v40 = vpop.permute.xlu0 %1373  ;;  %vm3454_vm13 = vcmp.lt.s32.totalorder %v11652_v45, 2  ;;  %vm3458_vm1 = vcmp.eq.s32.totalorder %v11652_v45, 2  ;;  %v11658_v6 = vld [vmem:[#allocation18_spill] sm:$0xff] }
 0x353   : > { %11650 = vst [vmem:[#allocation75_spill] sm:$0xff] %v9904_v19  ;;  %v3457_v60 = vsel %vm3455_vm8, %v11655_v58, %v11654_v29  ;;  %v3460_v53 = vsel %vm3458_vm1, %v11657_v47, %v11653_v7  ;;  %v11659_v41 = vxor.u32 2147483648, %v11658_v6  ;;  %vm3660_vm9 = vcmp.lt.s32.totalorder %v11661_v13, 2  ;;  %v11663_v58 = vld [vmem:[#allocation17_spill] sm:$0xff] }
 0x354   : > { %vm3661_vm0 = vcmp.eq.s32.totalorder %v11661_v13, 0  ;;  %vm3664_vm8 = vcmp.eq.s32.totalorder %v11661_v13, 2  ;;  %v9944_v31 = vpop.permute.xlu1 %1379  ;;  %v11662_v7 = vxor.u32 2147483648, %v11660_v43  ;;  %v11664_v47 = vxor.u32 2147483648, %v11663_v58  ;;  %v11687_v13 = vld [vmem:[#allocation84_spill] sm:$0xff] }
 0x355   : > { %v3354_v23 = vsel %vm3352_vm12, %v11660_v43, %v11659_v41  ;;  %v11665_v41 = vld [vmem:[#allocation15_spill] sm:$0xff]  ;;  %vm3558_vm6 = vcmp.eq.s32.totalorder %v11667_v18, 0  ;;  %vm3561_vm1 = vcmp.eq.s32.totalorder %v11667_v18, 2  ;;  %v3461_v33 = vsel %vm3454_vm13, %v3457_v60, %v3460_v53 }
 0x356   : > { %v3357_v29 = vsel %vm3355_vm2, %v11662_v7, %v11658_v6  ;;  %v3663_v54 = vsel %vm3661_vm0, %v11665_v41, %v11664_v47  ;;  %v11666_v49 = vxor.u32 2147483648, %v11665_v41  ;;  %v9956_v21 = vpop.permute.xlu0 %1377  ;;  %v3560_v38 = vsel %vm3558_vm6, %v11671_v51, %v11670_v44  ;;  %v11672_v43 = vld [vmem:[#allocation35_spill] sm:$0xff]  ;;  %v11675_v47 = vld [vmem:[#allocation41_spill] sm:$0xff] }
 0x357   : > { %11668 = vst [vmem:[#allocation82_spill] sm:$0xff] %v9956_v21  ;;  %vm3867_vm12 = vcmp.eq.s32.totalorder %v11672_v43, 0  ;;  %vm3870_vm2 = vcmp.eq.s32.totalorder %v11672_v43, 2  ;;  %v9966_v6 = vsel %vm3141_vm7, nan, %v3151_v39  ;;  %v11674_v7 = vxor.u32 2147483648, %v11671_v51  ;;  %v11679_v39 = vld [vmem:[#allocation46_spill] sm:$0xff] }
 0x358   : > { %v3666_v5 = vsel %vm3664_vm8, %v11666_v49, %v11663_v58  ;;  %11673 = vst [vmem:[#allocation83_spill] sm:$0xff] %v9966_v6  ;;  %v11676_v41 = vxor.u32 2147483648, %v11675_v47  ;;  %v11677_v49 = vld [vmem:[#allocation34_spill] sm:$0xff]  ;;  %v3358_v21 = vsel %vm3351_vm10, %v3354_v23, %v3357_v29  ;;  %vm3764_vm0 = vcmp.eq.s32.totalorder %v11679_v39, 0  ;;  %v9983_v51 = vpop.permute.xlu1 %1383 }
 0x359   : > { %v3563_v58 = vsel %vm3561_vm1, %v11674_v7, %v11669_v57  ;;  %v11678_v44 = vxor.u32 2147483648, %v11677_v49  ;;  %vm3767_vm8 = vcmp.eq.s32.totalorder %v11679_v39, 2  ;;  %vm3557_vm6 = vcmp.lt.s32.totalorder %v11667_v18, 2  ;;  %v11680_v57 = vld [vmem:[#allocation44_spill] sm:$0xff] }
 0x35a   : > { %v3869_v19 = vsel %vm3867_vm12, %v11677_v49, %v11676_v41  ;;  %vm3866_vm1 = vcmp.lt.s32.totalorder %v11672_v43, 2  ;;  %v11681_v7 = vxor.u32 2147483648, %v11680_v57  ;;  %v11682_v41 = vld [vmem:[#allocation33_spill] sm:$0xff]  ;;  %v4999_v26 = vmul.f32 2.0, %v9966_v6  ;;  %v9994_v53 = vpop.permute.xlu0 %1381  ;;  %v11685_v43 = vld [vmem:[#allocation62_spill] sm:$0xff] }
 0x35b   : > { %v3872_v0 = vsel %vm3870_vm2, %v11678_v44, %v11675_v47  ;;  %v11683_v45 = vxor.u32 2147483648, %v11682_v41  ;;  %v3667_v23 = vsel %vm3660_vm9, %v3663_v54, %v3666_v5  ;;  %v3564_v29 = vsel %vm3557_vm6, %v3560_v38, %v3563_v58  ;;  %v11689_v38 = vld [vmem:[#allocation70_spill] sm:$0xff] }
 0x35c   : > { %v3766_v47 = vsel %vm3764_vm0, %v11682_v41, %v11681_v7  ;;  %v3873_v49 = vsel %vm3866_vm1, %v3869_v19, %v3872_v0  ;;  %vm11684_vm13 = vcmask 97280   ;;  %vm3763_vm10 = vcmp.lt.s32.totalorder %v11679_v39, 2  ;;  %v11692_v39 = vld [vmem:[#allocation53_spill] sm:$0xff] }
 0x35d   : > { %v3769_v60 = vsel %vm3767_vm8, %v11683_v45, %v11680_v57  ;;  %v10001_v18 = vsel %vm11684_vm13, %v9840_v3, %v9424_v20  ;;  %vm4073_vm12 = vcmp.eq.s32.totalorder %v11685_v43, 0  ;;  %vm4076_vm2 = vcmp.eq.s32.totalorder %v11685_v43, 2  ;;  %v10016_v3 = vpop.permute.xlu1 %1387  ;;  %v11696_v45 = vld [vmem:[#allocation55_spill] sm:$0xff] }
 0x35e   : > { %v10008_v57 = vsel %vm1789_vm3, nan, %v3461_v33  ;;  %v3770_v7 = vsel %vm3763_vm10, %v3766_v47, %v3769_v60  ;;  %v11688_v54 = vxor.u32 2147483648, %v11687_v13  ;;  %v11690_v19 = vxor.u32 2147483648, %v11689_v38  ;;  %v11694_v33 = vld [vmem:[#allocation54_spill] sm:$0xff] }
 0x35f   : > { %v10020_v58 = vsel %vm1685_vm15, nan, %v3358_v21  ;;  %vm11693_vm9 = vweird.f32 %v11692_v39  ;;  %vm11695_vm3 = vweird.f32 %v11694_v33  ;;  %vm11697_vm0 = vweird.f32 %v11696_v45  ;;  %v11699_v21 = vld [vmem:[#allocation2_spill] sm:$0xff] }
 0x360   : > { %v4075_v0 = vsel %vm4073_vm12, %v11689_v38, %v11688_v54  ;;  %v4078_v20 = vsel %vm4076_vm2, %v11690_v19, %v11687_v13  ;;  %v10024_v41 = vsel %vm11693_vm9, nan, %v3667_v23  ;;  %v10028_v47 = vsel %vm11695_vm3, nan, %v3564_v29  ;;  %v10037_v13 = vpop.permute.xlu0 %1385  ;;  %v11702_v54 = vld [vmem:[#allocation56_spill] sm:$0xff] }
 0x361   : > { %v10032_v60 = vsel %vm11697_vm0, nan, %v3873_v49  ;;  %v10035_v44 = vmul.f32 %v4999_v26, %v9966_v6  ;;  %vm4072_vm15 = vcmp.lt.s32.totalorder %v11685_v43, 2  ;;  %vm3969_vm8 = vcmp.lt.s32.totalorder %v9617_v9, 2  ;;  %v11704_v49 = vld [vmem:[#allocation12_spill] sm:$0xff]  ;;  %v10056_v43 = vpop.permute.xlu1 %1391 }
 0x362   : > { %11698 = vst [vmem:[#allocation85_spill] sm:$0xff] %v10032_v60  ;;  %vm3970_vm6 = vcmp.eq.s32.totalorder %v9617_v9, 0  ;;  %vm11700_vm1 = vweird.f32 %v11699_v21  ;;  %v4079_v29 = vsel %vm4072_vm15, %v4075_v0, %v4078_v20  ;;  %v11703_v38 = vxor.u32 2147483648, %v11702_v54  ;;  %v11709_v21 = vld [vmem:[#allocation72_spill] sm:$0xff] }
 0x363   : > { %v10044_v23 = vsel %vm11700_vm1, nan, %v3770_v7  ;;  %vm3973_vm13 = vcmp.eq.s32.totalorder %v9617_v9, 2  ;;  %v11705_v26 = vxor.u32 2147483648, %v11704_v49  ;;  %vm4278_vm10 = vcmp.lt.s32.totalorder %v9634_v30, 2 }
 0x364   : > { %11701 = vst [vmem:[#allocation86_spill] sm:$0xff] %v10044_v23  ;;  %v3972_v19 = vsel %vm3970_vm6, %v11704_v49, %v11703_v38  ;;  %vm4279_vm12 = vcmp.eq.s32.totalorder %v9634_v30, 0  ;;  %vm4282_vm2 = vcmp.eq.s32.totalorder %v9634_v30, 2  ;;  %v11706_v7 = vxor.u32 2147483648, %v9357_v35  ;;  %v10066_v33 = vpop.permute.xlu0 %1389 }
 0x365   : > { %v3975_v5 = vsel %vm3973_vm13, %v11705_v26, %v11702_v54  ;;  %v11707_v20 = vxor.u32 2147483648, %v9330_v2  ;;  %vm4176_vm9 = vcmp.eq.s32.totalorder %v9644_v63, 0  ;;  %vm4179_vm3 = vcmp.eq.s32.totalorder %v9644_v63, 2  ;;  %v11713_v26 = vld [vmem:[#allocation42_spill] sm:$0xff] }
 0x366   : > { %v4281_v0 = vsel %vm4279_vm12, %v9330_v2, %v11706_v7  ;;  %v11708_v45 = vxor.u32 2147483648, %v9413_v17  ;;  %v11710_v38 = vxor.u32 2147483648, %v11709_v21  ;;  %vm4485_vm0 = vcmp.eq.s32.totalorder %v9657_v12, 0  ;;  %v11711_v2 = vld [vmem:[#allocation100_spill] sm:$0xff] }
 0x367   : > { %v4284_v39 = vsel %vm4282_vm2, %v11707_v20, %v9357_v35  ;;  %vm4488_vm15 = vcmp.eq.s32.totalorder %v9657_v12, 2  ;;  %v11712_v35 = vxor.u32 2147483648, %v11711_v2  ;;  %v11714_v20 = vxor.u32 2147483648, %v11713_v26 }
 0x368   : > { %v4178_v54 = vsel %vm4176_vm9, %v11709_v21, %v11708_v45  ;;  %v4181_v49 = vsel %vm4179_vm3, %v11710_v38, %v9413_v17  ;;  %vm4382_vm6 = vcmp.eq.s32.totalorder %v9675_v42, 0  ;;  %vm4385_vm1 = vcmp.eq.s32.totalorder %v9675_v42, 2  ;;  %v11715_v21 = vld [vmem:[#allocation3_spill] sm:$0xff] }
 0x369   : > { %v4487_v7 = vsel %vm4485_vm0, %v11713_v26, %v11712_v35  ;;  %v4490_v6 = vsel %vm4488_vm15, %v11714_v20, %v11711_v2  ;;  %vm11716_vm13 = vweird.f32 %v11715_v21  ;;  %v11717_v38 = vxor.u32 2147483648, %v9496_v11  ;;  %v10095_v26 = vpop.permute.xlu1 %1395 }
 0x36a   : > { %v10087_v17 = vsel %vm11716_vm13, nan, %v4079_v29  ;;  %v11718_v35 = vxor.u32 2147483648, %v9484_v4  ;;  %v3976_v2 = vsel %vm3969_vm8, %v3972_v19, %v3975_v5  ;;  %v4285_v20 = vsel %vm4278_vm10, %v4281_v0, %v4284_v39  ;;  %v10103_v29 = vpop.permute.xlu0 %1393  ;;  %v11723_v19 = vld [vmem:[#allocation7_spill] sm:$0xff] }
 0x36b   : > { %v4384_v23 = vsel %vm4382_vm6, %v9484_v4, %v11717_v38  ;;  %vm4175_vm12 = vcmp.lt.s32.totalorder %v9644_v63, 2  ;;  %vm4484_vm2 = vcmp.lt.s32.totalorder %v9657_v12, 2  ;;  %vm4381_vm9 = vcmp.lt.s32.totalorder %v9675_v42, 2  ;;  %v11725_v0 = vld [vmem:[#allocation19_spill] sm:$0xff] }
 0x36c   : > { %v4387_v60 = vsel %vm4385_vm1, %v11718_v35, %v9496_v11  ;;  %v4182_v21 = vsel %vm4175_vm12, %v4178_v54, %v4181_v49  ;;  %v4491_v38 = vsel %vm4484_vm2, %v4487_v7, %v4490_v6  ;;  %vm4691_vm3 = vcmp.eq.s32.totalorder %v9684_v59, 0  ;;  %v11728_v49 = vld [vmem:[#allocation132_spill] sm:$0xff] }
 0x36d   : > { %v4388_v11 = vsel %vm4381_vm9, %v4384_v23, %v4387_v60  ;;  %vm4694_vm0 = vcmp.eq.s32.totalorder %v9684_v59, 2  ;;  %vm4588_vm8 = vcmp.eq.s32.totalorder %v9705_v36, 0  ;;  %vm4591_vm15 = vcmp.eq.s32.totalorder %v9705_v36, 2  ;;  %v10122_v23 = vpop.permute.xlu1 %1399  ;;  %v11729_v35 = vld [vmem:[#allocation124_spill] sm:$0xff] }
 0x36e   : > { %v11719_v4 = vxor.u32 2147483648, %v9513_v46  ;;  %v11720_v9 = vxor.u32 2147483648, %v9504_v24  ;;  %v11721_v12 = vxor.u32 2147483648, %v9558_v15  ;;  %v11722_v6 = vxor.u32 2147483648, %v9545_v52 }
 0x36f   : > { %vm11724_vm10 = vweird.f32 %v11723_v19  ;;  %vm11726_vm6 = vweird.f32 %v11725_v0  ;;  %vm4690_vm1 = vcmp.lt.s32.totalorder %v9684_v59, 2  ;;  %v10145_v54 = vsel %vm2725_vm14, nan, %v4388_v11 }
 0x370   : > { %v4693_v30 = vsel %vm4691_vm3, %v9504_v24, %v11719_v4  ;;  %v4696_v63 = vsel %vm4694_vm0, %v11720_v9, %v9513_v46  ;;  %v4590_v42 = vsel %vm4588_vm8, %v9545_v52, %v11721_v12  ;;  %v4593_v60 = vsel %vm4591_vm15, %v11722_v6, %v9558_v15  ;;  %v10137_v24 = vpop.permute.xlu0 %1397  ;;  %v11735_v4 = vld [vmem:[#allocation58_spill] sm:$0xff] }
 0x371   : > { %v10126_v5 = vsel %vm11724_vm10, nan, %v3976_v2  ;;  %v10130_v39 = vsel %vm11726_vm6, nan, %v4285_v20  ;;  %v10134_v46 = vsel %vm2517_vm11, nan, %v4182_v21  ;;  %v10141_v15 = vsel %vm2829_vm4, nan, %v4491_v38  ;;  %v11731_v20 = vld [vmem:[#allocation123_spill] sm:$0xff]  ;;  %v11732_v21 = vld [vmem:[#allocation76_spill] sm:$0xff] }
 0x372   : > { %vm4587_vm13 = vcmp.lt.s32.totalorder %v9705_v36, 2  ;;  %vm4897_vm12 = vcmp.eq.s32.totalorder %v11728_v49, 0  ;;  %v4697_v7 = vsel %vm4690_vm1, %v4693_v30, %v4696_v63  ;;  %v11730_v2 = vxor.u32 2147483648, %v11729_v35  ;;  %v11736_v36 = vld [vmem:[#allocation115_spill] sm:$0xff]  ;;  %v1436_v63 = vpop.permute.xlu1 %1435  ;;  %v11765_v52 = vld [vmem:[#allocation110_spill] sm:$0xff] }
 0x373   : > { %v4594_v50 = vsel %vm4587_vm13, %v4590_v42, %v4593_v60  ;;  %vm4900_vm11 = vcmp.eq.s32.totalorder %v11728_v49, 2  ;;  %vm11733_vm4 = vcmask 121856   ;;  %v11734_v38 = vxor.u32 2147483648, %v11731_v20 }
 0x374   : > { %v4899_v59 = vsel %vm4897_vm12, %v11731_v20, %v11730_v2  ;;  %v1546_v32 = vsel %vm11733_vm4, %v9880_v8, %v11732_v21  ;;  %vm4794_vm14 = vcmp.eq.s32.totalorder %v11735_v4, 0  ;;  %vm4797_vm2 = vcmp.eq.s32.totalorder %v11735_v4, 2  ;;  %vm11737_vm9 = vmmov %vm11733_vm4  ;;  %v1434_v0 = vpop.permute.xlu0 %1433  ;;  %v11747_v20 = vld [vmem:[#allocation9_spill] sm:$0xff] }
 0x375   : > { %v4902_v11 = vsel %vm4900_vm11, %v11734_v38, %v11729_v35  ;;  %v1545_v30 = vsel %vm11737_vm9, %v9884_v16, %v11736_v36  ;;  %vm11738_vm3 = vcmask 146432   ;;  %v11739_v12 = vxor.u32 2147483648, %v9812_v62  ;;  %vm11746_vm1 = vmmov %vm11733_vm4  ;;  %v11751_v38 = vld [vmem:[#allocation119_spill] sm:$0xff] }
 0x376   : > { %v1562_v9 = vsel %vm11738_vm3, %v1546_v32, %v9856_v1  ;;  %v11740_v42 = vxor.u32 2147483648, %v9800_v55  ;;  %vm11741_vm0 = vmmov %vm11738_vm3  ;;  %vm11742_vm8 = vcmask 171008   ;;  %v10177_v16 = vsel %vm3037_vm5, nan, %v4697_v7  ;;  %v11749_v7 = vld [vmem:[#allocation81_spill] sm:$0xff]  ;;  %v1440_v36 = vpop.permute.xlu1 %1439 }
 0x377   : > { %v4796_v8 = vsel %vm4794_vm14, %v9800_v55, %v11739_v12  ;;  %v1561_v60 = vsel %vm11741_vm0, %v1545_v30, %v9875_v37  ;;  %v1578_v19 = vsel %vm11742_vm8, %v1562_v9, %v1436_v63  ;;  %vm4896_vm15 = vcmp.lt.s32.totalorder %v11728_v49, 2  ;;  %vm11744_vm10 = vmmov %vm11742_vm8  ;;  %v11745_v55 = vld [vmem:[#allocation118_spill] sm:$0xff] }
 0x378   : > { %v4799_v6 = vsel %vm4797_vm2, %v11740_v42, %v9812_v62  ;;  %v4906_v1 = vmul.f32 -0.5, %v1578_v19  ;;  %v1577_v35 = vsel %vm11744_vm10, %v1561_v60, %v1434_v0  ;;  %v4903_v2 = vsel %vm4896_vm15, %v4899_v59, %v4902_v11  ;;  %vm11752_vm12 = vmmov %vm11746_vm1  ;;  %v1438_v9 = vpop.permute.xlu0 %1437  ;;  %v11756_v63 = vld [vmem:[#allocation10_spill] sm:$0xff]  ;;  %v11763_v19 = vld [vmem:[#allocation103_spill] sm:$0xff] }
 0x379   : > { %vm4793_vm6 = vcmp.lt.s32.totalorder %v11735_v4, 2  ;;  %v1548_v62 = vsel %vm11746_vm1, %v9888_v14, %v11745_v55  ;;  %v4905_v37 = vmul.f32 -0.5, %v1577_v35  ;;  %vm11748_vm13 = vweird.f32 %v11747_v20  ;;  %vm11753_vm11 = vmmov %vm11741_vm0  ;;  %v11761_v42 = vld [vmem:[#allocation122_spill] sm:$0xff] }
 0x37a   : > { %v10187_v21 = vsel %vm11748_vm13, nan, %v4594_v50  ;;  %v4800_v32 = vsel %vm4793_vm6, %v4796_v8, %v4799_v6  ;;  %vm11750_vm5 = vcmask 97280   ;;  %v1547_v59 = vsel %vm11752_vm12, %v9892_v28, %v11751_v38  ;;  %vm11754_vm4 = vmmov %vm11741_vm0  ;;  %v11759_v8 = vld [vmem:[#allocation79_spill] sm:$0xff] }
 0x37b   : > { %v1537_v49 = vsel %vm11750_vm5, %v9844_v27, %v11749_v7  ;;  %v1564_v11 = vsel %vm11753_vm11, %v1548_v62, %v9920_v56  ;;  %v4923_v4 = vmul.f32 1.442695, %v4906_v1  ;;  %v1563_v14 = vsel %vm11754_vm4, %v1547_v59, %v9923_v40  ;;  %vm11755_vm14 = vmmov %vm11742_vm8  ;;  %v11774_v7 = vld [vmem:[#allocation69_spill] sm:$0xff] }
 0x37c   : > { %v4921_v30 = vmul.f32 1.442695, %v4905_v37  ;;  %v1580_v50 = vsel %vm11755_vm14, %v1564_v11, %v1440_v36  ;;  %vm11757_vm2 = vweird.f32 %v11756_v63  ;;  %vm11758_vm9 = vmmov %vm11742_vm8  ;;  %v10207_v56 = vsel %vm3141_vm7, nan, %v4800_v32  ;;  %v11773_v32 = vld [vmem:[#allocation40_spill] sm:$0xff]  ;;  %v11777_v59 = vld [vmem:[#allocation113_spill] sm:$0xff] }
 0x37d   : > { %v10202_v12 = vsel %vm11757_vm2, nan, %v4903_v2  ;;  %5830 = vpow2.f32 %v4923_v4  ;;  %v4908_v27 = vmul.f32 -0.5, %v1580_v50  ;;  %v1579_v28 = vsel %vm11758_vm9, %v1563_v14, %v1438_v9  ;;  %vm11760_vm3 = vmmov %vm11750_vm5  ;;  %v1444_v2 = vpop.permute.xlu1 %1443  ;;  %v11778_v11 = vld [vmem:[#allocation71_spill] sm:$0xff]  ;;  %v11783_v50 = vld [vmem:[#allocation114_spill] sm:$0xff] }
 0x37e   : > { %v1540_v40 = vsel %vm11760_vm3, %v9850_v34, %v11759_v8  ;;  %vm11762_vm0 = vmmov %vm11746_vm1  ;;  %5832 = vpow2.f32 %v4921_v30  ;;  %v4907_v60 = vmul.f32 -0.5, %v1579_v28  ;;  %v11768_v34 = vld [vmem:[#allocation92_spill] sm:$0xff]  ;;  %v11781_v36 = vld [vmem:[#allocation75_spill] sm:$0xff] }
 0x37f   : > { %v1550_v6 = vsel %vm11762_vm0, %v9896_v61, %v11761_v42  ;;  %vm11764_vm8 = vmmov %vm11760_vm3  ;;  %v4927_v35 = vmul.f32 1.442695, %v4908_v27  ;;  %v11770_v61 = vld [vmem:[#allocation82_spill] sm:$0xff]  ;;  %v11784_v9 = vld [vmem:[#allocation73_spill] sm:$0xff] }
 0x380   : > { %v1539_v0 = vsel %vm11764_vm8, %v9854_v48, %v11763_v19  ;;  %vm11766_vm15 = vmmov %vm11762_vm0  ;;  %v4925_v37 = vmul.f32 1.442695, %v4907_v60  ;;  %v1442_v48 = vpop.permute.xlu0 %1441  ;;  %v11786_v27 = vld [vmem:[#allocation129_spill] sm:$0xff]  ;;  %v11787_v28 = vld [vmem:[#allocation78_spill] sm:$0xff] }
 0x381   : > { %v1549_v25 = vsel %vm11766_vm15, %v9900_v10, %v11765_v52  ;;  %vm11767_vm7 = vmmov %vm11754_vm4  ;;  %5834 = vpow2.f32 %v4927_v35  ;;  %v1448_v60 = vpop.permute.xlu1 %1447  ;;  %v11790_v19 = vld [vmem:[#allocation131_spill] sm:$0xff] }
 0x382   : > { %v1566_v1 = vsel %vm11767_vm7, %v1550_v6, %v9944_v31  ;;  %vm11769_vm10 = vmmov %vm11760_vm3  ;;  %5836 = vpow2.f32 %v4925_v37  ;;  %v11797_v37 = vld [vmem:[#allocation51_spill] sm:$0xff] }
 0x383   : > { %v1542_v55 = vsel %vm11769_vm10, %v9861_v22, %v11768_v34  ;;  %vm11771_vm6 = vmmov %vm11754_vm4  ;;  %v11780_v22 = vld [vmem:[#allocation127_spill] sm:$0xff]  ;;  %v11794_v34 = vld [vmem:[#allocation45_spill] sm:$0xff] }
 0x384   : > { %v1565_v62 = vsel %vm11771_vm6, %v1549_v25, %v11770_v61  ;;  %vm11772_vm1 = vmmov %vm11758_vm9 }
 0x385   : > { %v1582_v20 = vsel %vm11772_vm1, %v1566_v1, %v1444_v2  ;;  %vm11775_vm13 = vmmov %vm11760_vm3  ;;  %v1446_v2 = vpop.permute.xlu0 %1445 }
 0x386   : > { %v1541_v10 = vsel %vm11775_vm13, %v11774_v7, %v11773_v32  ;;  %v4910_v38 = vmul.f32 -0.5, %v1582_v20  ;;  %vm11776_vm5 = vmmov %vm11772_vm1  ;;  %v11801_v7 = vld [vmem:[#allocation64_spill] sm:$0xff] }
 0x387   : > { %v1581_v31 = vsel %vm11776_vm5, %v1565_v62, %v1442_v48  ;;  %vm11779_vm12 = vmmov %vm11760_vm3  ;;  %v11799_v48 = vld [vmem:[#allocation5_spill] sm:$0xff] }
 0x388   : > { %v1544_v4 = vsel %vm11779_vm12, %v11778_v11, %v11777_v59  ;;  %vm11782_vm11 = vmmov %vm11762_vm0  ;;  %v4909_v30 = vmul.f32 -0.5, %v1581_v31  ;;  %v4931_v6 = vmul.f32 1.442695, %v4910_v38  ;;  %v1452_v11 = vpop.permute.xlu1 %1451 }
 0x389   : > { %v1552_v14 = vsel %vm11782_vm11, %v11781_v36, %v11780_v22  ;;  %vm11785_vm4 = vmmov %vm11760_vm3  ;;  %v1450_v36 = vpop.permute.xlu0 %1449 }
 0x38a   : > { %v1543_v63 = vsel %vm11785_vm4, %v11784_v9, %v11783_v50  ;;  %vm11788_vm14 = vmmov %vm11762_vm0  ;;  %v4929_v1 = vmul.f32 1.442695, %v4909_v30  ;;  %5838 = vpow2.f32 %v4931_v6  ;;  %v11807_v50 = vld [vmem:[#allocation65_spill] sm:$0xff] }
 0x38b   : > { %v1551_v8 = vsel %vm11788_vm14, %v11787_v28, %v11786_v27  ;;  %vm11789_vm2 = vmmov %vm11771_vm6 }
 0x38c   : > { %v1568_v42 = vsel %vm11789_vm2, %v1552_v14, %v9983_v51  ;;  %vm11791_vm9 = vmmov %vm11762_vm0  ;;  %5840 = vpow2.f32 %v4929_v1 }
 0x38d   : > { %v1554_v52 = vsel %vm11791_vm9, %v10001_v18, %v11790_v19  ;;  %vm11792_vm3 = vmmov %vm11789_vm2 }
 0x38e   : > { %v1567_v25 = vsel %vm11792_vm3, %v1551_v8, %v9994_v53  ;;  %vm11793_vm0 = vmmov %vm11772_vm1  ;;  %v10260_v53 = vpop.eup %5830  ;;  %v11809_v8 = vld [vmem:[#allocation66_spill] sm:$0xff] }
 0x38f   : > { %v1584_v35 = vsel %vm11793_vm0, %v1568_v42, %v1448_v60  ;;  %vm11795_vm8 = vmmov %vm11791_vm9  ;;  %v10268_v22 = vpop.eup %5832  ;;  %v10273_v14 = vmul.f32 %v10260_v53, %v10008_v57 }
 0x390   : > { %v1553_v61 = vsel %vm11795_vm8, %v1537_v49, %v11794_v34  ;;  %v4912_v62 = vmul.f32 -0.5, %v1584_v35  ;;  %vm11796_vm15 = vmmov %vm11793_vm0  ;;  %v10286_v28 = vpop.eup %5834  ;;  %v4953_v60 = vmul.f32 %v10268_v22, %v10268_v22 }
 0x391   : > { %v1583_v51 = vsel %vm11796_vm15, %v1567_v25, %v1446_v2  ;;  %vm11798_vm7 = vmmov %vm11795_vm8  ;;  %5259 = vrot.lane.b32.xlu1 %v10273_v14, %s5932_s29  ;;  %v10296_v19 = vpop.eup %5836 }
 0x392   : > { %v1556_v20 = vsel %vm11798_vm7, %v1540_v40, %v11797_v37  ;;  %vm11800_vm10 = vmmov %vm11798_vm7  ;;  %v4911_v32 = vmul.f32 -0.5, %v1583_v51  ;;  %v4935_v59 = vmul.f32 1.442695, %v4912_v62  ;;  %v10308_v34 = vmul.f32 %v10296_v19, %v10028_v47  ;;  %v11817_v51 = vld [vmem:[#allocation23_spill] sm:$0xff] }
 0x393   : > { %v1555_v18 = vsel %vm11800_vm10, %v1539_v0, %v11799_v48  ;;  %vm11802_vm6 = vmmov %vm11798_vm7  ;;  %v11818_v37 = vsub.f32 1.0, %v11817_v51  ;;  %v11830_v51 = vld [vmem:[#allocation31_spill] sm:$0xff] }
 0x394   : > { %v1558_v38 = vsel %vm11802_vm6, %v1542_v55, %v11801_v7  ;;  %vm11803_vm1 = vmmov %vm11789_vm2  ;;  %v4933_v40 = vmul.f32 1.442695, %v4911_v32  ;;  %v4954_v55 = vmul.f32 %v10260_v53, %v10260_v53  ;;  %5842 = vpow2.f32 %v4935_v59 }
 0x395   : > { %v1570_v49 = vsel %vm11803_vm1, %v1554_v52, %v10016_v3  ;;  %vm11804_vm13 = vmmov %vm11803_vm1  ;;  %v4956_v32 = vmul.f32 %v10286_v28, %v10286_v28 }
 0x396   : > { %v1569_v31 = vsel %vm11804_vm13, %v1553_v61, %v10037_v13  ;;  %vm11805_vm5 = vmmov %vm11793_vm0  ;;  %v10280_v13 = vmul.f32 %v10268_v22, %v10020_v58  ;;  %5844 = vpow2.f32 %v4933_v40  ;;  %v4970_v57 = vmul.f32 %v4954_v55, %v4954_v55  ;;  %v11815_v61 = vld [vmem:[#allocation67_spill] sm:$0xff]  ;;  %v11822_v40 = vld [vmem:[#allocation85_spill] sm:$0xff] }
 0x397   : > { %v1586_v0 = vsel %vm11805_vm5, %v1570_v49, %v1452_v11  ;;  %vm11806_vm12 = vmmov %vm11793_vm0 }
 0x398   : > { %v4914_v3 = vmul.f32 -0.5, %v1586_v0  ;;  %v1585_v30 = vsel %vm11806_vm12, %v1569_v31, %v1450_v36  ;;  %vm11808_vm11 = vmmov %vm11802_vm6  ;;  %5257 = vrot.lane.b32.xlu0 %v10280_v13, %s5932_s29  ;;  %v11824_v36 = vld [vmem:[#allocation86_spill] sm:$0xff]  ;;  %vm5305_vm12 = vcmask 195584  }
 0x399   : > { %v1557_v9 = vsel %vm11808_vm11, %v1541_v10, %v11807_v50  ;;  %v4913_v27 = vmul.f32 -0.5, %v1585_v30  ;;  %vm11810_vm4 = vmmov %vm11802_vm6  ;;  %v1456_v10 = vpop.permute.xlu1 %1455  ;;  %vm5322_vm11 = vcmask 392192  }
 0x39a   : > { %v1560_v42 = vsel %vm11810_vm4, %v1544_v4, %v11809_v8  ;;  %vm11811_vm14 = vmmov %vm11803_vm1  ;;  %v4939_v58 = vmul.f32 1.442695, %v4914_v3  ;;  %v1454_v4 = vpop.permute.xlu0 %1453  ;;  %v11826_v8 = vld [vmem:[#allocation30_spill] sm:$0xff] }
 0x39b   : > { %v1572_v6 = vsel %vm11811_vm14, %v1556_v20, %v10056_v43  ;;  %vm11812_vm2 = vmmov %vm11803_vm1  ;;  %v4937_v25 = vmul.f32 1.442695, %v4913_v27  ;;  %v10303_v43 = vmul.f32 %v10286_v28, %v10024_v41  ;;  %v10316_v41 = vmul.f32 %v11818_v37, %v4970_v57  ;;  %v10318_v20 = vpop.eup %5838 }
 0x39c   : > { %v1571_v52 = vsel %vm11812_vm2, %v1555_v18, %v10066_v33  ;;  %vm11813_vm9 = vmmov %vm11793_vm0  ;;  %5846 = vpow2.f32 %v4939_v58  ;;  %5261 = vrot.lane.b32.xlu0 %v10308_v34, %s5932_s29  ;;  %v10326_v7 = vpop.eup %5840  ;;  %v11831_v37 = vsub.f32 1.0, %v11830_v51 }
 0x39d   : > { %v1588_v1 = vsel %vm11813_vm9, %v1572_v6, %v1456_v10  ;;  %vm11814_vm3 = vmmov %vm11793_vm0  ;;  %5848 = vpow2.f32 %v4937_v25  ;;  %5263 = vrot.lane.b32.xlu1 %v10303_v43, %s5932_s29  ;;  %v1460_v47 = vpop.permute.xlu1 %1459  ;;  %v5053_v55 = vmul.f32 %v10326_v7, %v11824_v36  ;;  %v11827_v6 = vsub.f32 1.0, %v11826_v8  ;;  %v11833_v36 = vld [vmem:[#allocation38_spill] sm:$0xff] }
 0x39e   : > { %v4916_v35 = vmul.f32 -0.5, %v1588_v1  ;;  %v1587_v2 = vsel %vm11814_vm3, %v1571_v52, %v1454_v4  ;;  %vm11816_vm0 = vmmov %vm11810_vm4  ;;  %v1458_v11 = vpop.permute.xlu0 %1457  ;;  %v10340_v50 = vpop.eup %5842  ;;  %v5194_v10 = vmul.f32 %v10273_v14, %v10273_v14 }
 0x39f   : > { %v1559_v62 = vsel %vm11816_vm0, %v1543_v63, %v11815_v61  ;;  %v4915_v33 = vmul.f32 -0.5, %v1587_v2  ;;  %vm11819_vm8 = vmmov %vm11803_vm1  ;;  %v4969_v63 = vmul.f32 %v4953_v60, %v4953_v60  ;;  %v10361_v2 = vmul.f32 %v10280_v13, %v10280_v13 }
 0x3a0   : > { %v1574_v48 = vsel %vm11819_vm8, %v1558_v38, %v10095_v26  ;;  %v4943_v18 = vmul.f32 1.442695, %v4916_v35  ;;  %vm11820_vm15 = vmmov %vm11803_vm1  ;;  %v5054_v26 = vmul.f32 %v10318_v20, %v11822_v40  ;;  %5265 = vrot.lane.b32.xlu0 %v5053_v55, %s5932_s29  ;;  %v10392_v40 = vmul.f32 %v10308_v34, %v10308_v34 }
 0x3a1   : > { %v1573_v49 = vsel %vm11820_vm15, %v1557_v9, %v10103_v29  ;;  %v4941_v31 = vmul.f32 1.442695, %v4915_v33  ;;  %vm11821_vm7 = vmmov %vm11814_vm3  ;;  %v5162_v29 = vadd.f32 1.0, %v10316_v41  ;;  %v1575_v9 = vsel %vm11803_vm1, %v1559_v62, %v10137_v24  ;;  %v1464_v57 = vpop.permute.xlu1 %1463 }
 0x3a2   : > { %v1590_v59 = vsel %vm11821_vm7, %v1574_v48, %v1460_v47  ;;  %5850 = vpow2.f32 %v4943_v18  ;;  %vm11823_vm10 = vmmov %vm11814_vm3  ;;  %5267 = vrot.lane.b32.xlu1 %v5054_v26, %s5932_s29  ;;  %v10347_v58 = vmul.f32 %v11827_v6, %v4969_v63  ;;  %v1462_v25 = vpop.permute.xlu0 %1461  ;;  %v5056_v24 = vmul.f32 %v10340_v50, %v10087_v17 }
 0x3a3   : > { %v4918_v38 = vmul.f32 -0.5, %v1590_v59  ;;  %v1589_v0 = vsel %vm11823_vm10, %v1573_v49, %v1458_v11  ;;  %vm11825_vm6 = vmmov %vm11803_vm1  ;;  %5852 = vpow2.f32 %v4941_v31  ;;  %v5178_v61 = vmul.f32 0.5, %v5162_v29 }
 0x3a4   : > { %v1576_v3 = vsel %vm11825_vm6, %v1560_v42, %v10122_v23  ;;  %v4917_v30 = vmul.f32 -0.5, %v1589_v0  ;;  %v4972_v23 = vmul.f32 %v4956_v32, %v4956_v32  ;;  %v10349_v42 = vpop.eup %5844  ;;  %vm11828_vm13 = vmmov %vm11814_vm3  ;;  %v5161_v17 = vadd.f32 1.0, %v10347_v58  ;;  %v11832_v32 = vld [vmem:[#allocation20_spill] sm:$0xff] }
 0x3a5   : > { %v4947_v27 = vmul.f32 1.442695, %v4918_v38  ;;  %v1592_v52 = vsel %vm11828_vm13, %v1576_v3, %v1464_v57  ;;  %vm11829_vm5 = vmmov %vm11814_vm3  ;;  %v5055_v35 = vmul.f32 %v10349_v42, %v10126_v5  ;;  %v4955_v5 = vmul.f32 %v10296_v19, %v10296_v19 }
 0x3a6   : > { %v4945_v60 = vmul.f32 1.442695, %v4917_v30  ;;  %v4920_v1 = vmul.f32 -0.5, %v1592_v52  ;;  %v1591_v4 = vsel %vm11829_vm5, %v1575_v9, %v1462_v25  ;;  %5271 = vrot.lane.b32.xlu1 %v5056_v24, %s5932_s29  ;;  %v10364_v62 = vpop.eup %5846  ;;  %v10370_v48 = vmul.f32 %v11831_v37, %v4972_v23 }
 0x3a7   : > { %5854 = vpow2.f32 %v4947_v27  ;;  %v4919_v14 = vmul.f32 -0.5, %v1591_v4  ;;  %5269 = vrot.lane.b32.xlu0 %v5055_v35, %s5932_s29  ;;  %v10374_v13 = vpop.eup %5848  ;;  %v5058_v47 = vmul.f32 %v10364_v62, %v10130_v39  ;;  %v4958_v63 = vmul.f32 %v10318_v20, %v10318_v20  ;;  %v11835_v27 = vld [vmem:[#allocation43_spill] sm:$0xff] }
 0x3a8   : > { %5856 = vpow2.f32 %v4945_v60  ;;  %v4951_v33 = vmul.f32 1.442695, %v4920_v1  ;;  %v10382_v49 = vmul.f32 %v10260_v53, %v11832_v32  ;;  %v10386_v31 = vmul.f32 %v10303_v43, %v10303_v43 }
 0x3a9   : > { %v4949_v18 = vmul.f32 1.442695, %v4919_v14  ;;  %v5057_v59 = vmul.f32 %v10374_v13, %v10134_v46  ;;  %v4971_v11 = vmul.f32 %v4955_v5, %v4955_v5  ;;  %v5164_v39 = vadd.f32 1.0, %v10370_v48 }
 0x3aa   : > { %5858 = vpow2.f32 %v4951_v33  ;;  %5275 = vrot.lane.b32.xlu1 %v5058_v47, %s5932_s29  ;;  %v4974_v53 = vmul.f32 %v4958_v63, %v4958_v63  ;;  %v5210_v43 = vsub.f32 %v5178_v61, %v5194_v10  ;;  %v5177_v0 = vmul.f32 0.5, %v5161_v17  ;;  %v11837_v61 = vld [vmem:[#allocation8_spill] sm:$0xff] }
 0x3ab   : > { %5860 = vpow2.f32 %v4949_v18  ;;  %5273 = vrot.lane.b32.xlu0 %v5057_v59, %s5932_s29  ;;  %v11834_v3 = vsub.f32 1.0, %v11833_v36  ;;  %v4957_v34 = vmul.f32 %v10326_v7, %v10326_v7  ;;  %v10407_v29 = vmul.f32 %v5054_v26, %v5054_v26  ;;  %v11839_v18 = vld [vmem:[#allocation80_spill] sm:$0xff]  ;;  %v11841_v36 = vld [vmem:[#allocation25_spill] sm:$0xff] }
 0x3ac   : > { %v10396_v38 = vpop.eup %5850  ;;  %v11836_v57 = vsub.f32 1.0, %v11835_v27  ;;  %v4960_v6 = vmul.f32 %v10340_v50, %v10340_v50  ;;  %v10417_v23 = vmul.f32 %v5053_v55, %v5053_v55  ;;  %v5180_v26 = vmul.f32 0.5, %v5164_v39 }
 0x3ad   : > { %v10401_v46 = vmul.f32 %v11834_v3, %v4971_v11  ;;  %v10405_v30 = vpop.eup %5852  ;;  %v5060_v9 = vmul.f32 %v10396_v38, %v10141_v15  ;;  %v4973_v52 = vmul.f32 %v4957_v34, %v4957_v34  ;;  %v4959_v1 = vmul.f32 %v10349_v42, %v10349_v42 }
 0x3ae   : > { %v10413_v8 = vmul.f32 %v11836_v57, %v4974_v53  ;;  %v5059_v10 = vmul.f32 %v10405_v30, %v10145_v54  ;;  %v4976_v25 = vmul.f32 %v4960_v6, %v4960_v6  ;;  %v10428_v14 = vmul.f32 %v5056_v24, %v5056_v24 }
 0x3af   : > { %v5163_v60 = vadd.f32 1.0, %v10401_v46  ;;  %5279 = vrot.lane.b32.xlu1 %v5060_v9, %s5932_s29  ;;  %v5226_v55 = vmax.f32 %v5210_v43, 0.0  ;;  %v5209_v54 = vsub.f32 %v5177_v0, %v10361_v2  ;;  %v11838_v33 = vsub.f32 1.0, %v11837_v61 }
 0x3b0   : > { %v5166_v15 = vadd.f32 1.0, %v10413_v8  ;;  %5277 = vrot.lane.b32.xlu0 %v5059_v10, %s5932_s29  ;;  %v11840_v63 = vsub.f32 1.0, %v11839_v18  ;;  %v4975_v24 = vmul.f32 %v4959_v1, %v4959_v1  ;;  %v10444_v11 = vmul.f32 %v5055_v35, %v5055_v35 }
 0x3b1   : > { %v10426_v4 = vpop.eup %5854  ;;  %v10434_v17 = vmul.f32 %v11838_v33, %v4973_v52  ;;  %v5179_v5 = vmul.f32 0.5, %v5163_v60  ;;  %v10446_v39 = vmul.f32 %v5058_v47, %v5058_v47  ;;  %v4962_v53 = vmul.f32 %v10364_v62, %v10364_v62 }
 0x3b2   : > { %v10436_v51 = vpop.eup %5856  ;;  %v5062_v37 = vmul.f32 %v10426_v4, %v10177_v16  ;;  %v10442_v32 = vmul.f32 %v11840_v63, %v4976_v25  ;;  %v10452_v43 = vmul.f32 %v5057_v59, %v5057_v59  ;;  %v5212_v16 = vsub.f32 %v5180_v26, %v10386_v31 }
 0x3b3   : > { %v5061_v2 = vmul.f32 %v10436_v51, %v10187_v21  ;;  %v10456_v0 = vmul.f32 0.5, %v5166_v15  ;;  %v11842_v3 = vsub.f32 1.0, %v11841_v36  ;;  %v10464_v34 = vmul.f32 %v5060_v9, %v5060_v9  ;;  %v11843_v15 = vld [vmem:[#allocation63_spill] sm:$0xff]  ;;  %v11845_v36 = vld [vmem:[#allocation125_spill] sm:$0xff] }
 0x3b4   : > { %5283 = vrot.lane.b32.xlu1 %v5062_v37, %s5932_s29  ;;  %v10462_v47 = vpop.eup %5858  ;;  %v5225_v21 = vmax.f32 %v5209_v54, 0.0  ;;  %v5165_v59 = vadd.f32 1.0, %v10434_v17  ;;  %v4978_v27 = vmul.f32 %v4962_v53, %v4962_v53  ;;  %v10470_v6 = vmul.f32 %v5059_v10, %v5059_v10 }
 0x3b5   : > { %v10460_v35 = vmul.f32 %v11842_v3, %v4975_v24  ;;  %5281 = vrot.lane.b32.xlu0 %v5061_v2, %s5932_s29  ;;  %v10468_v57 = vpop.eup %5860  ;;  %v5064_v31 = vmul.f32 %v10462_v47, %v10202_v12  ;;  %v5211_v60 = vsub.f32 %v5179_v5, %v10392_v40  ;;  %v5168_v52 = vadd.f32 1.0, %v10442_v32 }
 0x3b6   : > { %v5063_v9 = vmul.f32 %v10468_v57, %v10207_v56  ;;  %v11844_v25 = vsub.f32 1.0, %v11843_v15  ;;  %v4961_v10 = vmul.f32 %v10374_v13, %v10374_v13  ;;  %v10485_v54 = vmul.f32 %v5062_v37, %v5062_v37 }
 0x3b7   : > { %v5167_v26 = vadd.f32 1.0, %v10460_v35  ;;  %v5228_v12 = vmax.f32 %v5212_v16, 0.0  ;;  %v5214_v40 = vsub.f32 %v10456_v0, %v10407_v29  ;;  %v4964_v56 = vmul.f32 %v10396_v38, %v10396_v38 }
 0x3b8   : > { %v10481_v1 = vmul.f32 %v11844_v25, %v4978_v27  ;;  %5287 = vrot.lane.b32.xlu1 %v5064_v31, %s5932_s29  ;;  %v10492_v61 = vmul.f32 %v5061_v2, %v5061_v2  ;;  %v5181_v33 = vmul.f32 0.5, %v5165_v59  ;;  %v4977_v18 = vmul.f32 %v4961_v10, %v4961_v10  ;;  %v11847_v27 = vld [vmem:[#allocation126_spill] sm:$0xff] }
 0x3b9   : > { %5285 = vrot.lane.b32.xlu0 %v5063_v9, %s5932_s29  ;;  %v5227_v63 = vmax.f32 %v5211_v60, 0.0  ;;  %v5184_v37 = vmul.f32 0.5, %v5168_v52  ;;  %v4980_v24 = vmul.f32 %v4964_v56, %v4964_v56  ;;  %v4963_v53 = vmul.f32 %v10405_v30, %v10405_v30 }
 0x3ba   : > { %v5170_v5 = vadd.f32 1.0, %v10481_v1  ;;  %v5183_v16 = vmul.f32 0.5, %v5167_v26  ;;  %v11846_v29 = vsub.f32 1.0, %v11845_v36  ;;  %v4966_v2 = vmul.f32 %v10426_v4, %v10426_v4 }
 0x3bb   : > { %v4965_v3 = vmul.f32 %v10436_v51, %v10436_v51  ;;  %v11848_v60 = vsub.f32 1.0, %v11847_v27  ;;  %v4979_v15 = vmul.f32 %v4963_v53, %v4963_v53  ;;  %v4968_v26 = vmul.f32 %v10462_v47, %v10462_v47 }
 0x3bc   : > { %v10500_v0 = vmul.f32 %v11846_v29, %v4977_v18  ;;  %5357 = vrot.lane.b32.xlu1 %v5226_v55, %s5932_s29  ;;  %v5186_v59 = vmul.f32 0.5, %v5170_v5  ;;  %v5213_v25 = vsub.f32 %v5181_v33, %v10417_v23  ;;  %v4982_v56 = vmul.f32 %v4966_v2, %v4966_v2  ;;  %v11850_v55 = vld [vmem:[#allocation128_spill] sm:$0xff]  ;;  %v11854_v2 = vld [vmem:[#allocation50_spill] sm:$0xff] }
 0x3bd   : > { %v10509_v52 = vmul.f32 %v11848_v60, %v4980_v24  ;;  %5355 = vrot.lane.b32.xlu0 %v5225_v21, %s5932_s29  ;;  %v4981_v18 = vmul.f32 %v4965_v3, %v4965_v3  ;;  %v11851_v5 = vsub.f32 1.0, %v11850_v55  ;;  %v4984_v24 = vmul.f32 %v4968_v26, %v4968_v26  ;;  %v11852_v60 = vld [vmem:[#allocation130_spill] sm:$0xff]  ;;  %v11856_v55 = vld [vmem:[#allocation68_spill] sm:$0xff] }
 0x3be   : > { %v5169_v10 = vadd.f32 1.0, %v10500_v0  ;;  %v4967_v53 = vmul.f32 %v10468_v57, %v10468_v57  ;;  %v5216_v27 = vsub.f32 %v5184_v37, %v10428_v14  ;;  %v5215_v21 = vsub.f32 %v5183_v16, %v10444_v11 }
 0x3bf   : > { %11849 = vst [vmem:[#allocation87_spill] sm:$0xff] %v10509_v52  ;;  %v5172_v36 = vadd.f32 1.0, %v10509_v52  ;;  %v10519_v29 = vmul.f32 %v11851_v5, %v4979_v15  ;;  %v11853_v23 = vsub.f32 1.0, %v11852_v60  ;;  %v11855_v3 = vsub.f32 1.0, %v11854_v2 }
 0x3c0   : > { %5361 = vrot.lane.b32.xlu1 %v5228_v12, %s5932_s29  ;;  %v5218_v15 = vsub.f32 %v5186_v59, %v10446_v39  ;;  %v11857_v5 = vsub.f32 1.0, %v11856_v55  ;;  %v4983_v14 = vmul.f32 %v4967_v53, %v4967_v53  ;;  %v5185_v11 = vmul.f32 0.5, %v5169_v10 }
 0x3c1   : > { %v10527_v33 = vmul.f32 %v11853_v23, %v4982_v56  ;;  %v10531_v45 = vmul.f32 %v11855_v3, %v4981_v18  ;;  %v5171_v26 = vadd.f32 1.0, %v10519_v29  ;;  %5359 = vrot.lane.b32.xlu0 %v5227_v63, %s5932_s29  ;;  %v5188_v37 = vmul.f32 0.5, %v5172_v36 }
 0x3c2   : > { %v10538_v52 = vmul.f32 %v11857_v5, %v4984_v24  ;;  %v5230_v18 = vmax.f32 %v5214_v40, 0.0  ;;  %v11858_v39 = vsub.f32 1.0, %v10035_v44  ;;  %v5208_v23 = vmul.f32 %v5064_v31, %v5064_v31 }
 0x3c3   : > { %v5174_v16 = vadd.f32 1.0, %v10527_v33  ;;  %v5173_v56 = vadd.f32 1.0, %v10531_v45  ;;  %v5187_v60 = vmul.f32 0.5, %v5171_v26  ;;  %v5229_v24 = vmax.f32 %v5213_v25, 0.0 }
 0x3c4   : > { %v5176_v12 = vadd.f32 1.0, %v10538_v52  ;;  %v10546_v59 = vmul.f32 %v11858_v39, %v4983_v14  ;;  %v5207_v3 = vmul.f32 %v5063_v9, %v5063_v9  ;;  %5365 = vrot.lane.b32.xlu1 %v5230_v18, %s5932_s29  ;;  %v5232_v63 = vmax.f32 %v5216_v27, 0.0  ;;  %v11859_v9 = vld [vmem:[#allocation22_spill] sm:$0xff] }
 0x3c5   : > { %v5190_v2 = vmul.f32 0.5, %v5174_v16  ;;  %v5189_v53 = vmul.f32 0.5, %v5173_v56  ;;  %5363 = vrot.lane.b32.xlu0 %v5229_v24, %s5932_s29  ;;  %v5231_v40 = vmax.f32 %v5215_v21, 0.0  ;;  %v5234_v26 = vmax.f32 %v5218_v15, 0.0  ;;  %v11860_v56 = vld [vmem:[#allocation28_spill] sm:$0xff] }
 0x3c6   : > { %v5192_v10 = vmul.f32 0.5, %v5176_v12  ;;  %v5175_v36 = vadd.f32 1.0, %v10546_v59  ;;  %v5217_v55 = vsub.f32 %v5185_v11, %v10452_v43  ;;  %v5220_v44 = vsub.f32 %v5188_v37, %v10464_v34  ;;  %v11861_v15 = vld [vmem:[#allocation32_spill] sm:$0xff]  ;;  %v11864_v37 = vld [vmem:[#allocation109_spill] sm:$0xff] }
 0x3c7   : > { %v5219_v31 = vsub.f32 %v5187_v60, %v10470_v6  ;;  %v5222_v25 = vsub.f32 %v5190_v2, %v10485_v54  ;;  %v10557_v14 = vmul.f32 %v10268_v22, %v11859_v9  ;;  %v5221_v27 = vsub.f32 %v5189_v53, %v10492_v61  ;;  %v11862_v22 = vld [vmem:[#allocation37_spill] sm:$0xff]  ;;  %v11863_v61 = vld [vmem:[#allocation47_spill] sm:$0xff]  ;;  %v11865_v60 = vld [vmem:[#allocation74_spill] sm:$0xff] }
 0x3c8   : > { %v5191_v5 = vmul.f32 0.5, %v5175_v36  ;;  %v5224_v16 = vsub.f32 %v5192_v10, %v5208_v23  ;;  %v10562_v21 = vmul.f32 %v10286_v28, %v11860_v56  ;;  %v10566_v43 = vmul.f32 %v10296_v19, %v11861_v15  ;;  %5369 = vrot.lane.b32.xlu1 %v5232_v63, %s5932_s29  ;;  %v11867_v10 = vld [vmem:[#allocation116_spill] sm:$0xff] }
 0x3c9   : > { %v10571_v6 = vmul.f32 %v10382_v49, %v10382_v49  ;;  %v10575_v54 = vmul.f32 %v10318_v20, %v11862_v22  ;;  %v10579_v11 = vmul.f32 %v10326_v7, %v11863_v61  ;;  %5367 = vrot.lane.b32.xlu0 %v5231_v40, %s5932_s29  ;;  %v5233_v28 = vmax.f32 %v5217_v55, 0.0  ;;  %v11866_v7 = vld [vmem:[#allocation104_spill] sm:$0xff]  ;;  %v11868_v55 = vld [vmem:[#allocation117_spill] sm:$0xff] }
 0x3ca   : > { %v5223_v34 = vsub.f32 %v5191_v5, %v5207_v3  ;;  %v5236_v19 = vmax.f32 %v5220_v44, 0.0  ;;  %v10584_v18 = vmul.f32 %v10340_v50, %v11864_v37  ;;  %v10588_v12 = vmul.f32 %v10349_v42, %v11865_v60  ;;  %v11872_v37 = vld [vmem:[#allocation57_spill] sm:$0xff] }
 0x3cb   : > { %v5235_v39 = vmax.f32 %v5219_v31, 0.0  ;;  %v5238_v23 = vmax.f32 %v5222_v25, 0.0  ;;  %v10592_v20 = vmul.f32 %v10557_v14, %v10557_v14  ;;  %v10596_v24 = vmul.f32 %v10364_v62, %v11866_v7  ;;  %v11869_v25 = vld [vmem:[#allocation120_spill] sm:$0xff] }
 0x3cc   : > { %v5237_v2 = vmax.f32 %v5221_v27, 0.0  ;;  %v5240_v53 = vmax.f32 %v5224_v16, 0.0  ;;  %v10600_v50 = vmul.f32 %v10562_v21, %v10562_v21  ;;  %v10604_v42 = vmul.f32 %v10566_v43, %v10566_v43  ;;  %5373 = vrot.lane.b32.xlu1 %v5234_v26, %s5932_s29  ;;  %v11870_v16 = vld [vmem:[#allocation121_spill] sm:$0xff] }
 0x3cd   : > { %v5239_v3 = vmax.f32 %v5223_v34, 0.0  ;;  %v10609_v63 = vmul.f32 %v10575_v54, %v10575_v54  ;;  %v10613_v62 = vmul.f32 %v10579_v11, %v10579_v11  ;;  %v10617_v36 = vmul.f32 %v10374_v13, %v11867_v10  ;;  %5371 = vrot.lane.b32.xlu0 %v5233_v28, %s5932_s29 }
 0x3ce   : > { %v10622_v40 = vmul.f32 %v10584_v18, %v10584_v18  ;;  %v10626_v26 = vmul.f32 %v10588_v12, %v10588_v12  ;;  %v10630_v44 = vmul.f32 %v10396_v38, %v11868_v55  ;;  %v5082_v31 = vsub.f32 1.0, %v10316_v41  ;;  %v11871_v38 = vld [vmem:[#allocation14_spill] sm:$0xff] }
 0x3cf   : > { %v10635_v13 = vmul.f32 %v10596_v24, %v10596_v24  ;;  %v10639_v5 = vmul.f32 %v10405_v30, %v11869_v25  ;;  %v5081_v9 = vsub.f32 1.0, %v10347_v58  ;;  %v5084_v27 = vsub.f32 1.0, %v10370_v48 }
 0x3d0   : > { %v10645_v56 = vmul.f32 %v10426_v4, %v11870_v16  ;;  %v10649_v15 = vmul.f32 %v10436_v51, %v11871_v38  ;;  %v10651_v41 = vmul.f32 0.5, %v5082_v31  ;;  %v5083_v34 = vsub.f32 1.0, %v10401_v46  ;;  %5377 = vrot.lane.b32.xlu1 %v5236_v19, %s5932_s29  ;;  %v11873_v16 = vld [vmem:[#allocation83_spill] sm:$0xff] }
 0x3d1   : > { %v10655_v30 = vmul.f32 0.5, %v5081_v9  ;;  %v10657_v22 = vmul.f32 0.5, %v5084_v27  ;;  %v5086_v58 = vsub.f32 1.0, %v10413_v8  ;;  %v5085_v48 = vsub.f32 1.0, %v10434_v17  ;;  %5375 = vrot.lane.b32.xlu0 %v5235_v39, %s5932_s29 }
 0x3d2   : > { %v5130_v4 = vsub.f32 %v10651_v41, %v10571_v6  ;;  %v10664_v51 = vmul.f32 0.5, %v5083_v34  ;;  %v5088_v61 = vsub.f32 1.0, %v10442_v32  ;;  %v5087_v46 = vsub.f32 1.0, %v10460_v35  ;;  %v11874_v34 = vld [vmem:[#allocation87_spill] sm:$0xff] }
 0x3d3   : > { %v5129_v28 = vsub.f32 %v10655_v30, %v10592_v20  ;;  %v5132_v19 = vsub.f32 %v10657_v22, %v10600_v50  ;;  %v10672_v8 = vmul.f32 0.5, %v5086_v58  ;;  %v10674_v17 = vmul.f32 0.5, %v5085_v48 }
 0x3d4   : > { %v10678_v60 = vmul.f32 %v10462_v47, %v11872_v37  ;;  %v5131_v39 = vsub.f32 %v10664_v51, %v10604_v42  ;;  %v10682_v32 = vmul.f32 0.5, %v5088_v61  ;;  %v10684_v35 = vmul.f32 0.5, %v5087_v46  ;;  %5381 = vrot.lane.b32.xlu1 %v5238_v23, %s5932_s29 }
 0x3d5   : > { %v10689_v7 = vmul.f32 %v10617_v36, %v10617_v36  ;;  %v10693_v10 = vmul.f32 %v10630_v44, %v10630_v44  ;;  %v5134_v47 = vsub.f32 %v10672_v8, %v10609_v63  ;;  %v5133_v55 = vsub.f32 %v10674_v17, %v10613_v62  ;;  %5379 = vrot.lane.b32.xlu0 %v5237_v2, %s5932_s29 }
 0x3d6   : > { %v10702_v31 = vmul.f32 %v10639_v5, %v10639_v5  ;;  %v5136_v23 = vsub.f32 %v10682_v32, %v10622_v40  ;;  %v5090_v9 = vsub.f32 1.0, %v10481_v1  ;;  %v10711_v27 = vmul.f32 %v10645_v56, %v10645_v56 }
 0x3d7   : > { %v10715_v38 = vmul.f32 %v10468_v57, %v11873_v16  ;;  %v5089_v2 = vsub.f32 1.0, %v10500_v0  ;;  %v5092_v58 = vsub.f32 1.0, %v11874_v34  ;;  %v10721_v48 = vmul.f32 %v10649_v15, %v10649_v15 }
 0x3d8   : > { %v10725_v61 = vmul.f32 %v10678_v60, %v10678_v60  ;;  %v10727_v1 = vmul.f32 0.5, %v5090_v9  ;;  %v5091_v46 = vsub.f32 1.0, %v10519_v29  ;;  %5385 = vrot.lane.b32.xlu1 %v5240_v53, %s5932_s29  ;;  %v5094_v0 = vsub.f32 1.0, %v10527_v33 }
 0x3d9   : > { %v10731_v57 = vmul.f32 0.5, %v5089_v2  ;;  %v10733_v37 = vmul.f32 0.5, %v5092_v58  ;;  %v5093_v16 = vsub.f32 1.0, %v10531_v45  ;;  %5383 = vrot.lane.b32.xlu0 %v5239_v3, %s5932_s29  ;;  %v5096_v29 = vsub.f32 1.0, %v10538_v52 }
 0x3da   : > { %v5138_v34 = vsub.f32 %v10727_v1, %v10635_v13  ;;  %v10740_v25 = vmul.f32 0.5, %v5091_v46  ;;  %v5095_v53 = vsub.f32 1.0, %v10546_v59  ;;  %v10748_v2 = vmul.f32 0.5, %v5094_v0 }
 0x3db   : > { %v5137_v9 = vsub.f32 %v10731_v57, %v10689_v7  ;;  %v10750_v45 = vmul.f32 0.5, %v5093_v16  ;;  %v10754_v3 = vmul.f32 %v10715_v38, %v10715_v38  ;;  %v10758_v52 = vmul.f32 0.5, %v5096_v29 }
 0x3dc   : > { %v10760_v59 = vmul.f32 0.5, %v5095_v53  ;;  %v5148_v6 = vmax.f32 %v5132_v19, 0.0  ;;  %v5147_v20 = vmax.f32 %v5131_v39, 0.0  ;;  %v5150_v50 = vmax.f32 %v5134_v47, 0.0 }
 0x3dd   : > { %v5149_v42 = vmax.f32 %v5133_v55, 0.0  ;;  %v5152_v63 = vmax.f32 %v5136_v23, 0.0  ;;  %v11875_v62 = vsub.f32 %v10684_v35, %v10626_v26  ;;  %v5154_v40 = vmax.f32 %v5138_v34, 0.0 }
 0x3de   : > { %v5153_v26 = vmax.f32 %v5137_v9, 0.0  ;;  %v11876_v13 = vsub.f32 %v10733_v37, %v10693_v10  ;;  %v11877_v7 = vsub.f32 %v10740_v25, %v10702_v31  ;;  %v11878_v10 = vsub.f32 %v10748_v2, %v10711_v27 }
 0x3df   : > { %v5151_v17 = vmax.f32 %v11875_v62, 0.0  ;;  %v11879_v31 = vsub.f32 %v10750_v45, %v10721_v48 }
 0x3e0   : > { %v5156_v1 = vmax.f32 %v11876_v13, 0.0  ;;  %v5155_v57 = vmax.f32 %v11877_v7, 0.0  ;;  %v5158_v37 = vmax.f32 %v11878_v10, 0.0 }
 0x3e1   : > { %v5157_v25 = vmax.f32 %v11879_v31, 0.0 }
 0x403   : > { %v5260_v29 = vpop.permute.xlu1 %5259 }
 0x404   : > { %v5307_v53 = vsel %vm5305_vm12, %v10382_v49, %v5260_v29 }
 0x405   : > { %5324 = vst.msk [vmem:[%s10774_s5 + $0x8] sm:$0xff] %vm5322_vm11, %v5307_v53 }
 0x40a   : > { %v5258_v16 = vpop.permute.xlu0 %5257 }
 0x40b   : > { %v5306_v33 = vsel %vm5305_vm12, %v10557_v14, %v5258_v16 }
 0x40c   : > { %5323 = vst.msk [vmem:[%s10774_s5] sm:$0xff] %vm5322_vm11, %v5306_v33 }
 0x40e   : > { %v5262_v58 = vpop.permute.xlu0 %5261 }
 0x40f   : > { %v5264_v0 = vpop.permute.xlu1 %5263  ;;  %v5308_v49 = vsel %vm5305_vm12, %v10566_v43, %v5262_v58 }
 0x410   : > { %v5309_v46 = vsel %vm5305_vm12, %v10562_v21, %v5264_v0  ;;  %5325 = vst.msk [vmem:[%s10774_s5 + $0x10] sm:$0xff] %vm5322_vm11, %v5308_v49 }
 0x411   : > { %5326 = vst.msk [vmem:[%s10774_s5 + $0x18] sm:$0xff] %vm5322_vm11, %v5309_v46 }
 0x412   : > { %v5266_v33 = vpop.permute.xlu0 %5265 }
 0x413   : > { %v5310_v21 = vsel %vm5305_vm12, %v10579_v11, %v5266_v33 }
 0x414   : > { %v5268_v29 = vpop.permute.xlu1 %5267  ;;  %5327 = vst.msk [vmem:[%s10774_s5 + $0x20] sm:$0xff] %vm5322_vm11, %v5310_v21 }
 0x415   : > { %v5311_v14 = vsel %vm5305_vm12, %v10575_v54, %v5268_v29 }
 0x416   : > { %5328 = vst.msk [vmem:[%s10774_s5 + $0x28] sm:$0xff] %vm5322_vm11, %v5311_v14 }
 0x418   : > { %v5272_v46 = vpop.permute.xlu1 %5271 }
 0x419   : > { %v5313_v43 = vsel %vm5305_vm12, %v10584_v18, %v5272_v46  ;;  %v5270_v58 = vpop.permute.xlu0 %5269 }
 0x41a   : > { %5330 = vst.msk [vmem:[%s10774_s5 + $0x38] sm:$0xff] %vm5322_vm11, %v5313_v43  ;;  %v5312_v54 = vsel %vm5305_vm12, %v10588_v12, %v5270_v58 }
 0x41b   : > { %5329 = vst.msk [vmem:[%s10774_s5 + $0x30] sm:$0xff] %vm5322_vm11, %v5312_v54 }
 0x41c   : > { %v5276_v0 = vpop.permute.xlu1 %5275 }
 0x41d   : > { %v5315_v11 = vsel %vm5305_vm12, %v10596_v24, %v5276_v0  ;;  %v5274_v16 = vpop.permute.xlu0 %5273 }
 0x41e   : > { %5332 = vst.msk [vmem:[%s10774_s5 + $0x48] sm:$0xff] %vm5322_vm11, %v5315_v11  ;;  %v5314_v18 = vsel %vm5305_vm12, %v10617_v36, %v5274_v16 }
 0x41f   : > { %5331 = vst.msk [vmem:[%s10774_s5 + $0x40] sm:$0xff] %vm5322_vm11, %v5314_v18 }
 0x421   : > { %v5280_v53 = vpop.permute.xlu1 %5279 }
 0x422   : > { %v5317_v12 = vsel %vm5305_vm12, %v10630_v44, %v5280_v53  ;;  %v5278_v49 = vpop.permute.xlu0 %5277 }
 0x423   : > { %5334 = vst.msk [vmem:[%s10774_s5 + $0x58] sm:$0xff] %vm5322_vm11, %v5317_v12  ;;  %v5316_v24 = vsel %vm5305_vm12, %v10639_v5, %v5278_v49 }
 0x424   : > { %5333 = vst.msk [vmem:[%s10774_s5 + $0x50] sm:$0xff] %vm5322_vm11, %v5316_v24  ;;  %v11880_v24 = vsub.f32 %v10758_v52, %v10725_v61 }
 0x426   : > { %v5284_v29 = vpop.permute.xlu1 %5283  ;;  %v5160_v27 = vmax.f32 %v11880_v24, 0.0 }
 0x427   : > { %v5319_v36 = vsel %vm5305_vm12, %v10645_v56, %v5284_v29  ;;  %v5282_v14 = vpop.permute.xlu0 %5281  ;;  %v5146_v56 = vmax.f32 %v5130_v4, 0.0  ;;  %v11881_v29 = vsub.f32 %v10760_v59, %v10754_v3 }
 0x428   : > { %5336 = vst.msk [vmem:[%s10774_s5 + $0x68] sm:$0xff] %vm5322_vm11, %v5319_v36  ;;  %v5318_v44 = vsel %vm5305_vm12, %v10649_v15, %v5282_v14 }
 0x429   : > { %5335 = vst.msk [vmem:[%s10774_s5 + $0x60] sm:$0xff] %vm5322_vm11, %v5318_v44  ;;  %v5159_v36 = vmax.f32 %v11881_v29, 0.0 }
 0x42a   : > { %v5288_v33 = vpop.permute.xlu1 %5287 }
 0x42b   : > { %v5321_v21 = vsel %vm5305_vm12, %v10678_v60, %v5288_v33  ;;  %v5286_v46 = vpop.permute.xlu0 %5285  ;;  %v5145_v60 = vmax.f32 %v5129_v28, 0.0 }
 0x42c   : > { %5338 = vst.msk [vmem:[%s10774_s5 + $0x78] sm:$0xff] %vm5322_vm11, %v5321_v21  ;;  %v5320_v5 = vsel %vm5305_vm12, %v10715_v38, %v5286_v46 }
 0x42d   : > { %5337 = vst.msk [vmem:[%s10774_s5 + $0x70] sm:$0xff] %vm5322_vm11, %v5320_v5 }
 0x42e   : > { %v5358_v15 = vpop.permute.xlu1 %5357 }
 0x42f   : > { %v5404_v38 = vsel %vm5305_vm12, %v5146_v56, %v5358_v15  ;;  %v5356_v43 = vpop.permute.xlu0 %5355 }
 0x430   : > { %5420 = vst.msk [vmem:[%s10844_s8 + $0x8] sm:$0xff] %vm5322_vm11, %v5404_v38  ;;  %v5403_v58 = vsel %vm5305_vm12, %v5145_v60, %v5356_v43 }
 0x431   : > { %5419 = vst.msk [vmem:[%s10844_s8] sm:$0xff] %vm5322_vm11, %v5403_v58 }
 0x432   : > { %v5362_v41 = vpop.permute.xlu1 %5361 }
 0x433   : > { %v5406_v30 = vsel %vm5305_vm12, %v5148_v6, %v5362_v41  ;;  %v5360_v4 = vpop.permute.xlu0 %5359 }
 0x434   : > { %5422 = vst.msk [vmem:[%s10844_s8 + $0x18] sm:$0xff] %vm5322_vm11, %v5406_v30  ;;  %v5405_v28 = vsel %vm5305_vm12, %v5147_v20, %v5360_v4 }
 0x435   : > { %5421 = vst.msk [vmem:[%s10844_s8 + $0x10] sm:$0xff] %vm5322_vm11, %v5405_v28 }
 0x436   : > { %v5366_v22 = vpop.permute.xlu1 %5365 }
 0x437   : > { %v5408_v51 = vsel %vm5305_vm12, %v5150_v50, %v5366_v22  ;;  %v5364_v19 = vpop.permute.xlu0 %5363 }
 0x438   : > { %5424 = vst.msk [vmem:[%s10844_s8 + $0x28] sm:$0xff] %vm5322_vm11, %v5408_v51  ;;  %v5407_v39 = vsel %vm5305_vm12, %v5149_v42, %v5364_v19 }
 0x439   : > { %5423 = vst.msk [vmem:[%s10844_s8 + $0x20] sm:$0xff] %vm5322_vm11, %v5407_v39 }
 0x43a   : > { %v5370_v8 = vpop.permute.xlu1 %5369 }
 0x43b   : > { %v5410_v47 = vsel %vm5305_vm12, %v5152_v63, %v5370_v8  ;;  %v5368_v55 = vpop.permute.xlu0 %5367 }
 0x43c   : > { %5426 = vst.msk [vmem:[%s10844_s8 + $0x38] sm:$0xff] %vm5322_vm11, %v5410_v47  ;;  %v5409_v54 = vsel %vm5305_vm12, %v5151_v17, %v5368_v55 }
 0x43d   : > { %5425 = vst.msk [vmem:[%s10844_s8 + $0x30] sm:$0xff] %vm5322_vm11, %v5409_v54 }
 0x43e   : > { %v5374_v32 = vpop.permute.xlu1 %5373 }
 0x43f   : > { %v5412_v35 = vsel %vm5305_vm12, %v5154_v40, %v5374_v32  ;;  %v5372_v23 = vpop.permute.xlu0 %5371 }
 0x440   : > { %5428 = vst.msk [vmem:[%s10844_s8 + $0x48] sm:$0xff] %vm5322_vm11, %v5412_v35  ;;  %v5411_v0 = vsel %vm5305_vm12, %v5153_v26, %v5372_v23 }
 0x441   : > { %5427 = vst.msk [vmem:[%s10844_s8 + $0x40] sm:$0xff] %vm5322_vm11, %v5411_v0 }
 0x442   : > { %v5378_v34 = vpop.permute.xlu1 %5377 }
 0x443   : > { %v5414_v9 = vsel %vm5305_vm12, %v5156_v1, %v5378_v34  ;;  %v5376_v11 = vpop.permute.xlu0 %5375 }
 0x444   : > { %5430 = vst.msk [vmem:[%s10844_s8 + $0x58] sm:$0xff] %vm5322_vm11, %v5414_v9  ;;  %v5413_v16 = vsel %vm5305_vm12, %v5155_v57, %v5376_v11 }
 0x445   : > { %5429 = vst.msk [vmem:[%s10844_s8 + $0x50] sm:$0xff] %vm5322_vm11, %v5413_v16 }
 0x446   : > { %v5382_v18 = vpop.permute.xlu1 %5381 }
 0x447   : > { %v5416_v53 = vsel %vm5305_vm12, %v5158_v37, %v5382_v18  ;;  %v5380_v12 = vpop.permute.xlu0 %5379 }
 0x448   : > { %5432 = vst.msk [vmem:[%s10844_s8 + $0x68] sm:$0xff] %vm5322_vm11, %v5416_v53  ;;  %v5415_v49 = vsel %vm5305_vm12, %v5157_v25, %v5380_v12 }
 0x449   : > { %5431 = vst.msk [vmem:[%s10844_s8 + $0x60] sm:$0xff] %vm5322_vm11, %v5415_v49 }
 0x44a   : > { %v5386_v2 = vpop.permute.xlu1 %5385 }
 0x44b   : > { %v5418_v48 = vsel %vm5305_vm12, %v5160_v27, %v5386_v2  ;;  %v5384_v45 = vpop.permute.xlu0 %5383 }
 0x44c   : > { %5434 = vst.msk [vmem:[%s10844_s8 + $0x78] sm:$0xff] %vm5322_vm11, %v5418_v48  ;;  %v5417_v14 = vsel %vm5305_vm12, %v5159_v36, %v5384_v45 }
 0x44d   : > { %5433 = vst.msk [vmem:[%s10844_s8 + $0x70] sm:$0xff] %vm5322_vm11, %v5417_v14 }
 0x44e PF: > { %s14_s12 = sadd.s32 1, %s5917_s12  }
 0x44f   : > { %p11_p4 = scmp.ge.s32.totalorder %s14_s12, 4  }
 0x451   :  { %13 = sbr.rel (!%p11_p4) target bundleno = 1 (0x1), region = 73 }

</bundles_post_ra>
